<compile_context>
chip_gen: v6e
topology: v6e:2x2x1
jax: 0.10.0
libtpu: 0.0.40
codegen_flags: <defaults>
</compile_context>

<pallas_src>
from functools import partial

import numpy as np
import jax
import jax.numpy as jnp
from jax import lax
from jax.experimental import pallas as pl
from jax.experimental.pallas import tpu as pltpu


# ----------------------------- model constants ----------------------------- #

FORECASTERS = 6
SERIES_LEN = 21
N_IN = [11, 32, 64]
N_OUT = [32, 64, 128]
KSIZE = [5, 5, 3]
PADS = [(k - 1) // 2 for k in KSIZE]              # "same" padding, stride=1, dil=1
LP = [SERIES_LEN + k - 1 for k in KSIZE]          # padded positions per layer: 25,25,23
LIN_IN = SERIES_LEN * N_OUT[-1] + 2 * FORECASTERS  # 21*128 + 12 = 2700


def _pick_tb(batch):
    """Samples per grid step.  TB*21 is the MXU M dim (TB=8 -> 168 rows, fine
    for v5e/v6e; TB>=16 -> >=336 rows, covers v7x's 256-wide MXU).  Keep the
    grid length >= 2 where possible so the "parallel" axis can use both v7x
    TensorCores."""
    for tb in (64, 32, 16, 8):
        if batch >= 2 * tb:
            return tb
    return 8


# ----------------------------- fused Pallas kernel ----------------------------- #

def fused_forward_kernel(x_ref, p_ref,
                         w0_ref, b0_ref, w1_ref, b1_ref, w2_ref, b2_ref,
                         wh_ref, wp_ref, bl_ref,
                         o_ref,
                         xp1_ref, xp2_ref, *, tb):
    """One grid step = TB samples, all activations position-major 2-D slabs.

    x_ref : (1, LP0*TB, 11)   pre-padded position-major input slab
    p_ref : (1, TB, 2F)       [preds | mask]
    wK/bK : (K, Cin, Cout) / (1, Cout)
    wh    : (L, F, C)         head weight for the conv features (lane-dense C=128)
    wp    : (2F, F)           head weight for the preds columns
    bl    : (1, F)
    o_ref : (1, TB, 1)
    xp1/xp2: padded position-major scratch slabs for conv layers 1 / 2
    """
    L = SERIES_LEN
    F = FORECASTERS
    nr = L * tb                                    # valid (position, sample) rows

    def conv_same(read, w_ref, b_ref):
        ksz, _, cout = w_ref.shape
        acc = jnp.zeros((nr, cout), jnp.float32)
        for k in range(ksz):                       # each tap: one contiguous slice
            acc = acc + jnp.dot(read(k), w_ref[k],  # + one (nr, Cin)@(Cin, Cout) MXU op
                                preferred_element_type=jnp.float32)
        return acc + b_ref[...]

    def stage(dst_ref, h, pad):
        """Write conv output into the next layer's padded scratch.
        Halo rows are re-zeroed every step (cheap, megacore-safe); the interior
        is fully overwritten every step."""
        lead = pad * tb
        total = dst_ref.shape[0]
        width = dst_ref.shape[1]
        dst_ref[0:lead, :] = jnp.zeros((lead, width), jnp.float32)
        dst_ref[lead + nr:total, :] = jnp.zeros((total - lead - nr, width), jnp.float32)
        dst_ref[lead:lead + nr, :] = h

    # ---- conv 0 (input arrives pre-padded & position-major from the wrapper) ----
    h = conv_same(lambda k: x_ref[0, k * tb:k * tb + nr, :], w0_ref, b0_ref)   # (nr, 32)
    stage(xp1_ref, h, PADS[1])

    # ---- conv 1 ----
    h = conv_same(lambda k: xp1_ref[k * tb:k * tb + nr, :], w1_ref, b1_ref)    # (nr, 64)
    stage(xp2_ref, h, PADS[2])

    # ---- conv 2 ----
    h = conv_same(lambda k: xp2_ref[k * tb:k * tb + nr, :], w2_ref, b2_ref)    # (nr, 128)

    # ---- head: one batched contraction over (l, c) replaces the flatten loop ----
    h3 = h.reshape(L, tb, h.shape[1])                       # (L, TB, 128); tb % 8 == 0
    lc = jnp.einsum("lbc,lfc->lbf", h3, wh_ref[...],
                    preferred_element_type=jnp.float32)     # (L, TB, F)
    p = p_ref[0]                                            # (TB, 2F)
    logits = (jnp.sum(lc, axis=0)
              + jnp.dot(p, wp_ref[...], preferred_element_type=jnp.float32)
              + bl_ref[...])                                # (TB, F)

    # ---- masked softmax + weighted sum ----
    preds = p[:, :F]
    mask = p[:, F:]
    e = jnp.exp(logits)           # no max-subtraction: matches the reference model
    m = e * mask
    # NOTE: m * pl.reciprocal(denom, approx=True) would move the divide onto the
    # EUP slot; plain division is kept for exact parity with the reference.
    w = m / (jnp.sum(m, axis=-1, keepdims=True) + 1e-5)
    o_ref[0, :, :] = jnp.sum(preds * w, axis=-1, keepdims=True)   # (TB, 1)


# ----------------------------- wrapper ----------------------------- #

@jax.jit
def ensembler_forward(kp, x, preds_to_ensemble):
    """kp: pre-laid-out params (see preprocess_params); x: (B, 21, 11);
    preds_to_ensemble: (B, 2F).  Returns (B,)."""
    B, L, cin = x.shape
    assert L == SERIES_LEN and cin == N_IN[0]
    F = FORECASTERS
    tb = _pick_tb(B)
    G = -(-B // tb)
    Bp = G * tb
    if Bp != B:                                   # pad batch to a multiple of TB
        x = jnp.pad(x, ((0, Bp - B), (0, 0), (0, 0)))
        preds_to_ensemble = jnp.pad(preds_to_ensemble, ((0, Bp - B), (0, 0)))

    # Build the position-major, "same"-padded input slab: row = position*TB + sample.
    xt = x.reshape(G, tb, L, cin).transpose(0, 2, 1, 3)               # (G, L, TB, Cin)
    xt = jnp.pad(xt, ((0, 0), (PADS[0], KSIZE[0] - 1 - PADS[0]), (0, 0), (0, 0)))
    xslab = xt.reshape(G, LP[0] * tb, cin)                            # (G, LP0*TB, Cin)
    pblk = preds_to_ensemble.reshape(G, tb, 2 * F)

    out = pl.pallas_call(
        partial(fused_forward_kernel, tb=tb),
        out_shape=jax.ShapeDtypeStruct((G, tb, 1), jnp.float32),
        grid=(G,),
        in_specs=[
            pl.BlockSpec((1, LP[0] * tb, cin), lambda i: (i, 0, 0)),          # x slab
            pl.BlockSpec((1, tb, 2 * F), lambda i: (i, 0, 0)),                # preds
            pl.BlockSpec((KSIZE[0], N_IN[0], N_OUT[0]), lambda i: (0, 0, 0)),
            pl.BlockSpec((1, N_OUT[0]), lambda i: (0, 0)),
            pl.BlockSpec((KSIZE[1], N_IN[1], N_OUT[1]), lambda i: (0, 0, 0)),
            pl.BlockSpec((1, N_OUT[1]), lambda i: (0, 0)),
            pl.BlockSpec((KSIZE[2], N_IN[2], N_OUT[2]), lambda i: (0, 0, 0)),
            pl.BlockSpec((1, N_OUT[2]), lambda i: (0, 0)),
            pl.BlockSpec((SERIES_LEN, FORECASTERS, N_OUT[2]), lambda i: (0, 0, 0)),  # wh
            pl.BlockSpec((2 * F, F), lambda i: (0, 0)),                              # wp
            pl.BlockSpec((1, F), lambda i: (0, 0)),                                  # bl
        ],
        out_specs=pl.BlockSpec((1, tb, 1), lambda i: (i, 0, 0)),
        scratch_shapes=[
            pltpu.VMEM((LP[1] * tb, N_IN[1]), jnp.float32),   # padded input, layer 1
            pltpu.VMEM((LP[2] * tb, N_IN[2]), jnp.float32),   # padded input, layer 2
        ],
        compiler_params=pltpu.CompilerParams(
            dimension_semantics=("parallel",)),
    )(xslab, pblk, kp["w0"], kp["b0"], kp["w1"], kp["b1"], kp["w2"], kp["b2"],
      kp["wh"], kp["wp"], kp["bl"])

    return out.reshape(Bp)[:B]


# ----------------------------- parameters ----------------------------- #

def init_params(key):
    """Torch-layout parameters (Conv1d: (Cout, Cin, K); Linear: (F, in))."""
    params = {}
    keys = jax.random.split(key, 2 * len(N_IN) + 2)
    for i, (cin, cout, k) in enumerate(zip(N_IN, N_OUT, KSIZE)):
        bound = 1.0 / np.sqrt(cin * k)
        params[f"conv{i}_w"] = jax.random.uniform(
            keys[2 * i], (cout, cin, k), minval=-bound, maxval=bound, dtype=jnp.float32)
        params[f"conv{i}_b"] = jax.random.uniform(
            keys[2 * i + 1], (cout,), minval=-bound, maxval=bound, dtype=jnp.float32)
    bound = 1.0 / np.sqrt(LIN_IN)
    params["last_w"] = jax.random.uniform(
        keys[-2], (FORECASTERS, LIN_IN), minval=-bound, maxval=bound, dtype=jnp.float32)
    params["last_b"] = jax.random.uniform(
        keys[-1], (FORECASTERS,), minval=-bound, maxval=bound, dtype=jnp.float32)
    return params


def preprocess_params(params):
    """One-time weight re-layout into kernel-friendly form (hoisted out of the
    jitted forward path)."""
    kp = {}
    for i in range(len(N_IN)):
        kp[f"w{i}"] = jnp.transpose(params[f"conv{i}_w"], (2, 1, 0))   # (K, Cin, Cout)
        kp[f"b{i}"] = params[f"conv{i}_b"].reshape(1, -1)              # (1, Cout)
    lw = params["last_w"]                                              # (F, 2700)
    wc = lw[:, :SERIES_LEN * N_OUT[-1]].reshape(FORECASTERS, SERIES_LEN, N_OUT[-1])
    kp["wh"] = jnp.transpose(wc, (1, 0, 2))                            # (L, F, C) lane-dense
    kp["wp"] = lw[:, SERIES_LEN * N_OUT[-1]:].T                        # (2F, F)
    kp["bl"] = params["last_b"].reshape(1, -1)                         # (1, F)
    return {k: jnp.asarray(v, jnp.float32) for k, v in kp.items()}


# ----------------------------- pure-JAX reference ----------------------------- #

def reference_forward(params, x, preds_to_ensemble):
    h = x
    for i in range(len(N_IN)):
        hc = jnp.transpose(h, (0, 2, 1))                 # (B, C, L)
        out = lax.conv_general_dilated(
            hc, params[f"conv{i}_w"], window_strides=(1,),
            padding=[(PADS[i], PADS[i])],
            dimension_numbers=("NCH", "OIH", "NCH"))
        out = out + params[f"conv{i}_b"][None, :, None]
        h = jnp.transpose(out, (0, 2, 1))                # (B, L, C)
    B = h.shape[0]
    flat = h.reshape(B, -1)
    z = jnp.concatenate([flat, preds_to_ensemble], axis=1)
    logits = z @ params["last_w"].T + params["last_b"]
    preds = preds_to_ensemble[:, :FORECASTERS]
    mask = preds_to_ensemble[:, FORECASTERS:]
    exps = jnp.exp(logits)
    masked = exps * mask
    weights = masked / (jnp.sum(masked, axis=-1, keepdims=True) + 1e-5)
    return jnp.sum(preds * weights, axis=1)


# ----------------------------- main ----------------------------- #

if __name__ == "__main__":
    key = jax.random.PRNGKey(0)
    kparam, kx, kpred, kmask = jax.random.split(key, 4)

    B = 10                                        # exercises batch padding + grid=2
    params = init_params(kparam)                  # torch layout (for reference)
    kparams = preprocess_params(params)           # kernel layout (done once)

    x = jax.random.normal(kx, (B, SERIES_LEN, N_IN[0]), dtype=jnp.float32)
    preds = jax.random.normal(kpred, (B, FORECASTERS), dtype=jnp.float32)
    mask = (jax.random.uniform(kmask, (B, FORECASTERS)) > 0.3).astype(jnp.float32)
    preds_to_ensemble = jnp.concatenate([preds, mask], axis=1)       # (B, 2F)

    out = jax.block_until_ready(ensembler_forward(kparams, x, preds_to_ensemble))

    ref = reference_forward(params, x, preds_to_ensemble)
    np.testing.assert_allclose(np.asarray(out), np.asarray(ref), rtol=1e-3, atol=1e-4)

    print("KERNEL_OK")
</pallas_src>

<mosaic_0001>
module attributes {stable_mosaic.version = 11 : i64} {
  func.func @fused_forward_kernel(%arg0: i32, %arg1: memref<1x200x11xf32, #tpu.memory_space<vmem>>, %arg2: memref<1x8x12xf32, #tpu.memory_space<vmem>>, %arg3: memref<5x11x32xf32, #tpu.memory_space<vmem>>, %arg4: memref<1x32xf32, #tpu.memory_space<vmem>>, %arg5: memref<5x32x64xf32, #tpu.memory_space<vmem>>, %arg6: memref<1x64xf32, #tpu.memory_space<vmem>>, %arg7: memref<3x64x128xf32, #tpu.memory_space<vmem>>, %arg8: memref<1x128xf32, #tpu.memory_space<vmem>>, %arg9: memref<21x6x128xf32, #tpu.memory_space<vmem>>, %arg10: memref<12x6xf32, #tpu.memory_space<vmem>>, %arg11: memref<1x6xf32, #tpu.memory_space<vmem>>, %arg12: memref<1x8x1xf32, #tpu.memory_space<vmem>>, %arg13: memref<200x32xf32, #tpu.memory_space<vmem>>, %arg14: memref<184x64xf32, #tpu.memory_space<vmem>>) attributes {dimension_semantics = [#tpu.dimension_semantics<parallel>], iteration_bounds = array<i64: 2>, scalar_prefetch = 0 : i64, scratch_operands = 2 : i64, tpu.core_type = #tpu.core_type<tc>, window_params = [{transform_indices = @transform_0, window_bounds = array<i64: 1, 200, 11>}, {transform_indices = @transform_1, window_bounds = array<i64: 1, 8, 12>}, {pipeline_mode = #tpu.pipeline_mode<synchronous>, transform_indices = @transform_2, window_bounds = array<i64: 5, 11, 32>}, {pipeline_mode = #tpu.pipeline_mode<synchronous>, transform_indices = @transform_3, window_bounds = array<i64: 1, 32>}, {pipeline_mode = #tpu.pipeline_mode<synchronous>, transform_indices = @transform_4, window_bounds = array<i64: 5, 32, 64>}, {pipeline_mode = #tpu.pipeline_mode<synchronous>, transform_indices = @transform_5, window_bounds = array<i64: 1, 64>}, {pipeline_mode = #tpu.pipeline_mode<synchronous>, transform_indices = @transform_6, window_bounds = array<i64: 3, 64, 128>}, {pipeline_mode = #tpu.pipeline_mode<synchronous>, transform_indices = @transform_7, window_bounds = array<i64: 1, 128>}, {pipeline_mode = #tpu.pipeline_mode<synchronous>, transform_indices = @transform_8, window_bounds = array<i64: 21, 6, 128>}, {pipeline_mode = #tpu.pipeline_mode<synchronous>, transform_indices = @transform_9, window_bounds = array<i64: 12, 6>}, {pipeline_mode = #tpu.pipeline_mode<synchronous>, transform_indices = @transform_10, window_bounds = array<i64: 1, 6>}, {transform_indices = @transform_11, window_bounds = array<i64: 1, 8, 1>}]} {
    %cst = arith.constant 0.000000e+00 : f32
    %0 = vector.broadcast %cst : f32 to vector<168x32xf32>
    %c0 = arith.constant 0 : index
    %c0_0 = arith.constant 0 : index
    %c0_1 = arith.constant 0 : index
    %1 = vector.load %arg1[%c0, %c0_0, %c0_1] : memref<1x200x11xf32, #tpu.memory_space<vmem>>, vector<1x168x11xf32>
    %2 = vector.shape_cast %1 : vector<1x168x11xf32> to vector<168x11xf32>
    %c0_2 = arith.constant 0 : index
    %c0_3 = arith.constant 0 : index
    %c0_4 = arith.constant 0 : index
    %3 = vector.load %arg3[%c0_2, %c0_3, %c0_4] : memref<5x11x32xf32, #tpu.memory_space<vmem>>, vector<1x11x32xf32>
    %4 = vector.shape_cast %3 : vector<1x11x32xf32> to vector<11x32xf32>
    %cst_5 = arith.constant dense<0.000000e+00> : vector<168x32xf32>
    %5 = tpu.matmul %2, %4, %cst_5 {dimension_numbers = #tpu.dot_dimension_numbers<[1], [0], [0], [1], [0, 0, 1, 1], [], []>} : vector<168x11xf32>, vector<11x32xf32>, vector<168x32xf32> -> vector<168x32xf32>
    %6 = arith.addf %0, %5 : vector<168x32xf32>
    %c0_6 = arith.constant 0 : index
    %c8 = arith.constant 8 : index
    %c0_7 = arith.constant 0 : index
    %7 = vector.load %arg1[%c0_6, %c8, %c0_7] : memref<1x200x11xf32, #tpu.memory_space<vmem>>, vector<1x168x11xf32>
    %8 = vector.shape_cast %7 : vector<1x168x11xf32> to vector<168x11xf32>
    %c1 = arith.constant 1 : index
    %c0_8 = arith.constant 0 : index
    %c0_9 = arith.constant 0 : index
    %9 = vector.load %arg3[%c1, %c0_8, %c0_9] : memref<5x11x32xf32, #tpu.memory_space<vmem>>, vector<1x11x32xf32>
    %10 = vector.shape_cast %9 : vector<1x11x32xf32> to vector<11x32xf32>
    %cst_10 = arith.constant dense<0.000000e+00> : vector<168x32xf32>
    %11 = tpu.matmul %8, %10, %cst_10 {dimension_numbers = #tpu.dot_dimension_numbers<[1], [0], [0], [1], [0, 0, 1, 1], [], []>} : vector<168x11xf32>, vector<11x32xf32>, vector<168x32xf32> -> vector<168x32xf32>
    %12 = arith.addf %6, %11 : vector<168x32xf32>
    %c0_11 = arith.constant 0 : index
    %c16 = arith.constant 16 : index
    %c0_12 = arith.constant 0 : index
    %13 = vector.load %arg1[%c0_11, %c16, %c0_12] : memref<1x200x11xf32, #tpu.memory_space<vmem>>, vector<1x168x11xf32>
    %14 = vector.shape_cast %13 : vector<1x168x11xf32> to vector<168x11xf32>
    %c2 = arith.constant 2 : index
    %c0_13 = arith.constant 0 : index
    %c0_14 = arith.constant 0 : index
    %15 = vector.load %arg3[%c2, %c0_13, %c0_14] : memref<5x11x32xf32, #tpu.memory_space<vmem>>, vector<1x11x32xf32>
    %16 = vector.shape_cast %15 : vector<1x11x32xf32> to vector<11x32xf32>
    %cst_15 = arith.constant dense<0.000000e+00> : vector<168x32xf32>
    %17 = tpu.matmul %14, %16, %cst_15 {dimension_numbers = #tpu.dot_dimension_numbers<[1], [0], [0], [1], [0, 0, 1, 1], [], []>} : vector<168x11xf32>, vector<11x32xf32>, vector<168x32xf32> -> vector<168x32xf32>
    %18 = arith.addf %12, %17 : vector<168x32xf32>
    %c0_16 = arith.constant 0 : index
    %c24 = arith.constant 24 : index
    %c0_17 = arith.constant 0 : index
    %19 = vector.load %arg1[%c0_16, %c24, %c0_17] : memref<1x200x11xf32, #tpu.memory_space<vmem>>, vector<1x168x11xf32>
    %20 = vector.shape_cast %19 : vector<1x168x11xf32> to vector<168x11xf32>
    %c3 = arith.constant 3 : index
    %c0_18 = arith.constant 0 : index
    %c0_19 = arith.constant 0 : index
    %21 = vector.load %arg3[%c3, %c0_18, %c0_19] : memref<5x11x32xf32, #tpu.memory_space<vmem>>, vector<1x11x32xf32>
    %22 = vector.shape_cast %21 : vector<1x11x32xf32> to vector<11x32xf32>
    %cst_20 = arith.constant dense<0.000000e+00> : vector<168x32xf32>
    %23 = tpu.matmul %20, %22, %cst_20 {dimension_numbers = #tpu.dot_dimension_numbers<[1], [0], [0], [1], [0, 0, 1, 1], [], []>} : vector<168x11xf32>, vector<11x32xf32>, vector<168x32xf32> -> vector<168x32xf32>
    %24 = arith.addf %18, %23 : vector<168x32xf32>
    %c0_21 = arith.constant 0 : index
    %c32 = arith.constant 32 : index
    %c0_22 = arith.constant 0 : index
    %25 = vector.load %arg1[%c0_21, %c32, %c0_22] : memref<1x200x11xf32, #tpu.memory_space<vmem>>, vector<1x168x11xf32>
    %26 = vector.shape_cast %25 : vector<1x168x11xf32> to vector<168x11xf32>
    %c4 = arith.constant 4 : index
    %c0_23 = arith.constant 0 : index
    %c0_24 = arith.constant 0 : index
    %27 = vector.load %arg3[%c4, %c0_23, %c0_24] : memref<5x11x32xf32, #tpu.memory_space<vmem>>, vector<1x11x32xf32>
    %28 = vector.shape_cast %27 : vector<1x11x32xf32> to vector<11x32xf32>
    %cst_25 = arith.constant dense<0.000000e+00> : vector<168x32xf32>
    %29 = tpu.matmul %26, %28, %cst_25 {dimension_numbers = #tpu.dot_dimension_numbers<[1], [0], [0], [1], [0, 0, 1, 1], [], []>} : vector<168x11xf32>, vector<11x32xf32>, vector<168x32xf32> -> vector<168x32xf32>
    %30 = arith.addf %24, %29 : vector<168x32xf32>
    %c0_26 = arith.constant 0 : index
    %c0_27 = arith.constant 0 : index
    %31 = vector.load %arg4[%c0_26, %c0_27] : memref<1x32xf32, #tpu.memory_space<vmem>>, vector<1x32xf32>
    %32 = vector.broadcast %31 : vector<1x32xf32> to vector<168x32xf32>
    %33 = arith.addf %30, %32 : vector<168x32xf32>
    %cst_28 = arith.constant 0.000000e+00 : f32
    %34 = vector.broadcast %cst_28 : f32 to vector<16x32xf32>
    %c0_29 = arith.constant 0 : index
    %c0_30 = arith.constant 0 : index
    %35 = vector.load %arg13[%c0_29, %c0_30] : memref<200x32xf32, #tpu.memory_space<vmem>>, vector<16x32xf32>
    tpu.vector_store %arg13[%c0_29, %c0_30], %34 {strides = array<i32>} : memref<200x32xf32, #tpu.memory_space<vmem>>, vector<16x32xf32>,
    %cst_31 = arith.constant 0.000000e+00 : f32
    %36 = vector.broadcast %cst_31 : f32 to vector<16x32xf32>
    %c184 = arith.constant 184 : index
    %c0_32 = arith.constant 0 : index
    %37 = vector.load %arg13[%c184, %c0_32] : memref<200x32xf32, #tpu.memory_space<vmem>>, vector<16x32xf32>
    tpu.vector_store %arg13[%c184, %c0_32], %36 {strides = array<i32>} : memref<200x32xf32, #tpu.memory_space<vmem>>, vector<16x32xf32>,
    %c16_33 = arith.constant 16 : index
    %c0_34 = arith.constant 0 : index
    %38 = vector.load %arg13[%c16_33, %c0_34] : memref<200x32xf32, #tpu.memory_space<vmem>>, vector<168x32xf32>
    tpu.vector_store %arg13[%c16_33, %c0_34], %33 {strides = array<i32>} : memref<200x32xf32, #tpu.memory_space<vmem>>, vector<168x32xf32>,
    %cst_35 = arith.constant 0.000000e+00 : f32
    %39 = vector.broadcast %cst_35 : f32 to vector<168x64xf32>
    %c0_36 = arith.constant 0 : index
    %c0_37 = arith.constant 0 : index
    %40 = vector.load %arg13[%c0_36, %c0_37] : memref<200x32xf32, #tpu.memory_space<vmem>>, vector<168x32xf32>
    %c0_38 = arith.constant 0 : index
    %c0_39 = arith.constant 0 : index
    %c0_40 = arith.constant 0 : index
    %41 = vector.load %arg5[%c0_38, %c0_39, %c0_40] : memref<5x32x64xf32, #tpu.memory_space<vmem>>, vector<1x32x64xf32>
    %42 = vector.shape_cast %41 : vector<1x32x64xf32> to vector<32x64xf32>
    %cst_41 = arith.constant dense<0.000000e+00> : vector<168x64xf32>
    %43 = tpu.matmul %40, %42, %cst_41 {dimension_numbers = #tpu.dot_dimension_numbers<[1], [0], [0], [1], [0, 0, 1, 1], [], []>} : vector<168x32xf32>, vector<32x64xf32>, vector<168x64xf32> -> vector<168x64xf32>
    %44 = arith.addf %39, %43 : vector<168x64xf32>
    %c8_42 = arith.constant 8 : index
    %c0_43 = arith.constant 0 : index
    %45 = vector.load %arg13[%c8_42, %c0_43] : memref<200x32xf32, #tpu.memory_space<vmem>>, vector<168x32xf32>
    %c1_44 = arith.constant 1 : index
    %c0_45 = arith.constant 0 : index
    %c0_46 = arith.constant 0 : index
    %46 = vector.load %arg5[%c1_44, %c0_45, %c0_46] : memref<5x32x64xf32, #tpu.memory_space<vmem>>, vector<1x32x64xf32>
    %47 = vector.shape_cast %46 : vector<1x32x64xf32> to vector<32x64xf32>
    %cst_47 = arith.constant dense<0.000000e+00> : vector<168x64xf32>
    %48 = tpu.matmul %45, %47, %cst_47 {dimension_numbers = #tpu.dot_dimension_numbers<[1], [0], [0], [1], [0, 0, 1, 1], [], []>} : vector<168x32xf32>, vector<32x64xf32>, vector<168x64xf32> -> vector<168x64xf32>
    %49 = arith.addf %44, %48 : vector<168x64xf32>
    %c16_48 = arith.constant 16 : index
    %c0_49 = arith.constant 0 : index
    %50 = vector.load %arg13[%c16_48, %c0_49] : memref<200x32xf32, #tpu.memory_space<vmem>>, vector<168x32xf32>
    %c2_50 = arith.constant 2 : index
    %c0_51 = arith.constant 0 : index
    %c0_52 = arith.constant 0 : index
    %51 = vector.load %arg5[%c2_50, %c0_51, %c0_52] : memref<5x32x64xf32, #tpu.memory_space<vmem>>, vector<1x32x64xf32>
    %52 = vector.shape_cast %51 : vector<1x32x64xf32> to vector<32x64xf32>
    %cst_53 = arith.constant dense<0.000000e+00> : vector<168x64xf32>
    %53 = tpu.matmul %50, %52, %cst_53 {dimension_numbers = #tpu.dot_dimension_numbers<[1], [0], [0], [1], [0, 0, 1, 1], [], []>} : vector<168x32xf32>, vector<32x64xf32>, vector<168x64xf32> -> vector<168x64xf32>
    %54 = arith.addf %49, %53 : vector<168x64xf32>
    %c24_54 = arith.constant 24 : index
    %c0_55 = arith.constant 0 : index
    %55 = vector.load %arg13[%c24_54, %c0_55] : memref<200x32xf32, #tpu.memory_space<vmem>>, vector<168x32xf32>
    %c3_56 = arith.constant 3 : index
    %c0_57 = arith.constant 0 : index
    %c0_58 = arith.constant 0 : index
    %56 = vector.load %arg5[%c3_56, %c0_57, %c0_58] : memref<5x32x64xf32, #tpu.memory_space<vmem>>, vector<1x32x64xf32>
    %57 = vector.shape_cast %56 : vector<1x32x64xf32> to vector<32x64xf32>
    %cst_59 = arith.constant dense<0.000000e+00> : vector<168x64xf32>
    %58 = tpu.matmul %55, %57, %cst_59 {dimension_numbers = #tpu.dot_dimension_numbers<[1], [0], [0], [1], [0, 0, 1, 1], [], []>} : vector<168x32xf32>, vector<32x64xf32>, vector<168x64xf32> -> vector<168x64xf32>
    %59 = arith.addf %54, %58 : vector<168x64xf32>
    %c32_60 = arith.constant 32 : index
    %c0_61 = arith.constant 0 : index
    %60 = vector.load %arg13[%c32_60, %c0_61] : memref<200x32xf32, #tpu.memory_space<vmem>>, vector<168x32xf32>
    %c4_62 = arith.constant 4 : index
    %c0_63 = arith.constant 0 : index
    %c0_64 = arith.constant 0 : index
    %61 = vector.load %arg5[%c4_62, %c0_63, %c0_64] : memref<5x32x64xf32, #tpu.memory_space<vmem>>, vector<1x32x64xf32>
    %62 = vector.shape_cast %61 : vector<1x32x64xf32> to vector<32x64xf32>
    %cst_65 = arith.constant dense<0.000000e+00> : vector<168x64xf32>
    %63 = tpu.matmul %60, %62, %cst_65 {dimension_numbers = #tpu.dot_dimension_numbers<[1], [0], [0], [1], [0, 0, 1, 1], [], []>} : vector<168x32xf32>, vector<32x64xf32>, vector<168x64xf32> -> vector<168x64xf32>
    %64 = arith.addf %59, %63 : vector<168x64xf32>
    %c0_66 = arith.constant 0 : index
    %c0_67 = arith.constant 0 : index
    %65 = vector.load %arg6[%c0_66, %c0_67] : memref<1x64xf32, #tpu.memory_space<vmem>>, vector<1x64xf32>
    %66 = vector.broadcast %65 : vector<1x64xf32> to vector<168x64xf32>
    %67 = arith.addf %64, %66 : vector<168x64xf32>
    %cst_68 = arith.constant 0.000000e+00 : f32
    %68 = vector.broadcast %cst_68 : f32 to vector<8x64xf32>
    %c0_69 = arith.constant 0 : index
    %c0_70 = arith.constant 0 : index
    %69 = vector.load %arg14[%c0_69, %c0_70] : memref<184x64xf32, #tpu.memory_space<vmem>>, vector<8x64xf32>
    tpu.vector_store %arg14[%c0_69, %c0_70], %68 {strides = array<i32>} : memref<184x64xf32, #tpu.memory_space<vmem>>, vector<8x64xf32>,
    %cst_71 = arith.constant 0.000000e+00 : f32
    %70 = vector.broadcast %cst_71 : f32 to vector<8x64xf32>
    %c176 = arith.constant 176 : index
    %c0_72 = arith.constant 0 : index
    %71 = vector.load %arg14[%c176, %c0_72] : memref<184x64xf32, #tpu.memory_space<vmem>>, vector<8x64xf32>
    tpu.vector_store %arg14[%c176, %c0_72], %70 {strides = array<i32>} : memref<184x64xf32, #tpu.memory_space<vmem>>, vector<8x64xf32>,
    %c8_73 = arith.constant 8 : index
    %c0_74 = arith.constant 0 : index
    %72 = vector.load %arg14[%c8_73, %c0_74] : memref<184x64xf32, #tpu.memory_space<vmem>>, vector<168x64xf32>
    tpu.vector_store %arg14[%c8_73, %c0_74], %67 {strides = array<i32>} : memref<184x64xf32, #tpu.memory_space<vmem>>, vector<168x64xf32>,
    %cst_75 = arith.constant 0.000000e+00 : f32
    %73 = vector.broadcast %cst_75 : f32 to vector<168x128xf32>
    %c0_76 = arith.constant 0 : index
    %c0_77 = arith.constant 0 : index
    %74 = vector.load %arg14[%c0_76, %c0_77] : memref<184x64xf32, #tpu.memory_space<vmem>>, vector<168x64xf32>
    %c0_78 = arith.constant 0 : index
    %c0_79 = arith.constant 0 : index
    %c0_80 = arith.constant 0 : index
    %75 = vector.load %arg7[%c0_78, %c0_79, %c0_80] : memref<3x64x128xf32, #tpu.memory_space<vmem>>, vector<1x64x128xf32>
    %76 = vector.shape_cast %75 : vector<1x64x128xf32> to vector<64x128xf32>
    %cst_81 = arith.constant dense<0.000000e+00> : vector<168x128xf32>
    %77 = tpu.matmul %74, %76, %cst_81 {dimension_numbers = #tpu.dot_dimension_numbers<[1], [0], [0], [1], [0, 0, 1, 1], [], []>} : vector<168x64xf32>, vector<64x128xf32>, vector<168x128xf32> -> vector<168x128xf32>
    %78 = arith.addf %73, %77 : vector<168x128xf32>
    %c8_82 = arith.constant 8 : index
    %c0_83 = arith.constant 0 : index
    %79 = vector.load %arg14[%c8_82, %c0_83] : memref<184x64xf32, #tpu.memory_space<vmem>>, vector<168x64xf32>
    %c1_84 = arith.constant 1 : index
    %c0_85 = arith.constant 0 : index
    %c0_86 = arith.constant 0 : index
    %80 = vector.load %arg7[%c1_84, %c0_85, %c0_86] : memref<3x64x128xf32, #tpu.memory_space<vmem>>, vector<1x64x128xf32>
    %81 = vector.shape_cast %80 : vector<1x64x128xf32> to vector<64x128xf32>
    %cst_87 = arith.constant dense<0.000000e+00> : vector<168x128xf32>
    %82 = tpu.matmul %79, %81, %cst_87 {dimension_numbers = #tpu.dot_dimension_numbers<[1], [0], [0], [1], [0, 0, 1, 1], [], []>} : vector<168x64xf32>, vector<64x128xf32>, vector<168x128xf32> -> vector<168x128xf32>
    %83 = arith.addf %78, %82 : vector<168x128xf32>
    %c16_88 = arith.constant 16 : index
    %c0_89 = arith.constant 0 : index
    %84 = vector.load %arg14[%c16_88, %c0_89] : memref<184x64xf32, #tpu.memory_space<vmem>>, vector<168x64xf32>
    %c2_90 = arith.constant 2 : index
    %c0_91 = arith.constant 0 : index
    %c0_92 = arith.constant 0 : index
    %85 = vector.load %arg7[%c2_90, %c0_91, %c0_92] : memref<3x64x128xf32, #tpu.memory_space<vmem>>, vector<1x64x128xf32>
    %86 = vector.shape_cast %85 : vector<1x64x128xf32> to vector<64x128xf32>
    %cst_93 = arith.constant dense<0.000000e+00> : vector<168x128xf32>
    %87 = tpu.matmul %84, %86, %cst_93 {dimension_numbers = #tpu.dot_dimension_numbers<[1], [0], [0], [1], [0, 0, 1, 1], [], []>} : vector<168x64xf32>, vector<64x128xf32>, vector<168x128xf32> -> vector<168x128xf32>
    %88 = arith.addf %83, %87 : vector<168x128xf32>
    %c0_94 = arith.constant 0 : index
    %c0_95 = arith.constant 0 : index
    %89 = vector.load %arg8[%c0_94, %c0_95] : memref<1x128xf32, #tpu.memory_space<vmem>>, vector<1x128xf32>
    %90 = vector.broadcast %89 : vector<1x128xf32> to vector<168x128xf32>
    %91 = arith.addf %88, %90 : vector<168x128xf32>
    %92 = vector.shape_cast %91 : vector<168x128xf32> to vector<21x8x128xf32>
    %c0_96 = arith.constant 0 : index
    %c0_97 = arith.constant 0 : index
    %c0_98 = arith.constant 0 : index
    %93 = vector.load %arg9[%c0_96, %c0_97, %c0_98] : memref<21x6x128xf32, #tpu.memory_space<vmem>>, vector<21x6x128xf32>
    "tpu.trace_start"() <{level = 10 : i32, message = "lbc,lfc->lbf"}> : () -> ()
    %cst_99 = arith.constant dense<0.000000e+00> : vector<21x8x6xf32>
    %94 = tpu.matmul %92, %93, %cst_99 {dimension_numbers = #tpu.dot_dimension_numbers<[2], [2], [1], [1], [0, 0, 0, 1, 1, 1], [0], [0]>} : vector<21x8x128xf32>, vector<21x6x128xf32>, vector<21x8x6xf32> -> vector<21x8x6xf32>
    "tpu.trace_stop"() : () -> ()
    %c0_100 = arith.constant 0 : index
    %c0_101 = arith.constant 0 : index
    %c0_102 = arith.constant 0 : index
    %95 = vector.load %arg2[%c0_100, %c0_101, %c0_102] : memref<1x8x12xf32, #tpu.memory_space<vmem>>, vector<1x8x12xf32>
    %96 = vector.shape_cast %95 : vector<1x8x12xf32> to vector<8x12xf32>
    %cst_103 = arith.constant dense<0.000000e+00> : vector<8x6xf32>
    %97 = vector.multi_reduction <add>, %94, %cst_103 [0] : vector<21x8x6xf32> to vector<8x6xf32>
    %c0_104 = arith.constant 0 : index
    %c0_105 = arith.constant 0 : index
    %98 = vector.load %arg10[%c0_104, %c0_105] : memref<12x6xf32, #tpu.memory_space<vmem>>, vector<12x6xf32>
    %cst_106 = arith.constant dense<0.000000e+00> : vector<8x6xf32>
    %99 = tpu.matmul %96, %98, %cst_106 {dimension_numbers = #tpu.dot_dimension_numbers<[1], [0], [0], [1], [0, 0, 1, 1], [], []>} : vector<8x12xf32>, vector<12x6xf32>, vector<8x6xf32> -> vector<8x6xf32>
    %100 = arith.addf %97, %99 : vector<8x6xf32>
    %c0_107 = arith.constant 0 : index
    %c0_108 = arith.constant 0 : index
    %101 = vector.load %arg11[%c0_107, %c0_108] : memref<1x6xf32, #tpu.memory_space<vmem>>, vector<1x6xf32>
    %102 = vector.broadcast %101 : vector<1x6xf32> to vector<8x6xf32>
    %103 = arith.addf %100, %102 : vector<8x6xf32>
    %104 = vector.extract_strided_slice %96 {offsets = [0, 0], sizes = [8, 6], strides = [1, 1]} : vector<8x12xf32> to vector<8x6xf32>
    %105 = vector.extract_strided_slice %96 {offsets = [0, 6], sizes = [8, 6], strides = [1, 1]} : vector<8x12xf32> to vector<8x6xf32>
    %106 = math.exp %103 : vector<8x6xf32>
    %107 = arith.mulf %106, %105 : vector<8x6xf32>
    %cst_109 = arith.constant dense<0.000000e+00> : vector<8xf32>
    %108 = vector.multi_reduction <add>, %107, %cst_109 [1] : vector<8x6xf32> to vector<8xf32>
    %109 = vector.shape_cast %108 : vector<8xf32> to vector<8x1xf32>
    %cst_110 = arith.constant 9.99999974E-6 : f32
    %110 = vector.broadcast %cst_110 : f32 to vector<8x1xf32>
    %111 = arith.addf %109, %110 : vector<8x1xf32>
    %112 = vector.broadcast %111 : vector<8x1xf32> to vector<8x6xf32>
    %113 = arith.divf %107, %112 : vector<8x6xf32>
    %114 = arith.mulf %104, %113 : vector<8x6xf32>
    %cst_111 = arith.constant dense<0.000000e+00> : vector<8xf32>
    %115 = vector.multi_reduction <add>, %114, %cst_111 [1] : vector<8x6xf32> to vector<8xf32>
    %116 = vector.shape_cast %115 : vector<8xf32> to vector<8x1xf32>
    %c0_112 = arith.constant 0 : index
    %c0_113 = arith.constant 0 : index
    %c0_114 = arith.constant 0 : index
    %117 = vector.load %arg12[%c0_112, %c0_113, %c0_114] : memref<1x8x1xf32, #tpu.memory_space<vmem>>, vector<1x8x1xf32>
    %118 = vector.shape_cast %117 : vector<1x8x1xf32> to vector<8x1xf32>
    %119 = vector.shape_cast %116 : vector<8x1xf32> to vector<1x8x1xf32>
    tpu.vector_store %arg12[%c0_112, %c0_113, %c0_114], %119 {strides = array<i32>} : memref<1x8x1xf32, #tpu.memory_space<vmem>>, vector<1x8x1xf32>,
    return
  }
  func.func @transform_0(%arg0: i32) -> (i32, i32, i32) {
    %c0_i32 = arith.constant 0 : i32
    %c0_i32_0 = arith.constant 0 : i32
    %c0_i32_1 = arith.constant 0 : i32
    return %arg0, %c0_i32, %c0_i32_0 : i32, i32, i32
  }
  func.func @transform_1(%arg0: i32) -> (i32, i32, i32) {
    %c0_i32 = arith.constant 0 : i32
    %c0_i32_0 = arith.constant 0 : i32
    %c0_i32_1 = arith.constant 0 : i32
    return %arg0, %c0_i32, %c0_i32_0 : i32, i32, i32
  }
  func.func @transform_2(%arg0: i32) -> (i32, i32, i32) {
    %c0_i32 = arith.constant 0 : i32
    %c0_i32_0 = arith.constant 0 : i32
    %c0_i32_1 = arith.constant 0 : i32
    %c0_i32_2 = arith.constant 0 : i32
    return %c0_i32, %c0_i32_0, %c0_i32_1 : i32, i32, i32
  }
  func.func @transform_3(%arg0: i32) -> (i32, i32) {
    %c0_i32 = arith.constant 0 : i32
    %c0_i32_0 = arith.constant 0 : i32
    %c0_i32_1 = arith.constant 0 : i32
    return %c0_i32, %c0_i32_0 : i32, i32
  }
  func.func @transform_4(%arg0: i32) -> (i32, i32, i32) {
    %c0_i32 = arith.constant 0 : i32
    %c0_i32_0 = arith.constant 0 : i32
    %c0_i32_1 = arith.constant 0 : i32
    %c0_i32_2 = arith.constant 0 : i32
    return %c0_i32, %c0_i32_0, %c0_i32_1 : i32, i32, i32
  }
  func.func @transform_5(%arg0: i32) -> (i32, i32) {
    %c0_i32 = arith.constant 0 : i32
    %c0_i32_0 = arith.constant 0 : i32
    %c0_i32_1 = arith.constant 0 : i32
    return %c0_i32, %c0_i32_0 : i32, i32
  }
  func.func @transform_6(%arg0: i32) -> (i32, i32, i32) {
    %c0_i32 = arith.constant 0 : i32
    %c0_i32_0 = arith.constant 0 : i32
    %c0_i32_1 = arith.constant 0 : i32
    %c0_i32_2 = arith.constant 0 : i32
    return %c0_i32, %c0_i32_0, %c0_i32_1 : i32, i32, i32
  }
  func.func @transform_7(%arg0: i32) -> (i32, i32) {
    %c0_i32 = arith.constant 0 : i32
    %c0_i32_0 = arith.constant 0 : i32
    %c0_i32_1 = arith.constant 0 : i32
    return %c0_i32, %c0_i32_0 : i32, i32
  }
  func.func @transform_8(%arg0: i32) -> (i32, i32, i32) {
    %c0_i32 = arith.constant 0 : i32
    %c0_i32_0 = arith.constant 0 : i32
    %c0_i32_1 = arith.constant 0 : i32
    %c0_i32_2 = arith.constant 0 : i32
    return %c0_i32, %c0_i32_0, %c0_i32_1 : i32, i32, i32
  }
  func.func @transform_9(%arg0: i32) -> (i32, i32) {
    %c0_i32 = arith.constant 0 : i32
    %c0_i32_0 = arith.constant 0 : i32
    %c0_i32_1 = arith.constant 0 : i32
    return %c0_i32, %c0_i32_0 : i32, i32
  }
  func.func @transform_10(%arg0: i32) -> (i32, i32) {
    %c0_i32 = arith.constant 0 : i32
    %c0_i32_0 = arith.constant 0 : i32
    %c0_i32_1 = arith.constant 0 : i32
    return %c0_i32, %c0_i32_0 : i32, i32
  }
  func.func @transform_11(%arg0: i32) -> (i32, i32, i32) {
    %c0_i32 = arith.constant 0 : i32
    %c0_i32_0 = arith.constant 0 : i32
    %c0_i32_1 = arith.constant 0 : i32
    return %arg0, %c0_i32, %c0_i32_0 : i32, i32, i32
  }
}

</mosaic_0001>

<bundles_post_ra>
// kernel: ensembler_forward.1
= control target key start
LH: loop header
LB: loop body
LE: loop exit
PB: predicated region body
PF: predicated region fallthrough
CT: control target
= control target key end

     0   :  { %s7364_s17 = smov 0   ;;  %s9452_s0 = inlined_call_operand.vmem [shape: f32[2,200,11], index: 0, kind: input, shape index: {}]   ;;  %s9453_s1 = inlined_call_operand.vmem [shape: f32[2,8,12], index: 1, kind: input, shape index: {}]   ;;  %s9454_s2 = inlined_call_operand.vmem [shape: f32[5,11,32], index: 2, kind: input, shape index: {}]   ;;  %s9455_s3 = inlined_call_operand.vmem [shape: f32[1,32], index: 3, kind: input, shape index: {}]   ;;  %s9456_s4 = inlined_call_operand.vmem [shape: f32[5,32,64], index: 4, kind: input, shape index: {}]   ;;  %s9457_s5 = inlined_call_operand.vmem [shape: f32[1,64], index: 5, kind: input, shape index: {}]   ;;  %s9458_s6 = inlined_call_operand.vmem [shape: f32[3,64,128], index: 6, kind: input, shape index: {}]   ;;  %s9459_s7 = inlined_call_operand.vmem [shape: f32[1,128], index: 7, kind: input, shape index: {}]   ;;  %s9460_s8 = inlined_call_operand.vmem [shape: f32[21,6,128], index: 8, kind: input, shape index: {}]   ;;  %s9461_s9 = inlined_call_operand.vmem [shape: f32[12,6], index: 9, kind: input, shape index: {}]   ;;  %s9462_s10 = inlined_call_operand.vmem [shape: f32[1,6], index: 10, kind: input, shape index: {}]   ;;  %s9463_s11 = inlined_call_operand.vmem [shape: f32[2,8,1], index: 11, kind: output, shape index: {}]  }
   0x1 LB: > { %s5532_s18 = sadd.s32 4294967295, %s7299_s17   ;;  %p5536_p0 = scmp.ge.s32.totalorder %s7299_s17, 1  ;;  %s7299_s17 = sphi %s7364_s17, %s21_s17  }
   0x2   : > { %p346_p1 = scmp.lt.s32.totalorder %s7299_s17, 3 }
   0x4   : > { %p347_p2 = pnand %p5536_p0, %p346_p1 }
   0x5   : > { %p389_p3 = scmp.lt.s32.totalorder (!%p347_p2), %s5532_s18, 1 }
   0x6   : > { %350 = sbr.rel (%p347_p2) target bundleno = 1638 (0x666), region = 64 }
   0xb   : > { %v5541_v0 = vld [vmem:[%s9454_s2 + $0x18] sm:$0x7]  ;;  %vm493_vm0 = vcmask 1042432   ;;  %v424_v1 = vld [vmem:[%s9454_s2 + $0x8] sm:$0x7]  ;;  %v7301_v2 = vmov 0.0  }
   0xc   : > { %6238 = vmatprep.subr.mxu0 %v7301_v2  ;;  %6305 = vmatprep.subr.mxu1 %v7301_v2  ;;  %v5540_v3 = vld [vmem:[%s9454_s2 + $0x10] sm:$0xff]  ;;  %v423_v4 = vld [vmem:[%s9454_s2] sm:$0xff]  ;;  %s9465_s18 = smov (!%p389_p3, %s5532_s18), 1  ;;  %vm7302_vm1 = vmmov 0   ;;  %vm429_vm2 = vcmask 89088   ;;  %v5662_v34 = vld [vmem:[%s9456_s4 + $0x38] sm:$0xff] }
   0xd   : > { %6239 = vmatpush3.msk.msra.mxu0 %vm493_vm0, %v5541_v0  ;;  %6306 = vmatpush3.msk.msra.mxu1 %vm493_vm0, %v424_v1  ;;  %s7277_s27 = smul.u32 200, %s9465_s18  ;;  %v5587_v5 = vld [vmem:[%s9454_s2 + $0x28] sm:$0x7]  ;;  %v5586_v8 = vld [vmem:[%s9454_s2 + $0x20] sm:$0xff]  ;;  %v5611_v9 = vld [vmem:[%s9454_s2 + $0x38] sm:$0x7] }
   0xe   : > { %6240 = vmatprep.subr.mxu0 %v7301_v2  ;;  %6307 = vmatprep.subr.mxu1 %v7301_v2  ;;  %v5610_v11 = vld [vmem:[%s9454_s2 + $0x30] sm:$0xff]  ;;  %v5635_v31 = vld [vmem:[%s9454_s2 + $0x48] sm:$0x7]  ;;  %v5634_v32 = vld [vmem:[%s9454_s2 + $0x40] sm:$0xff]  ;;  %vm1714_vm3 = vcmask 261120   ;;  %vm3045_vm4 = vcmask 523264  }
   0xf   : > { %6241 = vmatpush3.msra.mxu0 %v5540_v3  ;;  %6242 = vmatprep.mubr.msk.f32.mxu0 %vm7302_vm1, %v7301_v2  ;;  %s7402_s30 = scalar_lea.vmem %s9452_s0, %s7277_s27  ;;  %v5661_v36 = vld [vmem:[%s9456_s4 + $0x30] sm:$0xff]  ;;  %v5660_v47 = vld [vmem:[%s9456_s4 + $0x28] sm:$0xff]  ;;  %1715 = vst.msk [vmem:[#allocation2] sm:$0xff] %vm1714_vm3, %v7301_v2  ;;  %1716 = vst.msk [vmem:[#allocation2 + $0x8] sm:$0xff] %vm1714_vm3, %v7301_v2  ;;  %vm5366_vm5 = vcmask 1043456   ;;  %s5538_s23 = sshll.u32 %s9465_s18, 3 }
  0x10   : > { %6308 = vmatpush3.msra.mxu1 %v423_v4  ;;  %6309 = vmatprep.mubr.msk.f32.mxu1 %vm7302_vm1, %v7301_v2  ;;  %v403_v6 = vld [vmem:[%s7402_s30 + $0x8] sm:$0xff]  ;;  %v402_v7 = vld [vmem:[%s7402_s30] sm:$0xff]  ;;  %v7421_v10 = vld [vmem:[%s7402_s30 + $0x10] sm:$0xff]  ;;  %1717 = vst.msk [vmem:[#allocation2 + $0xb8] sm:$0xff] %vm1714_vm3, %v7301_v2  ;;  %s397_s26 = scalar_lea.vmem %s9453_s1, %s5538_s23  ;;  %vm5362_vm6 = vcmask 97280   ;;  %s7303_s27 = smov 122  }
  0x11   : > { %6372 = vmatprep.subr.mxu0 %v7301_v2  ;;  %6439 = vmatprep.subr.mxu1 %v7301_v2  ;;  %v7438_v12 = vld [vmem:[%s7402_s30 + $0x18] sm:$0xff]  ;;  %v7451_v13 = vld [vmem:[%s7402_s30 + $0x20] sm:$0xff]  ;;  %v7463_v14 = vld [vmem:[%s7402_s30 + $0x28] sm:$0xff]  ;;  %1718 = vst.msk [vmem:[#allocation2 + $0xc0] sm:$0xff] %vm1714_vm3, %v7301_v2  ;;  %vm5318_vm7 = vcmask 48128   ;;  %vm5465_vm8 = vcmask 7168  }
  0x12   : > { %6243 = vmatmul.mubr.msk.f32.vlgmr.msra.gmra.mxu0 %vm429_vm2, %v403_v6  ;;  %6310 = vmatmul.mubr.msk.f32.vlgmr.msra.gmra.mxu1 %vm429_vm2, %v402_v7  ;;  %v7474_v15 = vld [vmem:[%s7402_s30 + $0x30] sm:$0xff]  ;;  %v7485_v16 = vld [vmem:[%s7402_s30 + $0x38] sm:$0xff]  ;;  %v7496_v17 = vld [vmem:[%s7402_s30 + $0x40] sm:$0xff]  ;;  %3046 = vst.msk [vmem:[#allocation3] sm:$0xff] %vm3045_vm4, %v7301_v2 }
  0x13   : > { %6373 = vmatpush3.msk.msra.mxu0 %vm493_vm0, %v5587_v5  ;;  %6245 = vmatprep.mubr.msk.f32.mxu0 %vm7302_vm1, %v7301_v2  ;;  %v7507_v18 = vld [vmem:[%s7402_s30 + $0x48] sm:$0xff]  ;;  %v7518_v19 = vld [vmem:[%s7402_s30 + $0x50] sm:$0xff]  ;;  %v7529_v20 = vld [vmem:[%s7402_s30 + $0x58] sm:$0xff]  ;;  %3047 = vst.msk [vmem:[#allocation3 + $0xb0] sm:$0xff] %vm3045_vm4, %v7301_v2 }
  0x14   : > { %6312 = vmatprep.mubr.msk.f32.mxu1 %vm7302_vm1, %v7301_v2  ;;  %6374 = vmatprep.subr.mxu0 %v7301_v2  ;;  %v7540_v21 = vld [vmem:[%s7402_s30 + $0x60] sm:$0xff]  ;;  %v7551_v22 = vld [vmem:[%s7402_s30 + $0x68] sm:$0xff]  ;;  %v7562_v23 = vld [vmem:[%s7402_s30 + $0x70] sm:$0xff] }
  0x15   : > { %6375 = vmatpush3.msra.mxu0 %v5586_v8  ;;  %6440 = vmatpush3.msk.msra.mxu1 %vm493_vm0, %v5611_v9  ;;  %v7573_v24 = vld [vmem:[%s7402_s30 + $0x78] sm:$0xff]  ;;  %v7584_v25 = vld [vmem:[%s7402_s30 + $0x80] sm:$0xff]  ;;  %v7595_v26 = vld [vmem:[%s7402_s30 + $0x88] sm:$0xff] }
  0x16   : > { %6246 = vmatmul.mubr.msk.f32.gmra.mxu0 %vm429_vm2, %v7421_v10  ;;  %6313 = vmatmul.mubr.msk.f32.gmra.mxu1 %vm429_vm2, %v403_v6  ;;  %v7606_v27 = vld [vmem:[%s7402_s30 + $0x90] sm:$0xff]  ;;  %v7617_v28 = vld [vmem:[%s7402_s30 + $0x98] sm:$0xff]  ;;  %v7628_v29 = vld [vmem:[%s7402_s30 + $0xa0] sm:$0xff] }
  0x17   : > { %6248 = vmatprep.mubr.msk.f32.mxu0 %vm7302_vm1, %v7301_v2  ;;  %6315 = vmatprep.mubr.msk.f32.mxu1 %vm7302_vm1, %v7301_v2  ;;  %v7639_v30 = vld [vmem:[%s7402_s30 + $0xa8] sm:$0xff]  ;;  %v7811_v33 = vld [vmem:[%s7402_s30 + $0xb0] sm:$0xff]  ;;  %v7826_v35 = vld [vmem:[%s7402_s30 + $0xb8] sm:$0xff] }
  0x18   : > { %6506 = vmatprep.subr.mxu0 %v7301_v2  ;;  %6441 = vmatprep.subr.mxu1 %v7301_v2 }
  0x19   : > { %6442 = vmatpush3.msra.mxu1 %v5610_v11 }
  0x1a   : > { %6249 = vmatmul.mubr.msk.f32.gmra.mxu0 %vm429_vm2, %v7438_v12  ;;  %6316 = vmatmul.mubr.msk.f32.gmra.mxu1 %vm429_vm2, %v7421_v10 }
  0x1b   : > { %6251 = vmatprep.mubr.msk.f32.mxu0 %vm7302_vm1, %v7301_v2  ;;  %6318 = vmatprep.mubr.msk.f32.mxu1 %vm7302_vm1, %v7301_v2 }
  0x1c   : > { %6573 = vmatprep.subr.mxu1 %v7301_v2 }
  0x1e   : > { %6252 = vmatmul.mubr.msk.f32.gmra.mxu0 %vm429_vm2, %v7451_v13  ;;  %6319 = vmatmul.mubr.msk.f32.gmra.mxu1 %vm429_vm2, %v7438_v12 }
  0x1f   : > { %6254 = vmatprep.mubr.msk.f32.mxu0 %vm7302_vm1, %v7301_v2  ;;  %6321 = vmatprep.mubr.msk.f32.mxu1 %vm7302_vm1, %v7301_v2 }
  0x22   : > { %6255 = vmatmul.mubr.msk.f32.gmra.mxu0 %vm429_vm2, %v7463_v14  ;;  %6322 = vmatmul.mubr.msk.f32.gmra.mxu1 %vm429_vm2, %v7451_v13 }
  0x23   : > { %6257 = vmatprep.mubr.msk.f32.mxu0 %vm7302_vm1, %v7301_v2  ;;  %6324 = vmatprep.mubr.msk.f32.mxu1 %vm7302_vm1, %v7301_v2 }
  0x26   : > { %6258 = vmatmul.mubr.msk.f32.gmra.mxu0 %vm429_vm2, %v7474_v15  ;;  %6325 = vmatmul.mubr.msk.f32.gmra.mxu1 %vm429_vm2, %v7463_v14 }
  0x27   : > { %6260 = vmatprep.mubr.msk.f32.mxu0 %vm7302_vm1, %v7301_v2  ;;  %6327 = vmatprep.mubr.msk.f32.mxu1 %vm7302_vm1, %v7301_v2 }
  0x2a   : > { %6261 = vmatmul.mubr.msk.f32.gmra.mxu0 %vm429_vm2, %v7485_v16  ;;  %6328 = vmatmul.mubr.msk.f32.gmra.mxu1 %vm429_vm2, %v7474_v15 }
  0x2b   : > { %6263 = vmatprep.mubr.msk.f32.mxu0 %vm7302_vm1, %v7301_v2  ;;  %6330 = vmatprep.mubr.msk.f32.mxu1 %vm7302_vm1, %v7301_v2 }
  0x2e   : > { %6264 = vmatmul.mubr.msk.f32.gmra.mxu0 %vm429_vm2, %v7496_v17  ;;  %6331 = vmatmul.mubr.msk.f32.gmra.mxu1 %vm429_vm2, %v7485_v16 }
  0x2f   : > { %6266 = vmatprep.mubr.msk.f32.mxu0 %vm7302_vm1, %v7301_v2  ;;  %6333 = vmatprep.mubr.msk.f32.mxu1 %vm7302_vm1, %v7301_v2 }
  0x32   : > { %6267 = vmatmul.mubr.msk.f32.gmra.mxu0 %vm429_vm2, %v7507_v18  ;;  %6334 = vmatmul.mubr.msk.f32.gmra.mxu1 %vm429_vm2, %v7496_v17 }
  0x33   : > { %6269 = vmatprep.mubr.msk.f32.mxu0 %vm7302_vm1, %v7301_v2  ;;  %6336 = vmatprep.mubr.msk.f32.mxu1 %vm7302_vm1, %v7301_v2 }
  0x36   : > { %6270 = vmatmul.mubr.msk.f32.gmra.mxu0 %vm429_vm2, %v7518_v19  ;;  %6337 = vmatmul.mubr.msk.f32.gmra.mxu1 %vm429_vm2, %v7507_v18 }
  0x37   : > { %6272 = vmatprep.mubr.msk.f32.mxu0 %vm7302_vm1, %v7301_v2  ;;  %6339 = vmatprep.mubr.msk.f32.mxu1 %vm7302_vm1, %v7301_v2 }
  0x3a   : > { %6273 = vmatmul.mubr.msk.f32.gmra.mxu0 %vm429_vm2, %v7529_v20  ;;  %6340 = vmatmul.mubr.msk.f32.gmra.mxu1 %vm429_vm2, %v7518_v19 }
  0x3b   : > { %6275 = vmatprep.mubr.msk.f32.mxu0 %vm7302_vm1, %v7301_v2  ;;  %6342 = vmatprep.mubr.msk.f32.mxu1 %vm7302_vm1, %v7301_v2 }
  0x3e   : > { %6276 = vmatmul.mubr.msk.f32.gmra.mxu0 %vm429_vm2, %v7540_v21  ;;  %6343 = vmatmul.mubr.msk.f32.gmra.mxu1 %vm429_vm2, %v7529_v20 }
  0x3f   : > { %6278 = vmatprep.mubr.msk.f32.mxu0 %vm7302_vm1, %v7301_v2  ;;  %6345 = vmatprep.mubr.msk.f32.mxu1 %vm7302_vm1, %v7301_v2 }
  0x42   : > { %6279 = vmatmul.mubr.msk.f32.gmra.mxu0 %vm429_vm2, %v7551_v22  ;;  %6346 = vmatmul.mubr.msk.f32.gmra.mxu1 %vm429_vm2, %v7540_v21 }
  0x43   : > { %6281 = vmatprep.mubr.msk.f32.mxu0 %vm7302_vm1, %v7301_v2  ;;  %6348 = vmatprep.mubr.msk.f32.mxu1 %vm7302_vm1, %v7301_v2 }
  0x46   : > { %6282 = vmatmul.mubr.msk.f32.gmra.mxu0 %vm429_vm2, %v7562_v23  ;;  %6349 = vmatmul.mubr.msk.f32.gmra.mxu1 %vm429_vm2, %v7551_v22 }
  0x47   : > { %6284 = vmatprep.mubr.msk.f32.mxu0 %vm7302_vm1, %v7301_v2  ;;  %6351 = vmatprep.mubr.msk.f32.mxu1 %vm7302_vm1, %v7301_v2 }
  0x4a   : > { %6285 = vmatmul.mubr.msk.f32.gmra.mxu0 %vm429_vm2, %v7573_v24  ;;  %6352 = vmatmul.mubr.msk.f32.gmra.mxu1 %vm429_vm2, %v7562_v23 }
  0x4b   : > { %6287 = vmatprep.mubr.msk.f32.mxu0 %vm7302_vm1, %v7301_v2  ;;  %6354 = vmatprep.mubr.msk.f32.mxu1 %vm7302_vm1, %v7301_v2 }
  0x4e   : > { %6288 = vmatmul.mubr.msk.f32.gmra.mxu0 %vm429_vm2, %v7584_v25  ;;  %6355 = vmatmul.mubr.msk.f32.gmra.mxu1 %vm429_vm2, %v7573_v24 }
  0x4f   : > { %6290 = vmatprep.mubr.msk.f32.mxu0 %vm7302_vm1, %v7301_v2  ;;  %6357 = vmatprep.mubr.msk.f32.mxu1 %vm7302_vm1, %v7301_v2 }
  0x52   : > { %6291 = vmatmul.mubr.msk.f32.gmra.mxu0 %vm429_vm2, %v7595_v26  ;;  %6358 = vmatmul.mubr.msk.f32.gmra.mxu1 %vm429_vm2, %v7584_v25 }
  0x53   : > { %6293 = vmatprep.mubr.msk.f32.mxu0 %vm7302_vm1, %v7301_v2  ;;  %6360 = vmatprep.mubr.msk.f32.mxu1 %vm7302_vm1, %v7301_v2 }
  0x56   : > { %6294 = vmatmul.mubr.msk.f32.gmra.mxu0 %vm429_vm2, %v7606_v27  ;;  %6361 = vmatmul.mubr.msk.f32.gmra.mxu1 %vm429_vm2, %v7595_v26 }
  0x57   : > { %6296 = vmatprep.mubr.msk.f32.mxu0 %vm7302_vm1, %v7301_v2  ;;  %6363 = vmatprep.mubr.msk.f32.mxu1 %vm7302_vm1, %v7301_v2 }
  0x5a   : > { %6297 = vmatmul.mubr.msk.f32.gmra.mxu0 %vm429_vm2, %v7617_v28  ;;  %6364 = vmatmul.mubr.msk.f32.gmra.mxu1 %vm429_vm2, %v7606_v27 }
  0x5b   : > { %6299 = vmatprep.mubr.msk.f32.mxu0 %vm7302_vm1, %v7301_v2  ;;  %6366 = vmatprep.mubr.msk.f32.mxu1 %vm7302_vm1, %v7301_v2 }
  0x5e   : > { %6300 = vmatmul.mubr.msk.f32.gmra.mxu0 %vm429_vm2, %v7628_v29  ;;  %6367 = vmatmul.mubr.msk.f32.gmra.mxu1 %vm429_vm2, %v7617_v28 }
  0x5f   : > { %6302 = vmatprep.mubr.msk.f32.mxu0 %vm7302_vm1, %v7301_v2  ;;  %6369 = vmatprep.mubr.msk.f32.mxu1 %vm7302_vm1, %v7301_v2 }
  0x62   : > { %6303 = vmatmul.mubr.msk.f32.gmra.mxu0 %vm429_vm2, %v7639_v30  ;;  %6370 = vmatmul.mubr.msk.f32.gmra.mxu1 %vm429_vm2, %v7628_v29 }
  0x63   : > { %6376 = vmatprep.mubr.msk.f32.mxu0 %vm7302_vm1, %v7301_v2  ;;  %6443 = vmatprep.mubr.msk.f32.mxu1 %vm7302_vm1, %v7301_v2 }
  0x66   : > { %6377 = vmatmul.mubr.msk.f32.vlgmr.msra.gmra.mxu0 %vm429_vm2, %v7421_v10  ;;  %6444 = vmatmul.mubr.msk.f32.vlgmr.msra.gmra.mxu1 %vm429_vm2, %v7438_v12 }
  0x67   : > { %6507 = vmatpush3.msk.msra.mxu0 %vm493_vm0, %v5635_v31  ;;  %6379 = vmatprep.mubr.msk.f32.mxu0 %vm7302_vm1, %v7301_v2 }
  0x68   : > { %6446 = vmatprep.mubr.msk.f32.mxu1 %vm7302_vm1, %v7301_v2  ;;  %6508 = vmatprep.subr.mxu0 %v7301_v2 }
  0x69   : > { %6509 = vmatpush3.msra.mxu0 %v5634_v32  ;;  %6574 = vmatpush3.msra.mxu1 %v5662_v34  ;;  %v1762_v34 = vld [vmem:[%s9456_s4 + $0x8] sm:$0xff] }
  0x6a   : > { %6380 = vmatmul.mubr.msk.f32.gmra.mxu0 %vm429_vm2, %v7438_v12  ;;  %6447 = vmatmul.mubr.msk.f32.gmra.mxu1 %vm429_vm2, %v7451_v13 }
  0x6b   : > { %6382 = vmatprep.mubr.msk.f32.mxu0 %vm7302_vm1, %v7301_v2  ;;  %6449 = vmatprep.mubr.msk.f32.mxu1 %vm7302_vm1, %v7301_v2 }
  0x6c   : > { %6644 = vmatprep.subr.mxu0 %v7301_v2  ;;  %6575 = vmatprep.subr.mxu1 %v7301_v2 }
  0x6d   : > { %6576 = vmatpush3.msra.mxu1 %v5661_v36 }
  0x6e   : > { %6383 = vmatmul.mubr.msk.f32.gmra.mxu0 %vm429_vm2, %v7451_v13  ;;  %6450 = vmatmul.mubr.msk.f32.gmra.mxu1 %vm429_vm2, %v7463_v14 }
  0x6f   : > { %6385 = vmatprep.mubr.msk.f32.mxu0 %vm7302_vm1, %v7301_v2  ;;  %6452 = vmatprep.mubr.msk.f32.mxu1 %vm7302_vm1, %v7301_v2 }
  0x70   : > { %6577 = vmatprep.subr.mxu1 %v7301_v2 }
  0x71   : > { %6578 = vmatpush3.msra.mxu1 %v5660_v47 }
  0x72   : > { %6386 = vmatmul.mubr.msk.f32.gmra.mxu0 %vm429_vm2, %v7463_v14  ;;  %6453 = vmatmul.mubr.msk.f32.gmra.mxu1 %vm429_vm2, %v7474_v15 }
  0x73   : > { %6388 = vmatprep.mubr.msk.f32.mxu0 %vm7302_vm1, %v7301_v2  ;;  %6455 = vmatprep.mubr.msk.f32.mxu1 %vm7302_vm1, %v7301_v2 }
  0x74   : > { %6579 = vmatprep.subr.mxu1 %v7301_v2 }
  0x76   : > { %6389 = vmatmul.mubr.msk.f32.gmra.mxu0 %vm429_vm2, %v7474_v15  ;;  %6456 = vmatmul.mubr.msk.f32.gmra.mxu1 %vm429_vm2, %v7485_v16 }
  0x77   : > { %6391 = vmatprep.mubr.msk.f32.mxu0 %vm7302_vm1, %v7301_v2  ;;  %6458 = vmatprep.mubr.msk.f32.mxu1 %vm7302_vm1, %v7301_v2 }
  0x7a   : > { %6392 = vmatmul.mubr.msk.f32.gmra.mxu0 %vm429_vm2, %v7485_v16  ;;  %6459 = vmatmul.mubr.msk.f32.gmra.mxu1 %vm429_vm2, %v7496_v17 }
  0x7b   : > { %6394 = vmatprep.mubr.msk.f32.mxu0 %vm7302_vm1, %v7301_v2  ;;  %6461 = vmatprep.mubr.msk.f32.mxu1 %vm7302_vm1, %v7301_v2 }
  0x7e   : > { %6395 = vmatmul.mubr.msk.f32.gmra.mxu0 %vm429_vm2, %v7496_v17  ;;  %6462 = vmatmul.mubr.msk.f32.gmra.mxu1 %vm429_vm2, %v7507_v18 }
  0x7f   : > { %6397 = vmatprep.mubr.msk.f32.mxu0 %vm7302_vm1, %v7301_v2  ;;  %6464 = vmatprep.mubr.msk.f32.mxu1 %vm7302_vm1, %v7301_v2 }
  0x82   : > { %6398 = vmatmul.mubr.msk.f32.gmra.mxu0 %vm429_vm2, %v7507_v18  ;;  %6465 = vmatmul.mubr.msk.f32.gmra.mxu1 %vm429_vm2, %v7518_v19 }
  0x83   : > { %6400 = vmatprep.mubr.msk.f32.mxu0 %vm7302_vm1, %v7301_v2  ;;  %6467 = vmatprep.mubr.msk.f32.mxu1 %vm7302_vm1, %v7301_v2 }
  0x86   : > { %6401 = vmatmul.mubr.msk.f32.gmra.mxu0 %vm429_vm2, %v7518_v19  ;;  %6468 = vmatmul.mubr.msk.f32.gmra.mxu1 %vm429_vm2, %v7529_v20 }
  0x87   : > { %6403 = vmatprep.mubr.msk.f32.mxu0 %vm7302_vm1, %v7301_v2  ;;  %6470 = vmatprep.mubr.msk.f32.mxu1 %vm7302_vm1, %v7301_v2 }
  0x8a   : > { %6404 = vmatmul.mubr.msk.f32.gmra.mxu0 %vm429_vm2, %v7529_v20  ;;  %6471 = vmatmul.mubr.msk.f32.gmra.mxu1 %vm429_vm2, %v7540_v21 }
  0x8b   : > { %6406 = vmatprep.mubr.msk.f32.mxu0 %vm7302_vm1, %v7301_v2  ;;  %6473 = vmatprep.mubr.msk.f32.mxu1 %vm7302_vm1, %v7301_v2 }
  0x8e   : > { %6407 = vmatmul.mubr.msk.f32.gmra.mxu0 %vm429_vm2, %v7540_v21  ;;  %6474 = vmatmul.mubr.msk.f32.gmra.mxu1 %vm429_vm2, %v7551_v22 }
  0x8f   : > { %6409 = vmatprep.mubr.msk.f32.mxu0 %vm7302_vm1, %v7301_v2  ;;  %6476 = vmatprep.mubr.msk.f32.mxu1 %vm7302_vm1, %v7301_v2 }
  0x92   : > { %6410 = vmatmul.mubr.msk.f32.gmra.mxu0 %vm429_vm2, %v7551_v22  ;;  %6477 = vmatmul.mubr.msk.f32.gmra.mxu1 %vm429_vm2, %v7562_v23 }
  0x93   : > { %6412 = vmatprep.mubr.msk.f32.mxu0 %vm7302_vm1, %v7301_v2  ;;  %6479 = vmatprep.mubr.msk.f32.mxu1 %vm7302_vm1, %v7301_v2 }
  0x96   : > { %6413 = vmatmul.mubr.msk.f32.gmra.mxu0 %vm429_vm2, %v7562_v23  ;;  %6480 = vmatmul.mubr.msk.f32.gmra.mxu1 %vm429_vm2, %v7573_v24 }
  0x97   : > { %6415 = vmatprep.mubr.msk.f32.mxu0 %vm7302_vm1, %v7301_v2  ;;  %6482 = vmatprep.mubr.msk.f32.mxu1 %vm7302_vm1, %v7301_v2 }
  0x9a   : > { %6416 = vmatmul.mubr.msk.f32.gmra.mxu0 %vm429_vm2, %v7573_v24  ;;  %6483 = vmatmul.mubr.msk.f32.gmra.mxu1 %vm429_vm2, %v7584_v25 }
  0x9b   : > { %6418 = vmatprep.mubr.msk.f32.mxu0 %vm7302_vm1, %v7301_v2  ;;  %6485 = vmatprep.mubr.msk.f32.mxu1 %vm7302_vm1, %v7301_v2 }
  0x9e   : > { %6419 = vmatmul.mubr.msk.f32.gmra.mxu0 %vm429_vm2, %v7584_v25  ;;  %6486 = vmatmul.mubr.msk.f32.gmra.mxu1 %vm429_vm2, %v7595_v26 }
  0x9f   : > { %6421 = vmatprep.mubr.msk.f32.mxu0 %vm7302_vm1, %v7301_v2  ;;  %6488 = vmatprep.mubr.msk.f32.mxu1 %vm7302_vm1, %v7301_v2 }
  0xa2   : > { %6422 = vmatmul.mubr.msk.f32.gmra.mxu0 %vm429_vm2, %v7595_v26  ;;  %6489 = vmatmul.mubr.msk.f32.gmra.mxu1 %vm429_vm2, %v7606_v27 }
  0xa3   : > { %6424 = vmatprep.mubr.msk.f32.mxu0 %vm7302_vm1, %v7301_v2  ;;  %6491 = vmatprep.mubr.msk.f32.mxu1 %vm7302_vm1, %v7301_v2 }
  0xa6   : > { %6425 = vmatmul.mubr.msk.f32.gmra.mxu0 %vm429_vm2, %v7606_v27  ;;  %6492 = vmatmul.mubr.msk.f32.gmra.mxu1 %vm429_vm2, %v7617_v28 }
  0xa7   : > { %6427 = vmatprep.mubr.msk.f32.mxu0 %vm7302_vm1, %v7301_v2  ;;  %6494 = vmatprep.mubr.msk.f32.mxu1 %vm7302_vm1, %v7301_v2 }
  0xaa   : > { %6428 = vmatmul.mubr.msk.f32.gmra.mxu0 %vm429_vm2, %v7617_v28  ;;  %6495 = vmatmul.mubr.msk.f32.gmra.mxu1 %vm429_vm2, %v7628_v29 }
  0xab   : > { %6430 = vmatprep.mubr.msk.f32.mxu0 %vm7302_vm1, %v7301_v2  ;;  %6497 = vmatprep.mubr.msk.f32.mxu1 %vm7302_vm1, %v7301_v2 }
  0xae   : > { %6431 = vmatmul.mubr.msk.f32.gmra.mxu0 %vm429_vm2, %v7628_v29  ;;  %6498 = vmatmul.mubr.msk.f32.gmra.mxu1 %vm429_vm2, %v7639_v30 }
  0xaf   : > { %6433 = vmatprep.mubr.msk.f32.mxu0 %vm7302_vm1, %v7301_v2  ;;  %6500 = vmatprep.mubr.msk.f32.mxu1 %vm7302_vm1, %v7301_v2 }
  0xb2   : > { %6434 = vmatmul.mubr.msk.f32.gmra.mxu0 %vm429_vm2, %v7639_v30  ;;  %6501 = vmatmul.mubr.msk.f32.gmra.mxu1 %vm429_vm2, %v7811_v33 }
  0xb3   : > { %6436 = vmatprep.mubr.msk.f32.mxu0 %vm7302_vm1, %v7301_v2  ;;  %6503 = vmatprep.mubr.msk.f32.mxu1 %vm7302_vm1, %v7301_v2 }
  0xb6   : > { %6437 = vmatmul.mubr.msk.f32.gmra.mxu0 %vm429_vm2, %v7811_v33  ;;  %6504 = vmatmul.mubr.msk.f32.gmra.mxu1 %vm429_vm2, %v7826_v35 }
  0xb7   : > { %6510 = vmatprep.mubr.msk.f32.mxu0 %vm7302_vm1, %v7301_v2  ;;  %6581 = vmatprep.mubr.msk.f32.mxu1 %vm7302_vm1, %v7301_v2 }
  0xba   : > { %6511 = vmatmul.mubr.msk.f32.vlgmr.msra.gmra.mxu0 %vm429_vm2, %v7451_v13  ;;  %v5659_v13 = vld [vmem:[%s9456_s4 + $0x20] sm:$0xff] }
  0xbb   : > { %6513 = vmatprep.mubr.msk.f32.mxu0 %vm7302_vm1, %v7301_v2  ;;  %6580 = vmatpush3.msra.mxu1 %v5659_v13 }
  0xbc   : > { %6715 = vmatprep.subr.mxu1 %v7301_v2 }
  0xbe   : > { %6514 = vmatmul.mubr.msk.f32.gmra.mxu0 %vm429_vm2, %v7463_v14 }
  0xbf   : > { %6516 = vmatprep.mubr.msk.f32.mxu0 %vm7302_vm1, %v7301_v2 }
  0xc2   : > { %6517 = vmatmul.mubr.msk.f32.gmra.mxu0 %vm429_vm2, %v7474_v15 }
  0xc3   : > { %6519 = vmatprep.mubr.msk.f32.mxu0 %vm7302_vm1, %v7301_v2 }
  0xc6   : > { %6520 = vmatmul.mubr.msk.f32.gmra.mxu0 %vm429_vm2, %v7485_v16 }
  0xc7   : > { %6522 = vmatprep.mubr.msk.f32.mxu0 %vm7302_vm1, %v7301_v2 }
  0xca   : > { %6523 = vmatmul.mubr.msk.f32.gmra.mxu0 %vm429_vm2, %v7496_v17 }
  0xcb   : > { %6525 = vmatprep.mubr.msk.f32.mxu0 %vm7302_vm1, %v7301_v2 }
  0xce   : > { %6526 = vmatmul.mubr.msk.f32.gmra.mxu0 %vm429_vm2, %v7507_v18 }
  0xcf   : > { %6528 = vmatprep.mubr.msk.f32.mxu0 %vm7302_vm1, %v7301_v2 }
  0xd2   : > { %v563_v37 = vpop.f32.mrf.mxu0  ;;  %v739_v38 = vpop.f32.mrf.mxu1  ;;  %6529 = vmatmul.mubr.msk.f32.gmra.mxu0 %vm429_vm2, %v7518_v19 }
  0xd3   : > { %v7866_v39 = vadd.f32 %v739_v38, %v563_v37  ;;  %6531 = vmatprep.mubr.msk.f32.mxu0 %vm7302_vm1, %v7301_v2  ;;  %v1761_v38 = vld [vmem:[%s9456_s4] sm:$0xff] }
  0xd4   : > { %v6244_v40 = vpop.f32.mrf.mxu0  ;;  %v6311_v41 = vpop.f32.mrf.mxu1 }
  0xd6   : > { %v568_v42 = vpop.f32.mrf.mxu0  ;;  %v744_v43 = vpop.f32.mrf.mxu1  ;;  %6532 = vmatmul.mubr.msk.f32.gmra.mxu0 %vm429_vm2, %v7529_v20 }
  0xd7   : > { %v7872_v44 = vadd.f32 %v744_v43, %v568_v42  ;;  %6534 = vmatprep.mubr.msk.f32.mxu0 %vm7302_vm1, %v7301_v2 }
  0xd8   : > { %v6247_v45 = vpop.f32.mrf.mxu0  ;;  %v6314_v46 = vpop.f32.mrf.mxu1 }
  0xd9   : > { %v1741_v45 = vld [vmem:[#allocation2 + $0x8] sm:$0xff] }
  0xda   : > { %v573_v48 = vpop.f32.mrf.mxu0  ;;  %v749_v49 = vpop.f32.mrf.mxu1  ;;  %6535 = vmatmul.mubr.msk.f32.gmra.mxu0 %vm429_vm2, %v7540_v21  ;;  %6582 = vmatmul.mubr.msk.f32.vlgmr.msra.gmra.mxu1 %vm1714_vm3, %v1741_v45 }
  0xdb   : > { %v7881_v50 = vadd.f32 %v749_v49, %v573_v48  ;;  %6537 = vmatprep.mubr.msk.f32.mxu0 %vm7302_vm1, %v7301_v2  ;;  %6584 = vmatprep.mubr.msk.f32.mxu1 %vm7302_vm1, %v7301_v2 }
  0xdc   : > { %v6250_v51 = vpop.f32.mrf.mxu0  ;;  %v6317_v52 = vpop.f32.mrf.mxu1 }
  0xde   : > { %v578_v53 = vpop.f32.mrf.mxu0  ;;  %v754_v54 = vpop.f32.mrf.mxu1  ;;  %6538 = vmatmul.mubr.msk.f32.gmra.mxu0 %vm429_vm2, %v7551_v22 }
  0xdf   : > { %v7888_v55 = vadd.f32 %v754_v54, %v578_v53  ;;  %6540 = vmatprep.mubr.msk.f32.mxu0 %vm7302_vm1, %v7301_v2  ;;  %v5708_v54 = vld [vmem:[%s9456_s4 + $0x58] sm:$0xff] }
  0xe0   : > { %v6253_v56 = vpop.f32.mrf.mxu0  ;;  %v6320_v57 = vpop.f32.mrf.mxu1  ;;  %6716 = vmatpush3.msra.mxu1 %v5708_v54 }
  0xe1   : > { %6717 = vmatprep.subr.mxu1 %v7301_v2 }
  0xe2   : > { %v583_v58 = vpop.f32.mrf.mxu0  ;;  %v759_v59 = vpop.f32.mrf.mxu1  ;;  %6541 = vmatmul.mubr.msk.f32.gmra.mxu0 %vm429_vm2, %v7562_v23 }
  0xe3   : > { %v7894_v60 = vadd.f32 %v759_v59, %v583_v58  ;;  %6543 = vmatprep.mubr.msk.f32.mxu0 %vm7302_vm1, %v7301_v2 }
  0xe4   : > { %v6256_v61 = vpop.f32.mrf.mxu0  ;;  %v6323_v62 = vpop.f32.mrf.mxu1 }
  0xe5   : > { %v1740_v61 = vld [vmem:[#allocation2] sm:$0xff] }
  0xe6   : > { %v588_v63 = vpop.f32.mrf.mxu0  ;;  %v764_v0 = vpop.f32.mrf.mxu1  ;;  %6544 = vmatmul.mubr.msk.f32.gmra.mxu0 %vm429_vm2, %v7573_v24  ;;  %v1764_v24 = vld [vmem:[%s9456_s4 + $0x18] sm:$0xff] }
  0xe7   : > { %v7900_v1 = vadd.f32 %v764_v0, %v588_v63  ;;  %6546 = vmatprep.mubr.msk.f32.mxu0 %vm7302_vm1, %v7301_v2  ;;  %6645 = vmatpush3.msra.mxu0 %v1764_v24  ;;  %v5707_v24 = vld [vmem:[%s9456_s4 + $0x50] sm:$0xff] }
  0xe8   : > { %v6259_v3 = vpop.f32.mrf.mxu0  ;;  %v6326_v4 = vpop.f32.mrf.mxu1  ;;  %6646 = vmatprep.subr.mxu0 %v7301_v2  ;;  %6718 = vmatpush3.msra.mxu1 %v5707_v24 }
  0xe9   : > { %6719 = vmatprep.subr.mxu1 %v7301_v2 }
  0xea   : > { %v593_v5 = vpop.f32.mrf.mxu0  ;;  %v769_v6 = vpop.f32.mrf.mxu1  ;;  %6547 = vmatmul.mubr.msk.f32.gmra.mxu0 %vm429_vm2, %v7584_v25 }
  0xeb   : > { %v7906_v7 = vadd.f32 %v769_v6, %v593_v5  ;;  %6549 = vmatprep.mubr.msk.f32.mxu0 %vm7302_vm1, %v7301_v2 }
  0xec   : > { %v6262_v8 = vpop.f32.mrf.mxu0  ;;  %v6329_v9 = vpop.f32.mrf.mxu1 }
  0xee   : > { %v598_v10 = vpop.f32.mrf.mxu0  ;;  %v774_v11 = vpop.f32.mrf.mxu1  ;;  %6550 = vmatmul.mubr.msk.f32.gmra.mxu0 %vm429_vm2, %v7595_v26 }
  0xef   : > { %v7912_v12 = vadd.f32 %v774_v11, %v598_v10  ;;  %6552 = vmatprep.mubr.msk.f32.mxu0 %vm7302_vm1, %v7301_v2 }
  0xf0   : > { %v6265_v14 = vpop.f32.mrf.mxu0  ;;  %v6332_v15 = vpop.f32.mrf.mxu1 }
  0xf2   : > { %v603_v16 = vpop.f32.mrf.mxu0  ;;  %v779_v17 = vpop.f32.mrf.mxu1  ;;  %6553 = vmatmul.mubr.msk.f32.gmra.mxu0 %vm429_vm2, %v7606_v27  ;;  %v1763_v27 = vld [vmem:[%s9456_s4 + $0x10] sm:$0xff] }
  0xf3   : > { %v7922_v18 = vadd.f32 %v779_v17, %v603_v16  ;;  %6555 = vmatprep.mubr.msk.f32.mxu0 %vm7302_vm1, %v7301_v2  ;;  %6647 = vmatpush3.msra.mxu0 %v1763_v27 }
  0xf4   : > { %v6268_v19 = vpop.f32.mrf.mxu0  ;;  %v6335_v20 = vpop.f32.mrf.mxu1  ;;  %6648 = vmatprep.subr.mxu0 %v7301_v2 }
  0xf5   : > { %6649 = vmatpush3.msra.mxu0 %v1762_v34 }
  0xf6   : > { %v608_v21 = vpop.f32.mrf.mxu0  ;;  %v784_v22 = vpop.f32.mrf.mxu1  ;;  %6556 = vmatmul.mubr.msk.f32.gmra.mxu0 %vm429_vm2, %v7617_v28  ;;  %6650 = vmatprep.subr.mxu0 %v7301_v2 }
  0xf7   : > { %v7928_v23 = vadd.f32 %v784_v22, %v608_v21  ;;  %6558 = vmatprep.mubr.msk.f32.mxu0 %vm7302_vm1, %v7301_v2  ;;  %6651 = vmatpush3.msra.mxu0 %v1761_v38 }
  0xf8   : > { %v6271_v25 = vpop.f32.mrf.mxu0  ;;  %v6338_v26 = vpop.f32.mrf.mxu1  ;;  %6786 = vmatprep.subr.mxu0 %v7301_v2 }
  0xfa   : > { %v613_v28 = vpop.f32.mrf.mxu0  ;;  %v789_v31 = vpop.f32.mrf.mxu1  ;;  %6559 = vmatmul.mubr.msk.f32.gmra.mxu0 %vm429_vm2, %v7628_v29 }
  0xfb   : > { %v7949_v32 = vadd.f32 %v789_v31, %v613_v28  ;;  %6561 = vmatprep.mubr.msk.f32.mxu0 %vm7302_vm1, %v7301_v2 }
  0xfc   : > { %v6274_v36 = vpop.f32.mrf.mxu0  ;;  %v6341_v37 = vpop.f32.mrf.mxu1 }
  0xfe   : > { %v618_v29 = vpop.f32.mrf.mxu0  ;;  %v794_v40 = vpop.f32.mrf.mxu1  ;;  %6562 = vmatmul.mubr.msk.f32.gmra.mxu0 %vm429_vm2, %v7639_v30 }
  0xff   : > { %v7963_v41 = vadd.f32 %v794_v40, %v618_v29  ;;  %6564 = vmatprep.mubr.msk.f32.mxu0 %vm7302_vm1, %v7301_v2 }
 0x100   : > { %v6277_v42 = vpop.f32.mrf.mxu0  ;;  %v6344_v43 = vpop.f32.mrf.mxu1 }
 0x102   : > { %v623_v46 = vpop.f32.mrf.mxu0  ;;  %v799_v47 = vpop.f32.mrf.mxu1  ;;  %6565 = vmatmul.mubr.msk.f32.gmra.mxu0 %vm429_vm2, %v7811_v33  ;;  %v1425_v33 = vld [vmem:[%s7402_s30 + $0xc0] sm:$0xff] }
 0x103   : > { %v7973_v30 = vadd.f32 %v799_v47, %v623_v46  ;;  %6567 = vmatprep.mubr.msk.f32.mxu0 %vm7302_vm1, %v7301_v2 }
 0x104   : > { %v6280_v48 = vpop.f32.mrf.mxu0  ;;  %v6347_v49 = vpop.f32.mrf.mxu1 }
 0x106   : > { %v628_v51 = vpop.f32.mrf.mxu0  ;;  %v804_v52 = vpop.f32.mrf.mxu1  ;;  %6568 = vmatmul.mubr.msk.f32.gmra.mxu0 %vm429_vm2, %v7826_v35 }
 0x107   : > { %v7979_v53 = vadd.f32 %v804_v52, %v628_v51  ;;  %6570 = vmatprep.mubr.msk.f32.mxu0 %vm7302_vm1, %v7301_v2 }
 0x108   : > { %v6283_v56 = vpop.f32.mrf.mxu0  ;;  %v6350_v57 = vpop.f32.mrf.mxu1 }
 0x10a   : > { %v633_v58 = vpop.f32.mrf.mxu0  ;;  %v809_v59 = vpop.f32.mrf.mxu1  ;;  %6571 = vmatmul.mubr.msk.f32.gmra.mxu0 %vm429_vm2, %v1425_v33 }
 0x10b   : > { %v7989_v35 = vadd.f32 %v809_v59, %v633_v58  ;;  %6652 = vmatprep.mubr.msk.f32.mxu0 %vm7302_vm1, %v7301_v2 }
 0x10c   : > { %v6286_v62 = vpop.f32.mrf.mxu0  ;;  %v6353_v63 = vpop.f32.mrf.mxu1 }
 0x10e   : > { %v638_v0 = vpop.f32.mrf.mxu0  ;;  %v814_v3 = vpop.f32.mrf.mxu1  ;;  %6653 = vmatmul.mubr.msk.f32.vlgmr.msra.gmra.mxu0 %vm1714_vm3, %v1740_v61 }
 0x10f   : > { %v7994_v4 = vadd.f32 %v814_v3, %v638_v0  ;;  %6655 = vmatprep.mubr.msk.f32.mxu0 %vm7302_vm1, %v7301_v2 }
 0x110   : > { %v6289_v5 = vpop.f32.mrf.mxu0  ;;  %v6356_v6 = vpop.f32.mrf.mxu1 }
 0x112   : > { %v643_v8 = vpop.f32.mrf.mxu0  ;;  %v819_v9 = vpop.f32.mrf.mxu1  ;;  %6656 = vmatmul.mubr.msk.f32.gmra.mxu0 %vm1714_vm3, %v1741_v45 }
 0x113   : > { %v7999_v10 = vadd.f32 %v819_v9, %v643_v8  ;;  %6658 = vmatprep.mubr.msk.f32.mxu0 %vm7302_vm1, %v7301_v2 }
 0x114   : > { %v6292_v11 = vpop.f32.mrf.mxu0  ;;  %v6359_v13 = vpop.f32.mrf.mxu1 }
 0x116   : > { %v648_v14 = vpop.f32.mrf.mxu0  ;;  %v824_v15 = vpop.f32.mrf.mxu1 }
 0x117   : > { %v8003_v16 = vadd.f32 %v824_v15, %v648_v14 }
 0x118   : > { %v6295_v17 = vpop.f32.mrf.mxu0  ;;  %v6362_v19 = vpop.f32.mrf.mxu1 }
 0x11a   : > { %v653_v20 = vpop.f32.mrf.mxu0  ;;  %v829_v21 = vpop.f32.mrf.mxu1 }
 0x11b   : > { %v8005_v22 = vadd.f32 %v829_v21, %v653_v20 }
 0x11c   : > { %v6298_v25 = vpop.f32.mrf.mxu0  ;;  %v6365_v26 = vpop.f32.mrf.mxu1 }
 0x11e   : > { %v658_v27 = vpop.f32.mrf.mxu0  ;;  %v834_v28 = vpop.f32.mrf.mxu1 }
 0x11f   : > { %v8011_v31 = vadd.f32 %v834_v28, %v658_v27 }
 0x120   : > { %v6301_v34 = vpop.f32.mrf.mxu0  ;;  %v6368_v36 = vpop.f32.mrf.mxu1 }
 0x122   : > { %v663_v37 = vpop.f32.mrf.mxu0  ;;  %v839_v38 = vpop.f32.mrf.mxu1 }
 0x123   : > { %v8013_v29 = vadd.f32 %v839_v38, %v663_v37 }
 0x124   : > { %v6304_v40 = vpop.f32.mrf.mxu0  ;;  %v6371_v42 = vpop.f32.mrf.mxu1 }
 0x126   : > { %v999_v43 = vpop.f32.mrf.mxu0  ;;  %v1280_v45 = vpop.f32.mrf.mxu1 }
 0x127   : > { %v1103_v46 = vadd.f32 %v999_v43, %v7866_v39  ;;  %v5706_v39 = vld [vmem:[%s9456_s4 + $0x48] sm:$0xff] }
 0x128   : > { %v6378_v47 = vpop.f32.mrf.mxu0  ;;  %v6445_v48 = vpop.f32.mrf.mxu1  ;;  %6720 = vmatpush3.msra.mxu1 %v5706_v39 }
 0x129   : > { %v8016_v49 = vadd.f32 %v1280_v45, %v1103_v46  ;;  %6721 = vmatprep.subr.mxu1 %v7301_v2 }
 0x12a   : > { %v1004_v51 = vpop.f32.mrf.mxu0  ;;  %v1285_v52 = vpop.f32.mrf.mxu1 }
 0x12b   : > { %v1104_v33 = vadd.f32 %v1004_v51, %v7872_v44 }
 0x12c   : > { %v6381_v54 = vpop.f32.mrf.mxu0  ;;  %v6448_v56 = vpop.f32.mrf.mxu1 }
 0x12d   : > { %v8019_v57 = vadd.f32 %v1285_v52, %v1104_v33  ;;  %v5733_v56 = vld [vmem:[%s9456_s4 + $0x78] sm:$0xff] }
 0x12e   : > { %v1009_v58 = vpop.f32.mrf.mxu0  ;;  %v1290_v59 = vpop.f32.mrf.mxu1  ;;  %6787 = vmatpush3.msra.mxu0 %v5733_v56 }
 0x12f   : > { %v1105_v61 = vadd.f32 %v1009_v58, %v7881_v50  ;;  %6788 = vmatprep.subr.mxu0 %v7301_v2 }
 0x130   : > { %v6384_v62 = vpop.f32.mrf.mxu0  ;;  %v6451_v63 = vpop.f32.mrf.mxu1 }
 0x131   : > { %v8025_v0 = vadd.f32 %v1290_v59, %v1105_v61  ;;  %v5732_v61 = vld [vmem:[%s9456_s4 + $0x70] sm:$0xff]  ;;  %v5731_v63 = vld [vmem:[%s9456_s4 + $0x68] sm:$0xff] }
 0x132   : > { %v1014_v44 = vpop.f32.mrf.mxu0  ;;  %v1295_v3 = vpop.f32.mrf.mxu1  ;;  %6789 = vmatpush3.msra.mxu0 %v5732_v61 }
 0x133   : > { %v1106_v5 = vadd.f32 %v1014_v44, %v7888_v55  ;;  %6790 = vmatprep.subr.mxu0 %v7301_v2 }
 0x134   : > { %v6387_v6 = vpop.f32.mrf.mxu0  ;;  %v6454_v8 = vpop.f32.mrf.mxu1  ;;  %6791 = vmatpush3.msra.mxu0 %v5731_v63 }
 0x135   : > { %v8029_v9 = vadd.f32 %v1295_v3, %v1106_v5  ;;  %v5730_v5 = vld [vmem:[%s9456_s4 + $0x60] sm:$0xff]  ;;  %6792 = vmatprep.subr.mxu0 %v7301_v2 }
 0x136   : > { %v1019_v50 = vpop.f32.mrf.mxu0  ;;  %v1300_v11 = vpop.f32.mrf.mxu1  ;;  %6793 = vmatpush3.msra.mxu0 %v5730_v5 }
 0x137   : > { %v1107_v13 = vadd.f32 %v1019_v50, %v7894_v60  ;;  %6928 = vmatprep.subr.mxu0 %v7301_v2 }
 0x138   : > { %v6390_v14 = vpop.f32.mrf.mxu0  ;;  %v6457_v15 = vpop.f32.mrf.mxu1 }
 0x139   : > { %v8032_v17 = vadd.f32 %v1300_v11, %v1107_v13 }
 0x13a   : > { %v1024_v19 = vpop.f32.mrf.mxu0  ;;  %v1305_v20 = vpop.f32.mrf.mxu1 }
 0x13b   : > { %v1108_v21 = vadd.f32 %v1024_v19, %v7900_v1 }
 0x13c   : > { %v6393_v24 = vpop.f32.mrf.mxu0  ;;  %v6460_v25 = vpop.f32.mrf.mxu1 }
 0x13d   : > { %v8035_v26 = vadd.f32 %v1305_v20, %v1108_v21 }
 0x13e   : > { %v1029_v55 = vpop.f32.mrf.mxu0  ;;  %v1310_v27 = vpop.f32.mrf.mxu1 }
 0x13f   : > { %v1109_v28 = vadd.f32 %v1029_v55, %v7906_v7  ;;  %v5705_v7 = vld [vmem:[%s9456_s4 + $0x40] sm:$0xff] }
 0x140   : > { %v6396_v34 = vpop.f32.mrf.mxu0  ;;  %v6463_v36 = vpop.f32.mrf.mxu1  ;;  %6722 = vmatpush3.msra.mxu1 %v5705_v7 }
 0x141   : > { %v8038_v37 = vadd.f32 %v1310_v27, %v1109_v28  ;;  %6857 = vmatprep.subr.mxu1 %v7301_v2 }
 0x142   : > { %v1034_v60 = vpop.f32.mrf.mxu0  ;;  %v1315_v38 = vpop.f32.mrf.mxu1 }
 0x143   : > { %v1110_v40 = vadd.f32 %v1034_v60, %v7912_v12 }
 0x144   : > { %v6399_v42 = vpop.f32.mrf.mxu0  ;;  %v6466_v43 = vpop.f32.mrf.mxu1 }
 0x145   : > { %v8041_v45 = vadd.f32 %v1315_v38, %v1110_v40 }
 0x146   : > { %v1039_v1 = vpop.f32.mrf.mxu0  ;;  %v1320_v46 = vpop.f32.mrf.mxu1 }
 0x147   : > { %v1111_v47 = vadd.f32 %v1039_v1, %v7922_v18 }
 0x148   : > { %v6402_v48 = vpop.f32.mrf.mxu0  ;;  %v6469_v51 = vpop.f32.mrf.mxu1 }
 0x149   : > { %v8047_v52 = vadd.f32 %v1320_v46, %v1111_v47 }
 0x14a   : > { %v1044_v12 = vpop.f32.mrf.mxu0  ;;  %v1325_v33 = vpop.f32.mrf.mxu1 }
 0x14b   : > { %v1112_v54 = vadd.f32 %v1044_v12, %v7928_v23 }
 0x14c   : > { %v6405_v18 = vpop.f32.mrf.mxu0  ;;  %v6472_v58 = vpop.f32.mrf.mxu1 }
 0x14d   : > { %v8054_v59 = vadd.f32 %v1325_v33, %v1112_v54 }
 0x14e   : > { %v1049_v39 = vpop.f32.mrf.mxu0  ;;  %v1330_v62 = vpop.f32.mrf.mxu1 }
 0x14f   : > { %v1113_v23 = vadd.f32 %v1049_v39, %v7949_v32 }
 0x150   : > { %v6408_v44 = vpop.f32.mrf.mxu0  ;;  %v6475_v3 = vpop.f32.mrf.mxu1 }
 0x151   : > { %v8068_v6 = vadd.f32 %v1330_v62, %v1113_v23 }
 0x152   : > { %v1054_v8 = vpop.f32.mrf.mxu0  ;;  %v1335_v50 = vpop.f32.mrf.mxu1 }
 0x153   : > { %v1114_v32 = vadd.f32 %v1054_v8, %v7963_v41 }
 0x154   : > { %v6411_v11 = vpop.f32.mrf.mxu0  ;;  %v6478_v13 = vpop.f32.mrf.mxu1 }
 0x155   : > { %v8073_v14 = vadd.f32 %v1335_v50, %v1114_v32 }
 0x156   : > { %v1059_v15 = vpop.f32.mrf.mxu0  ;;  %v1340_v19 = vpop.f32.mrf.mxu1 }
 0x157   : > { %v1115_v20 = vadd.f32 %v1059_v15, %v7973_v30 }
 0x158   : > { %v6414_v21 = vpop.f32.mrf.mxu0  ;;  %v6481_v24 = vpop.f32.mrf.mxu1 }
 0x159   : > { %v8076_v25 = vadd.f32 %v1340_v19, %v1115_v20 }
 0x15a   : > { %v1064_v55 = vpop.f32.mrf.mxu0  ;;  %v1345_v27 = vpop.f32.mrf.mxu1 }
 0x15b   : > { %v1116_v28 = vadd.f32 %v1064_v55, %v7979_v53 }
 0x15c   : > { %v6417_v34 = vpop.f32.mrf.mxu0  ;;  %v6484_v41 = vpop.f32.mrf.mxu1 }
 0x15d   : > { %v8079_v36 = vadd.f32 %v1345_v27, %v1116_v28  ;;  %v8105_v27 = vld [vmem:[%s9455_s3] ss:$0 sm:$0xff] }
 0x15e   : > { %v1069_v60 = vpop.f32.mrf.mxu0  ;;  %v1350_v38 = vpop.f32.mrf.mxu1 }
 0x15f   : > { %v1117_v40 = vadd.f32 %v1069_v60, %v7989_v35 }
 0x160   : > { %v6420_v42 = vpop.f32.mrf.mxu0  ;;  %v6487_v43 = vpop.f32.mrf.mxu1 }
 0x161   : > { %v8082_v1 = vadd.f32 %v1350_v38, %v1117_v40 }
 0x162   : > { %v1074_v30 = vpop.f32.mrf.mxu0  ;;  %v1355_v46 = vpop.f32.mrf.mxu1 }
 0x163   : > { %v1118_v47 = vadd.f32 %v1074_v30, %v7994_v4 }
 0x164   : > { %v6423_v7 = vpop.f32.mrf.mxu0  ;;  %v6490_v48 = vpop.f32.mrf.mxu1 }
 0x165   : > { %v8085_v51 = vadd.f32 %v1355_v46, %v1118_v47 }
 0x166   : > { %v1079_v53 = vpop.f32.mrf.mxu0  ;;  %v1360_v12 = vpop.f32.mrf.mxu1 }
 0x167   : > { %v1119_v33 = vadd.f32 %v1079_v53, %v7999_v10 }
 0x168   : > { %v6426_v54 = vpop.f32.mrf.mxu0  ;;  %v6493_v56 = vpop.f32.mrf.mxu1 }
 0x169   : > { %v8088_v18 = vadd.f32 %v1360_v12, %v1119_v33 }
 0x16a   : > { %v1084_v35 = vpop.f32.mrf.mxu0  ;;  %v1365_v58 = vpop.f32.mrf.mxu1 }
 0x16b   : > { %v1120_v61 = vadd.f32 %v1084_v35, %v8003_v16 }
 0x16c   : > { %v6429_v39 = vpop.f32.mrf.mxu0  ;;  %v6496_v62 = vpop.f32.mrf.mxu1 }
 0x16d   : > { %v8091_v23 = vadd.f32 %v1365_v58, %v1120_v61 }
 0x16e   : > { %v1089_v4 = vpop.f32.mrf.mxu0  ;;  %v1370_v63 = vpop.f32.mrf.mxu1 }
 0x16f   : > { %v1121_v44 = vadd.f32 %v1089_v4, %v8005_v22 }
 0x170   : > { %v6432_v3 = vpop.f32.mrf.mxu0  ;;  %v6499_v5 = vpop.f32.mrf.mxu1 }
 0x171   : > { %v8094_v8 = vadd.f32 %v1370_v63, %v1121_v44 }
 0x172   : > { %v1094_v10 = vpop.f32.mrf.mxu0  ;;  %v1375_v50 = vpop.f32.mrf.mxu1 }
 0x173   : > { %v1122_v32 = vadd.f32 %v1094_v10, %v8011_v31 }
 0x174   : > { %v6435_v11 = vpop.f32.mrf.mxu0  ;;  %v6502_v13 = vpop.f32.mrf.mxu1 }
 0x175   : > { %v8097_v15 = vadd.f32 %v1375_v50, %v1122_v32 }
 0x176   : > { %v1099_v16 = vpop.f32.mrf.mxu0  ;;  %v1380_v19 = vpop.f32.mrf.mxu1 }
 0x177   : > { %v1123_v20 = vadd.f32 %v1099_v16, %v8013_v29 }
 0x178   : > { %v6438_v21 = vpop.f32.mrf.mxu0  ;;  %v6505_v24 = vpop.f32.mrf.mxu1 }
 0x179   : > { %v8100_v55 = vadd.f32 %v1380_v19, %v1123_v20 }
 0x17a   : > { %v1561_v22 = vpop.f32.mrf.mxu0 }
 0x17b   : > { %v1665_v31 = vadd.f32 %v1561_v22, %v8016_v49 }
 0x17c   : > { %v6512_v28 = vpop.f32.mrf.mxu0 }
 0x17d   : > { %v1693_v34 = vadd.f32 %v8105_v27, %v1665_v31 }
 0x17e   : > { %v1566_v41 = vpop.f32.mrf.mxu0 }
 0x17f   : > { %1719 = vst.msk [vmem:[#allocation2 + $0x10] sm:$0xff] %vm1714_vm3, %v1693_v34  ;;  %v1666_v29 = vadd.f32 %v1566_v41, %v8019_v57 }
 0x180   : > { %v6515_v60 = vpop.f32.mrf.mxu0 }
 0x181   : > { %v1694_v38 = vadd.f32 %v8105_v27, %v1666_v29 }
 0x182   : > { %v1571_v40 = vpop.f32.mrf.mxu0 }
 0x183   : > { %1720 = vst.msk [vmem:[#allocation2 + $0x18] sm:$0xff] %vm1714_vm3, %v1694_v38  ;;  %v1667_v42 = vadd.f32 %v1571_v40, %v8025_v0 }
 0x184   : > { %v6518_v43 = vpop.f32.mrf.mxu0 }
 0x185   : > { %v1695_v30 = vadd.f32 %v8105_v27, %v1667_v42 }
 0x186   : > { %v1576_v49 = vpop.f32.mrf.mxu0  ;;  %v8115_v46 = vld [vmem:[#allocation2 + $0x10] sm:$0xff] }
 0x187   : > { %1721 = vst.msk [vmem:[#allocation2 + $0x20] sm:$0xff] %vm1714_vm3, %v1695_v30  ;;  %v1668_v47 = vadd.f32 %v1576_v49, %v8029_v9  ;;  %6585 = vmatmul.mubr.msk.f32.gmra.mxu1 %vm1714_vm3, %v8115_v46  ;;  %6659 = vmatmul.mubr.msk.f32.gmra.mxu0 %vm1714_vm3, %v8115_v46 }
 0x188   : > { %v6521_v57 = vpop.f32.mrf.mxu0  ;;  %6587 = vmatprep.mubr.msk.f32.mxu1 %vm7302_vm1, %v7301_v2  ;;  %6661 = vmatprep.mubr.msk.f32.mxu0 %vm7302_vm1, %v7301_v2 }
 0x189   : > { %v1696_v0 = vadd.f32 %v8105_v27, %v1668_v47 }
 0x18a   : > { %v1581_v7 = vpop.f32.mrf.mxu0  ;;  %v8128_v48 = vld [vmem:[#allocation2 + $0x18] sm:$0xff] }
 0x18b   : > { %1722 = vst.msk [vmem:[#allocation2 + $0x28] sm:$0xff] %vm1714_vm3, %v1696_v0  ;;  %v1669_v9 = vadd.f32 %v1581_v7, %v8032_v17  ;;  %6588 = vmatmul.mubr.msk.f32.gmra.mxu1 %vm1714_vm3, %v8128_v48  ;;  %6662 = vmatmul.mubr.msk.f32.gmra.mxu0 %vm1714_vm3, %v8128_v48 }
 0x18c   : > { %v6524_v53 = vpop.f32.mrf.mxu0  ;;  %6590 = vmatprep.mubr.msk.f32.mxu1 %vm7302_vm1, %v7301_v2  ;;  %6664 = vmatprep.mubr.msk.f32.mxu0 %vm7302_vm1, %v7301_v2 }
 0x18d   : > { %v1697_v12 = vadd.f32 %v8105_v27, %v1669_v9 }
 0x18e   : > { %v1586_v33 = vpop.f32.mrf.mxu0  ;;  %v8141_v54 = vld [vmem:[#allocation2 + $0x20] sm:$0xff] }
 0x18f   : > { %1723 = vst.msk [vmem:[#allocation2 + $0x30] sm:$0xff] %vm1714_vm3, %v1697_v12  ;;  %v1670_v17 = vadd.f32 %v1586_v33, %v8035_v26  ;;  %6591 = vmatmul.mubr.msk.f32.gmra.mxu1 %vm1714_vm3, %v8141_v54  ;;  %6665 = vmatmul.mubr.msk.f32.gmra.mxu0 %vm1714_vm3, %v8141_v54 }
 0x190   : > { %v6527_v56 = vpop.f32.mrf.mxu0  ;;  %6593 = vmatprep.mubr.msk.f32.mxu1 %vm7302_vm1, %v7301_v2  ;;  %6667 = vmatprep.mubr.msk.f32.mxu0 %vm7302_vm1, %v7301_v2 }
 0x191   : > { %v1698_v35 = vadd.f32 %v8105_v27, %v1670_v17 }
 0x192   : > { %v1591_v58 = vpop.f32.mrf.mxu0  ;;  %v8154_v61 = vld [vmem:[#allocation2 + $0x28] sm:$0xff] }
 0x193   : > { %1724 = vst.msk [vmem:[#allocation2 + $0x38] sm:$0xff] %vm1714_vm3, %v1698_v35  ;;  %v1671_v26 = vadd.f32 %v1591_v58, %v8038_v37  ;;  %6594 = vmatmul.mubr.msk.f32.gmra.mxu1 %vm1714_vm3, %v8154_v61  ;;  %6668 = vmatmul.mubr.msk.f32.gmra.mxu0 %vm1714_vm3, %v8154_v61 }
 0x194   : > { %v6530_v39 = vpop.f32.mrf.mxu0  ;;  %6596 = vmatprep.mubr.msk.f32.mxu1 %vm7302_vm1, %v7301_v2  ;;  %6670 = vmatprep.mubr.msk.f32.mxu0 %vm7302_vm1, %v7301_v2 }
 0x195   : > { %v1699_v62 = vadd.f32 %v8105_v27, %v1671_v26 }
 0x196   : > { %v1596_v4 = vpop.f32.mrf.mxu0  ;;  %v8167_v63 = vld [vmem:[#allocation2 + $0x30] sm:$0xff] }
 0x197   : > { %1725 = vst.msk [vmem:[#allocation2 + $0x40] sm:$0xff] %vm1714_vm3, %v1699_v62  ;;  %v1672_v37 = vadd.f32 %v1596_v4, %v8041_v45  ;;  %6597 = vmatmul.mubr.msk.f32.gmra.mxu1 %vm1714_vm3, %v8167_v63  ;;  %6671 = vmatmul.mubr.msk.f32.gmra.mxu0 %vm1714_vm3, %v8167_v63 }
 0x198   : > { %v6533_v44 = vpop.f32.mrf.mxu0  ;;  %6599 = vmatprep.mubr.msk.f32.mxu1 %vm7302_vm1, %v7301_v2  ;;  %6673 = vmatprep.mubr.msk.f32.mxu0 %vm7302_vm1, %v7301_v2 }
 0x199   : > { %v1700_v3 = vadd.f32 %v8105_v27, %v1672_v37 }
 0x19a   : > { %v1601_v5 = vpop.f32.mrf.mxu0  ;;  %v8180_v10 = vld [vmem:[#allocation2 + $0x38] sm:$0xff]  ;;  %v1900_v37 = vpop.f32.mrf.mxu1 }
 0x19b   : > { %1726 = vst.msk [vmem:[#allocation2 + $0x48] sm:$0xff] %vm1714_vm3, %v1700_v3  ;;  %v1673_v45 = vadd.f32 %v1601_v5, %v8047_v52  ;;  %6600 = vmatmul.mubr.msk.f32.gmra.mxu1 %vm1714_vm3, %v8180_v10  ;;  %6674 = vmatmul.mubr.msk.f32.gmra.mxu0 %vm1714_vm3, %v8180_v10 }
 0x19c   : > { %v6536_v50 = vpop.f32.mrf.mxu0  ;;  %6602 = vmatprep.mubr.msk.f32.mxu1 %vm7302_vm1, %v7301_v2  ;;  %6676 = vmatprep.mubr.msk.f32.mxu0 %vm7302_vm1, %v7301_v2  ;;  %v6583_v5 = vpop.f32.mrf.mxu1 }
 0x19d   : > { %v1701_v32 = vadd.f32 %v8105_v27, %v1673_v45 }
 0x19e   : > { %v1606_v11 = vpop.f32.mrf.mxu0  ;;  %v8193_v13 = vld [vmem:[#allocation2 + $0x40] sm:$0xff] }
 0x19f   : > { %1727 = vst.msk [vmem:[#allocation2 + $0x50] sm:$0xff] %vm1714_vm3, %v1701_v32  ;;  %v1674_v52 = vadd.f32 %v1606_v11, %v8054_v59  ;;  %6603 = vmatmul.mubr.msk.f32.gmra.mxu1 %vm1714_vm3, %v8193_v13  ;;  %6677 = vmatmul.mubr.msk.f32.gmra.mxu0 %vm1714_vm3, %v8193_v13 }
 0x1a0   : > { %v6539_v16 = vpop.f32.mrf.mxu0  ;;  %6605 = vmatprep.mubr.msk.f32.mxu1 %vm7302_vm1, %v7301_v2  ;;  %6679 = vmatprep.mubr.msk.f32.mxu0 %vm7302_vm1, %v7301_v2 }
 0x1a1   : > { %v1702_v19 = vadd.f32 %v8105_v27, %v1674_v52 }
 0x1a2   : > { %v1611_v20 = vpop.f32.mrf.mxu0  ;;  %v8206_v21 = vld [vmem:[#allocation2 + $0x48] sm:$0xff] }
 0x1a3   : > { %1728 = vst.msk [vmem:[#allocation2 + $0x58] sm:$0xff] %vm1714_vm3, %v1702_v19  ;;  %v1675_v59 = vadd.f32 %v1611_v20, %v8068_v6  ;;  %6606 = vmatmul.mubr.msk.f32.gmra.mxu1 %vm1714_vm3, %v8206_v21  ;;  %6680 = vmatmul.mubr.msk.f32.gmra.mxu0 %vm1714_vm3, %v8206_v21 }
 0x1a4   : > { %v6542_v24 = vpop.f32.mrf.mxu0  ;;  %6608 = vmatprep.mubr.msk.f32.mxu1 %vm7302_vm1, %v7301_v2  ;;  %6682 = vmatprep.mubr.msk.f32.mxu0 %vm7302_vm1, %v7301_v2 }
 0x1a5   : > { %v1703_v22 = vadd.f32 %v8105_v27, %v1675_v59 }
 0x1a6   : > { %v1616_v31 = vpop.f32.mrf.mxu0  ;;  %v8219_v28 = vld [vmem:[#allocation2 + $0x50] sm:$0xff] }
 0x1a7   : > { %1729 = vst.msk [vmem:[#allocation2 + $0x60] sm:$0xff] %vm1714_vm3, %v1703_v22  ;;  %v1676_v6 = vadd.f32 %v1616_v31, %v8073_v14  ;;  %6609 = vmatmul.mubr.msk.f32.gmra.mxu1 %vm1714_vm3, %v8219_v28  ;;  %6683 = vmatmul.mubr.msk.f32.gmra.mxu0 %vm1714_vm3, %v8219_v28 }
 0x1a8   : > { %v6545_v34 = vpop.f32.mrf.mxu0  ;;  %6611 = vmatprep.mubr.msk.f32.mxu1 %vm7302_vm1, %v7301_v2  ;;  %6685 = vmatprep.mubr.msk.f32.mxu0 %vm7302_vm1, %v7301_v2 }
 0x1a9   : > { %v1704_v41 = vadd.f32 %v8105_v27, %v1676_v6 }
 0x1aa   : > { %v1621_v29 = vpop.f32.mrf.mxu0  ;;  %v8232_v60 = vld [vmem:[#allocation2 + $0x58] sm:$0xff] }
 0x1ab   : > { %1730 = vst.msk [vmem:[#allocation2 + $0x68] sm:$0xff] %vm1714_vm3, %v1704_v41  ;;  %v1677_v14 = vadd.f32 %v1621_v29, %v8076_v25  ;;  %6612 = vmatmul.mubr.msk.f32.gmra.mxu1 %vm1714_vm3, %v8232_v60  ;;  %6686 = vmatmul.mubr.msk.f32.gmra.mxu0 %vm1714_vm3, %v8232_v60  ;;  %v5758_v29 = vld [vmem:[%s9456_s4 + $0x98] sm:$0xff] }
 0x1ac   : > { %v6548_v38 = vpop.f32.mrf.mxu0  ;;  %6614 = vmatprep.mubr.msk.f32.mxu1 %vm7302_vm1, %v7301_v2  ;;  %6688 = vmatprep.mubr.msk.f32.mxu0 %vm7302_vm1, %v7301_v2 }
 0x1ad   : > { %v1705_v40 = vadd.f32 %v8105_v27, %v1677_v14  ;;  %v5757_v14 = vld [vmem:[%s9456_s4 + $0x90] sm:$0xff] }
 0x1ae   : > { %v1626_v42 = vpop.f32.mrf.mxu0  ;;  %v8245_v43 = vld [vmem:[#allocation2 + $0x60] sm:$0xff] }
 0x1af   : > { %1731 = vst.msk [vmem:[#allocation2 + $0x70] sm:$0xff] %vm1714_vm3, %v1705_v40  ;;  %v1678_v25 = vadd.f32 %v1626_v42, %v8079_v36  ;;  %6615 = vmatmul.mubr.msk.f32.gmra.mxu1 %vm1714_vm3, %v8245_v43  ;;  %6689 = vmatmul.mubr.msk.f32.gmra.mxu0 %vm1714_vm3, %v8245_v43  ;;  %v8544_v40 = vld [vmem:[#allocation2 + $0xb8] sm:$0xff] }
 0x1b0   : > { %v6551_v30 = vpop.f32.mrf.mxu0  ;;  %6617 = vmatprep.mubr.msk.f32.mxu1 %vm7302_vm1, %v7301_v2  ;;  %6691 = vmatprep.mubr.msk.f32.mxu0 %vm7302_vm1, %v7301_v2  ;;  %v5788_v42 = vld [vmem:[%s9458_s6 + $0x78] sm:$0xff] }
 0x1b1   : > { %v1706_v49 = vadd.f32 %v8105_v27, %v1678_v25  ;;  %v5787_v25 = vld [vmem:[%s9458_s6 + $0x70] sm:$0xff] }
 0x1b2   : > { %v1631_v47 = vpop.f32.mrf.mxu0  ;;  %v8258_v57 = vld [vmem:[#allocation2 + $0x68] sm:$0xff] }
 0x1b3   : > { %1732 = vst.msk [vmem:[#allocation2 + $0x78] sm:$0xff] %vm1714_vm3, %v1706_v49  ;;  %v1679_v36 = vadd.f32 %v1631_v47, %v8082_v1  ;;  %6618 = vmatmul.mubr.msk.f32.gmra.mxu1 %vm1714_vm3, %v8258_v57  ;;  %6692 = vmatmul.mubr.msk.f32.gmra.mxu0 %vm1714_vm3, %v8258_v57 }
 0x1b4   : > { %v6554_v0 = vpop.f32.mrf.mxu0  ;;  %6620 = vmatprep.mubr.msk.f32.mxu1 %vm7302_vm1, %v7301_v2  ;;  %6694 = vmatprep.mubr.msk.f32.mxu0 %vm7302_vm1, %v7301_v2 }
 0x1b5   : > { %v1707_v7 = vadd.f32 %v8105_v27, %v1679_v36 }
 0x1b6   : > { %v1636_v9 = vpop.f32.mrf.mxu0  ;;  %v8271_v53 = vld [vmem:[#allocation2 + $0x70] sm:$0xff] }
 0x1b7   : > { %1733 = vst.msk [vmem:[#allocation2 + $0x80] sm:$0xff] %vm1714_vm3, %v1707_v7  ;;  %v1680_v1 = vadd.f32 %v1636_v9, %v8085_v51  ;;  %6621 = vmatmul.mubr.msk.f32.gmra.mxu1 %vm1714_vm3, %v8271_v53  ;;  %6695 = vmatmul.mubr.msk.f32.gmra.mxu0 %vm1714_vm3, %v8271_v53 }
 0x1b8   : > { %v6557_v12 = vpop.f32.mrf.mxu0  ;;  %6623 = vmatprep.mubr.msk.f32.mxu1 %vm7302_vm1, %v7301_v2  ;;  %6697 = vmatprep.mubr.msk.f32.mxu0 %vm7302_vm1, %v7301_v2 }
 0x1b9   : > { %v1708_v33 = vadd.f32 %v8105_v27, %v1680_v1 }
 0x1ba   : > { %v1641_v17 = vpop.f32.mrf.mxu0  ;;  %v8284_v56 = vld [vmem:[#allocation2 + $0x78] sm:$0xff] }
 0x1bb   : > { %1734 = vst.msk [vmem:[#allocation2 + $0x88] sm:$0xff] %vm1714_vm3, %v1708_v33  ;;  %v1681_v51 = vadd.f32 %v1641_v17, %v8088_v18  ;;  %6624 = vmatmul.mubr.msk.f32.gmra.mxu1 %vm1714_vm3, %v8284_v56  ;;  %6698 = vmatmul.mubr.msk.f32.gmra.mxu0 %vm1714_vm3, %v8284_v56 }
 0x1bc   : > { %v6560_v35 = vpop.f32.mrf.mxu0  ;;  %6626 = vmatprep.mubr.msk.f32.mxu1 %vm7302_vm1, %v7301_v2  ;;  %6700 = vmatprep.mubr.msk.f32.mxu0 %vm7302_vm1, %v7301_v2 }
 0x1bd   : > { %v1709_v58 = vadd.f32 %v8105_v27, %v1681_v51 }
 0x1be   : > { %v1646_v26 = vpop.f32.mrf.mxu0  ;;  %v8297_v39 = vld [vmem:[#allocation2 + $0x80] sm:$0xff] }
 0x1bf   : > { %1735 = vst.msk [vmem:[#allocation2 + $0x90] sm:$0xff] %vm1714_vm3, %v1709_v58  ;;  %v1682_v18 = vadd.f32 %v1646_v26, %v8091_v23  ;;  %6627 = vmatmul.mubr.msk.f32.gmra.mxu1 %vm1714_vm3, %v8297_v39  ;;  %6701 = vmatmul.mubr.msk.f32.gmra.mxu0 %vm1714_vm3, %v8297_v39 }
 0x1c0   : > { %v6563_v62 = vpop.f32.mrf.mxu0  ;;  %6629 = vmatprep.mubr.msk.f32.mxu1 %vm7302_vm1, %v7301_v2  ;;  %6703 = vmatprep.mubr.msk.f32.mxu0 %vm7302_vm1, %v7301_v2 }
 0x1c1   : > { %v1710_v4 = vadd.f32 %v8105_v27, %v1682_v18 }
 0x1c2   : > { %v1651_v44 = vpop.f32.mrf.mxu0  ;;  %v8310_v3 = vld [vmem:[#allocation2 + $0x88] sm:$0xff] }
 0x1c3   : > { %1736 = vst.msk [vmem:[#allocation2 + $0x98] sm:$0xff] %vm1714_vm3, %v1710_v4  ;;  %v1683_v23 = vadd.f32 %v1651_v44, %v8094_v8  ;;  %6630 = vmatmul.mubr.msk.f32.gmra.mxu1 %vm1714_vm3, %v8310_v3  ;;  %6704 = vmatmul.mubr.msk.f32.gmra.mxu0 %vm1714_vm3, %v8310_v3 }
 0x1c4   : > { %v6566_v45 = vpop.f32.mrf.mxu0  ;;  %6632 = vmatprep.mubr.msk.f32.mxu1 %vm7302_vm1, %v7301_v2  ;;  %6706 = vmatprep.mubr.msk.f32.mxu0 %vm7302_vm1, %v7301_v2 }
 0x1c5   : > { %v1711_v50 = vadd.f32 %v8105_v27, %v1683_v23 }
 0x1c6   : > { %v1656_v32 = vpop.f32.mrf.mxu0  ;;  %v8323_v11 = vld [vmem:[#allocation2 + $0x90] sm:$0xff] }
 0x1c7   : > { %1737 = vst.msk [vmem:[#allocation2 + $0xa0] sm:$0xff] %vm1714_vm3, %v1711_v50  ;;  %v1684_v8 = vadd.f32 %v1656_v32, %v8097_v15  ;;  %6633 = vmatmul.mubr.msk.f32.gmra.mxu1 %vm1714_vm3, %v8323_v11  ;;  %6707 = vmatmul.mubr.msk.f32.gmra.mxu0 %vm1714_vm3, %v8323_v11 }
 0x1c8   : > { %v6569_v52 = vpop.f32.mrf.mxu0  ;;  %6635 = vmatprep.mubr.msk.f32.mxu1 %vm7302_vm1, %v7301_v2  ;;  %6709 = vmatprep.mubr.msk.f32.mxu0 %vm7302_vm1, %v7301_v2 }
 0x1c9   : > { %v1712_v16 = vadd.f32 %v8105_v27, %v1684_v8 }
 0x1ca   : > { %v1661_v19 = vpop.f32.mrf.mxu0  ;;  %v8336_v20 = vld [vmem:[#allocation2 + $0x98] sm:$0xff] }
 0x1cb   : > { %1738 = vst.msk [vmem:[#allocation2 + $0xa8] sm:$0xff] %vm1714_vm3, %v1712_v16  ;;  %v1685_v15 = vadd.f32 %v1661_v19, %v8100_v55  ;;  %6636 = vmatmul.mubr.msk.f32.gmra.mxu1 %vm1714_vm3, %v8336_v20  ;;  %6710 = vmatmul.mubr.msk.f32.gmra.mxu0 %vm1714_vm3, %v8336_v20  ;;  %v3097_v19 = vld [vmem:[%s9458_s6 + $0x38] sm:$0xff] }
 0x1cc   : > { %6638 = vmatprep.mubr.msk.f32.mxu1 %vm7302_vm1, %v7301_v2  ;;  %6712 = vmatprep.mubr.msk.f32.mxu0 %vm7302_vm1, %v7301_v2  ;;  %v6572_v59 = vpop.f32.mrf.mxu0 }
 0x1cd   : > { %v1713_v24 = vadd.f32 %v8105_v27, %v1685_v15 }
 0x1ce   : > { %v8349_v22 = vld [vmem:[#allocation2 + $0xa0] sm:$0xff]  ;;  %v2073_v31 = vpop.f32.mrf.mxu0 }
 0x1cf   : > { %1739 = vst.msk [vmem:[#allocation2 + $0xb0] sm:$0xff] %vm1714_vm3, %v1713_v24  ;;  %6639 = vmatmul.mubr.msk.f32.gmra.mxu1 %vm1714_vm3, %v8349_v22  ;;  %6713 = vmatmul.mubr.msk.f32.gmra.mxu0 %vm1714_vm3, %v8349_v22  ;;  %v8356_v55 = vadd.f32 %v2073_v31, %v1900_v37 }
 0x1d0   : > { %6641 = vmatprep.mubr.msk.f32.mxu1 %vm7302_vm1, %v7301_v2  ;;  %6794 = vmatprep.mubr.msk.f32.mxu0 %vm7302_vm1, %v7301_v2  ;;  %v6654_v27 = vpop.f32.mrf.mxu0 }
 0x1d2   : > { %v8362_v6 = vld [vmem:[#allocation2 + $0xa8] sm:$0xff]  ;;  %v8364_v34 = vpop.f32.mrf.mxu0 }
 0x1d3   : > { %6642 = vmatmul.mubr.msk.f32.gmra.mxu1 %vm1714_vm3, %v8362_v6  ;;  %6795 = vmatmul.mubr.msk.f32.vlgmr.msra.gmra.mxu0 %vm1714_vm3, %v8128_v48 }
 0x1d4   : > { %6723 = vmatprep.mubr.msk.f32.mxu1 %vm7302_vm1, %v7301_v2  ;;  %6797 = vmatprep.mubr.msk.f32.mxu0 %vm7302_vm1, %v7301_v2  ;;  %v6657_v41 = vpop.f32.mrf.mxu0 }
 0x1d5   : > { %6929 = vmatpush3.msra.mxu0 %v5788_v42  ;;  %v3095_v41 = vld [vmem:[%s9458_s6 + $0x28] sm:$0xff] }
 0x1d6   : > { %v8534_v38 = vld [vmem:[#allocation2 + $0xb0] sm:$0xff]  ;;  %6930 = vmatprep.subr.mxu0 %v7301_v2 }
 0x1d7   : > { %6724 = vmatmul.mubr.msk.f32.vlgmr.msra.gmra.mxu1 %vm1714_vm3, %v8115_v46  ;;  %6798 = vmatmul.mubr.msk.f32.gmra.mxu0 %vm1714_vm3, %v8141_v54  ;;  %v5756_v46 = vld [vmem:[%s9456_s4 + $0x88] sm:$0xff] }
 0x1d8   : > { %6858 = vmatpush3.msra.mxu1 %v5758_v29  ;;  %6726 = vmatprep.mubr.msk.f32.mxu1 %vm7302_vm1, %v7301_v2 }
 0x1d9   : > { %6800 = vmatprep.mubr.msk.f32.mxu0 %vm7302_vm1, %v7301_v2  ;;  %6859 = vmatprep.subr.mxu1 %v7301_v2 }
 0x1da   : > { %6860 = vmatpush3.msra.mxu1 %v5757_v14  ;;  %6931 = vmatpush3.msra.mxu0 %v5787_v25  ;;  %v3093_v25 = vld [vmem:[%s9458_s6 + $0x18] sm:$0xff] }
 0x1db   : > { %6727 = vmatmul.mubr.msk.f32.gmra.mxu1 %vm1714_vm3, %v8128_v48  ;;  %6801 = vmatmul.mubr.msk.f32.gmra.mxu0 %vm1714_vm3, %v8154_v61  ;;  %v5755_v48 = vld [vmem:[%s9456_s4 + $0x80] sm:$0xff] }
 0x1dc   : > { %6729 = vmatprep.mubr.msk.f32.mxu1 %vm7302_vm1, %v7301_v2  ;;  %6803 = vmatprep.mubr.msk.f32.mxu0 %vm7302_vm1, %v7301_v2 }
 0x1dd   : > { %6861 = vmatprep.subr.mxu1 %v7301_v2  ;;  %6932 = vmatprep.subr.mxu0 %v7301_v2 }
 0x1de   : > { %6862 = vmatpush3.msra.mxu1 %v5756_v46  ;;  %v3094_v46 = vld [vmem:[%s9458_s6 + $0x20] sm:$0xff] }
 0x1df   : > { %6730 = vmatmul.mubr.msk.f32.gmra.mxu1 %vm1714_vm3, %v8141_v54  ;;  %6804 = vmatmul.mubr.msk.f32.gmra.mxu0 %vm1714_vm3, %v8167_v63 }
 0x1e0   : > { %6732 = vmatprep.mubr.msk.f32.mxu1 %vm7302_vm1, %v7301_v2  ;;  %6806 = vmatprep.mubr.msk.f32.mxu0 %vm7302_vm1, %v7301_v2 }
 0x1e1   : > { %6863 = vmatprep.subr.mxu1 %v7301_v2 }
 0x1e2   : > { %6864 = vmatpush3.msra.mxu1 %v5755_v48 }
 0x1e3   : > { %6733 = vmatmul.mubr.msk.f32.gmra.mxu1 %vm1714_vm3, %v8154_v61  ;;  %6807 = vmatmul.mubr.msk.f32.gmra.mxu0 %vm1714_vm3, %v8180_v10 }
 0x1e4   : > { %6735 = vmatprep.mubr.msk.f32.mxu1 %vm7302_vm1, %v7301_v2  ;;  %6809 = vmatprep.mubr.msk.f32.mxu0 %vm7302_vm1, %v7301_v2 }
 0x1e5   : > { %7007 = vmatprep.subr.mxu1 %v7301_v2 }
 0x1e7   : > { %6736 = vmatmul.mubr.msk.f32.gmra.mxu1 %vm1714_vm3, %v8167_v63  ;;  %6810 = vmatmul.mubr.msk.f32.gmra.mxu0 %vm1714_vm3, %v8193_v13 }
 0x1e8   : > { %6738 = vmatprep.mubr.msk.f32.mxu1 %vm7302_vm1, %v7301_v2  ;;  %6812 = vmatprep.mubr.msk.f32.mxu0 %vm7302_vm1, %v7301_v2 }
 0x1eb   : > { %6739 = vmatmul.mubr.msk.f32.gmra.mxu1 %vm1714_vm3, %v8180_v10  ;;  %6813 = vmatmul.mubr.msk.f32.gmra.mxu0 %vm1714_vm3, %v8206_v21 }
 0x1ec   : > { %6741 = vmatprep.mubr.msk.f32.mxu1 %vm7302_vm1, %v7301_v2  ;;  %6815 = vmatprep.mubr.msk.f32.mxu0 %vm7302_vm1, %v7301_v2 }
 0x1ef   : > { %6742 = vmatmul.mubr.msk.f32.gmra.mxu1 %vm1714_vm3, %v8193_v13  ;;  %6816 = vmatmul.mubr.msk.f32.gmra.mxu0 %vm1714_vm3, %v8219_v28 }
 0x1f0   : > { %6744 = vmatprep.mubr.msk.f32.mxu1 %vm7302_vm1, %v7301_v2  ;;  %6818 = vmatprep.mubr.msk.f32.mxu0 %vm7302_vm1, %v7301_v2 }
 0x1f3   : > { %6745 = vmatmul.mubr.msk.f32.gmra.mxu1 %vm1714_vm3, %v8206_v21  ;;  %6819 = vmatmul.mubr.msk.f32.gmra.mxu0 %vm1714_vm3, %v8232_v60 }
 0x1f4   : > { %6747 = vmatprep.mubr.msk.f32.mxu1 %vm7302_vm1, %v7301_v2  ;;  %6821 = vmatprep.mubr.msk.f32.mxu0 %vm7302_vm1, %v7301_v2 }
 0x1f7   : > { %6748 = vmatmul.mubr.msk.f32.gmra.mxu1 %vm1714_vm3, %v8219_v28  ;;  %6822 = vmatmul.mubr.msk.f32.gmra.mxu0 %vm1714_vm3, %v8245_v43 }
 0x1f8   : > { %6750 = vmatprep.mubr.msk.f32.mxu1 %vm7302_vm1, %v7301_v2  ;;  %6824 = vmatprep.mubr.msk.f32.mxu0 %vm7302_vm1, %v7301_v2 }
 0x1fb   : > { %6751 = vmatmul.mubr.msk.f32.gmra.mxu1 %vm1714_vm3, %v8232_v60  ;;  %6825 = vmatmul.mubr.msk.f32.gmra.mxu0 %vm1714_vm3, %v8258_v57 }
 0x1fc   : > { %6753 = vmatprep.mubr.msk.f32.mxu1 %vm7302_vm1, %v7301_v2  ;;  %6827 = vmatprep.mubr.msk.f32.mxu0 %vm7302_vm1, %v7301_v2 }
 0x1ff   : > { %6754 = vmatmul.mubr.msk.f32.gmra.mxu1 %vm1714_vm3, %v8245_v43  ;;  %6828 = vmatmul.mubr.msk.f32.gmra.mxu0 %vm1714_vm3, %v8271_v53 }
 0x200   : > { %6756 = vmatprep.mubr.msk.f32.mxu1 %vm7302_vm1, %v7301_v2  ;;  %6830 = vmatprep.mubr.msk.f32.mxu0 %vm7302_vm1, %v7301_v2 }
 0x203   : > { %6757 = vmatmul.mubr.msk.f32.gmra.mxu1 %vm1714_vm3, %v8258_v57  ;;  %6831 = vmatmul.mubr.msk.f32.gmra.mxu0 %vm1714_vm3, %v8284_v56 }
 0x204   : > { %6759 = vmatprep.mubr.msk.f32.mxu1 %vm7302_vm1, %v7301_v2  ;;  %6833 = vmatprep.mubr.msk.f32.mxu0 %vm7302_vm1, %v7301_v2 }
 0x207   : > { %6760 = vmatmul.mubr.msk.f32.gmra.mxu1 %vm1714_vm3, %v8271_v53  ;;  %6834 = vmatmul.mubr.msk.f32.gmra.mxu0 %vm1714_vm3, %v8297_v39 }
 0x208   : > { %6762 = vmatprep.mubr.msk.f32.mxu1 %vm7302_vm1, %v7301_v2  ;;  %6836 = vmatprep.mubr.msk.f32.mxu0 %vm7302_vm1, %v7301_v2 }
 0x20b   : > { %6763 = vmatmul.mubr.msk.f32.gmra.mxu1 %vm1714_vm3, %v8284_v56  ;;  %6837 = vmatmul.mubr.msk.f32.gmra.mxu0 %vm1714_vm3, %v8310_v3 }
 0x20c   : > { %6765 = vmatprep.mubr.msk.f32.mxu1 %vm7302_vm1, %v7301_v2  ;;  %6839 = vmatprep.mubr.msk.f32.mxu0 %vm7302_vm1, %v7301_v2 }
 0x20f   : > { %6766 = vmatmul.mubr.msk.f32.gmra.mxu1 %vm1714_vm3, %v8297_v39  ;;  %6840 = vmatmul.mubr.msk.f32.gmra.mxu0 %vm1714_vm3, %v8323_v11 }
 0x210   : > { %6768 = vmatprep.mubr.msk.f32.mxu1 %vm7302_vm1, %v7301_v2  ;;  %6842 = vmatprep.mubr.msk.f32.mxu0 %vm7302_vm1, %v7301_v2 }
 0x213   : > { %6769 = vmatmul.mubr.msk.f32.gmra.mxu1 %vm1714_vm3, %v8310_v3  ;;  %6843 = vmatmul.mubr.msk.f32.gmra.mxu0 %vm1714_vm3, %v8336_v20 }
 0x214   : > { %6771 = vmatprep.mubr.msk.f32.mxu1 %vm7302_vm1, %v7301_v2  ;;  %6845 = vmatprep.mubr.msk.f32.mxu0 %vm7302_vm1, %v7301_v2 }
 0x217   : > { %6772 = vmatmul.mubr.msk.f32.gmra.mxu1 %vm1714_vm3, %v8323_v11  ;;  %6846 = vmatmul.mubr.msk.f32.gmra.mxu0 %vm1714_vm3, %v8349_v22 }
 0x218   : > { %6774 = vmatprep.mubr.msk.f32.mxu1 %vm7302_vm1, %v7301_v2  ;;  %6848 = vmatprep.mubr.msk.f32.mxu0 %vm7302_vm1, %v7301_v2 }
 0x21b   : > { %6775 = vmatmul.mubr.msk.f32.gmra.mxu1 %vm1714_vm3, %v8336_v20  ;;  %6849 = vmatmul.mubr.msk.f32.gmra.mxu0 %vm1714_vm3, %v8362_v6 }
 0x21c   : > { %6777 = vmatprep.mubr.msk.f32.mxu1 %vm7302_vm1, %v7301_v2  ;;  %6851 = vmatprep.mubr.msk.f32.mxu0 %vm7302_vm1, %v7301_v2 }
 0x21f   : > { %6778 = vmatmul.mubr.msk.f32.gmra.mxu1 %vm1714_vm3, %v8349_v22  ;;  %6852 = vmatmul.mubr.msk.f32.gmra.mxu0 %vm1714_vm3, %v8534_v38 }
 0x220   : > { %6780 = vmatprep.mubr.msk.f32.mxu1 %vm7302_vm1, %v7301_v2  ;;  %6854 = vmatprep.mubr.msk.f32.mxu0 %vm7302_vm1, %v7301_v2 }
 0x223   : > { %6781 = vmatmul.mubr.msk.f32.gmra.mxu1 %vm1714_vm3, %v8362_v6  ;;  %6855 = vmatmul.mubr.msk.f32.gmra.mxu0 %vm1714_vm3, %v8544_v40 }
 0x224   : > { %6783 = vmatprep.mubr.msk.f32.mxu1 %vm7302_vm1, %v7301_v2  ;;  %6944 = vmatprep.mubr.msk.f32.mxu0 %vm7302_vm1, %v7301_v2 }
 0x227   : > { %6784 = vmatmul.mubr.msk.f32.gmra.mxu1 %vm1714_vm3, %v8534_v38 }
 0x228   : > { %6865 = vmatprep.mubr.msk.f32.mxu1 %vm7302_vm1, %v7301_v2 }
 0x22b   : > { %6866 = vmatmul.mubr.msk.f32.vlgmr.msra.gmra.mxu1 %vm1714_vm3, %v8141_v54  ;;  %v5786_v54 = vld [vmem:[%s9458_s6 + $0x68] sm:$0xff] }
 0x22c   : > { %6868 = vmatprep.mubr.msk.f32.mxu1 %vm7302_vm1, %v7301_v2  ;;  %6933 = vmatpush3.msra.mxu0 %v5786_v54 }
 0x22d   : > { %6934 = vmatprep.subr.mxu0 %v7301_v2  ;;  %7008 = vmatpush3.msra.mxu1 %v3097_v19 }
 0x22e   : > { %7009 = vmatprep.subr.mxu1 %v7301_v2 }
 0x22f   : > { %6869 = vmatmul.mubr.msk.f32.gmra.mxu1 %vm1714_vm3, %v8154_v61  ;;  %v5785_v61 = vld [vmem:[%s9458_s6 + $0x60] sm:$0xff] }
 0x230   : > { %6871 = vmatprep.mubr.msk.f32.mxu1 %vm7302_vm1, %v7301_v2  ;;  %6935 = vmatpush3.msra.mxu0 %v5785_v61  ;;  %v3092_v61 = vld [vmem:[%s9458_s6 + $0x10] sm:$0xff] }
 0x231   : > { %6936 = vmatprep.subr.mxu0 %v7301_v2 }
 0x233   : > { %6872 = vmatmul.mubr.msk.f32.gmra.mxu1 %vm1714_vm3, %v8167_v63 }
 0x234   : > { %6874 = vmatprep.mubr.msk.f32.mxu1 %vm7302_vm1, %v7301_v2 }
 0x237   : > { %6875 = vmatmul.mubr.msk.f32.gmra.mxu1 %vm1714_vm3, %v8180_v10 }
 0x238   : > { %6877 = vmatprep.mubr.msk.f32.mxu1 %vm7302_vm1, %v7301_v2 }
 0x23b   : > { %6878 = vmatmul.mubr.msk.f32.gmra.mxu1 %vm1714_vm3, %v8193_v13 }
 0x23c   : > { %6880 = vmatprep.mubr.msk.f32.mxu1 %vm7302_vm1, %v7301_v2 }
 0x23f   : > { %6881 = vmatmul.mubr.msk.f32.gmra.mxu1 %vm1714_vm3, %v8206_v21 }
 0x240   : > { %6883 = vmatprep.mubr.msk.f32.mxu1 %vm7302_vm1, %v7301_v2 }
 0x243   : > { %6884 = vmatmul.mubr.msk.f32.gmra.mxu1 %vm1714_vm3, %v8219_v28 }
 0x244   : > { %6886 = vmatprep.mubr.msk.f32.mxu1 %vm7302_vm1, %v7301_v2 }
 0x247   : > { %v8602_v63 = vpop.f32.mrf.mxu1  ;;  %v2083_v10 = vpop.f32.mrf.mxu0  ;;  %6887 = vmatmul.mubr.msk.f32.gmra.mxu1 %vm1714_vm3, %v8232_v60  ;;  %v5784_v60 = vld [vmem:[%s9458_s6 + $0x58] sm:$0xff] }
 0x248   : > { %6889 = vmatprep.mubr.msk.f32.mxu1 %vm7302_vm1, %v7301_v2  ;;  %6937 = vmatpush3.msra.mxu0 %v5784_v60 }
 0x249   : > { %v6586_v13 = vpop.f32.mrf.mxu1  ;;  %v6660_v21 = vpop.f32.mrf.mxu0  ;;  %6938 = vmatprep.subr.mxu0 %v7301_v2 }
 0x24b   : > { %v1910_v28 = vpop.f32.mrf.mxu1  ;;  %v2088_v30 = vpop.f32.mrf.mxu0  ;;  %6890 = vmatmul.mubr.msk.f32.gmra.mxu1 %vm1714_vm3, %v8245_v43 }
 0x24c   : > { %v8610_v49 = vadd.f32 %v2083_v10, %v1910_v28  ;;  %6892 = vmatprep.mubr.msk.f32.mxu1 %vm7302_vm1, %v7301_v2  ;;  %v5781_v28 = vld [vmem:[%s9458_s6 + $0x40] sm:$0xff] }
 0x24d   : > { %v6589_v47 = vpop.f32.mrf.mxu1  ;;  %v6663_v36 = vpop.f32.mrf.mxu0 }
 0x24f   : > { %v1915_v0 = vpop.f32.mrf.mxu1  ;;  %v2093_v7 = vpop.f32.mrf.mxu0  ;;  %6893 = vmatmul.mubr.msk.f32.gmra.mxu1 %vm1714_vm3, %v8258_v57 }
 0x250   : > { %v8620_v43 = vadd.f32 %v2088_v30, %v1915_v0  ;;  %6895 = vmatprep.mubr.msk.f32.mxu1 %vm7302_vm1, %v7301_v2  ;;  %v3091_v30 = vld [vmem:[%s9458_s6 + $0x8] sm:$0xff] }
 0x251   : > { %v6592_v9 = vpop.f32.mrf.mxu1  ;;  %v6666_v1 = vpop.f32.mrf.mxu0 }
 0x253   : > { %v1920_v12 = vpop.f32.mrf.mxu1  ;;  %v2098_v33 = vpop.f32.mrf.mxu0  ;;  %6896 = vmatmul.mubr.msk.f32.gmra.mxu1 %vm1714_vm3, %v8271_v53  ;;  %v5783_v53 = vld [vmem:[%s9458_s6 + $0x50] sm:$0xff] }
 0x254   : > { %v8626_v17 = vadd.f32 %v2093_v7, %v1920_v12  ;;  %6898 = vmatprep.mubr.msk.f32.mxu1 %vm7302_vm1, %v7301_v2  ;;  %6939 = vmatpush3.msra.mxu0 %v5783_v53  ;;  %v3069_v53 = vld [vmem:[#allocation3] sm:$0xff] }
 0x255   : > { %v6595_v57 = vpop.f32.mrf.mxu1  ;;  %v6669_v51 = vpop.f32.mrf.mxu0  ;;  %6940 = vmatprep.subr.mxu0 %v7301_v2 }
 0x257   : > { %v1925_v35 = vpop.f32.mrf.mxu1  ;;  %v2103_v58 = vpop.f32.mrf.mxu0  ;;  %6899 = vmatmul.mubr.msk.f32.gmra.mxu1 %vm1714_vm3, %v8284_v56 }
 0x258   : > { %v8632_v26 = vadd.f32 %v2098_v33, %v1925_v35  ;;  %6901 = vmatprep.mubr.msk.f32.mxu1 %vm7302_vm1, %v7301_v2 }
 0x259   : > { %v6598_v18 = vpop.f32.mrf.mxu1  ;;  %v6672_v62 = vpop.f32.mrf.mxu0 }
 0x25b   : > { %v1930_v4 = vpop.f32.mrf.mxu1  ;;  %v2108_v37 = vpop.f32.mrf.mxu0  ;;  %6902 = vmatmul.mubr.msk.f32.gmra.mxu1 %vm1714_vm3, %v8297_v39 }
 0x25c   : > { %v8642_v56 = vadd.f32 %v2103_v58, %v1930_v4  ;;  %6904 = vmatprep.mubr.msk.f32.mxu1 %vm7302_vm1, %v7301_v2 }
 0x25d   : > { %v6601_v44 = vpop.f32.mrf.mxu1  ;;  %v6675_v23 = vpop.f32.mrf.mxu0 }
 0x25f   : > { %v1935_v5 = vpop.f32.mrf.mxu1  ;;  %v2113_v45 = vpop.f32.mrf.mxu0  ;;  %6905 = vmatmul.mubr.msk.f32.gmra.mxu1 %vm1714_vm3, %v8310_v3  ;;  %v5782_v3 = vld [vmem:[%s9458_s6 + $0x48] sm:$0xff] }
 0x260   : > { %v8648_v50 = vadd.f32 %v2108_v37, %v1935_v5  ;;  %6907 = vmatprep.mubr.msk.f32.mxu1 %vm7302_vm1, %v7301_v2  ;;  %6941 = vmatpush3.msra.mxu0 %v5782_v3 }
 0x261   : > { %v6604_v39 = vpop.f32.mrf.mxu1  ;;  %v6678_v32 = vpop.f32.mrf.mxu0  ;;  %6942 = vmatprep.subr.mxu0 %v7301_v2 }
 0x262   : > { %6943 = vmatpush3.msra.mxu0 %v5781_v28 }
 0x263   : > { %v1940_v8 = vpop.f32.mrf.mxu1  ;;  %v2118_v52 = vpop.f32.mrf.mxu0  ;;  %6908 = vmatmul.mubr.msk.f32.gmra.mxu1 %vm1714_vm3, %v8323_v11  ;;  %v3096_v11 = vld [vmem:[%s9458_s6 + $0x30] sm:$0xff]  ;;  %7086 = vmatprep.subr.mxu0 %v7301_v2 }
 0x264   : > { %v8654_v16 = vadd.f32 %v2113_v45, %v1940_v8  ;;  %6910 = vmatprep.mubr.msk.f32.mxu1 %vm7302_vm1, %v7301_v2  ;;  %7010 = vmatpush3.msra.mxu1 %v3096_v11 }
 0x265   : > { %v6607_v15 = vpop.f32.mrf.mxu1  ;;  %v6681_v59 = vpop.f32.mrf.mxu0  ;;  %7011 = vmatprep.subr.mxu1 %v7301_v2 }
 0x266   : > { %7012 = vmatpush3.msra.mxu1 %v3095_v41 }
 0x267   : > { %v1945_v24 = vpop.f32.mrf.mxu1  ;;  %v2123_v31 = vpop.f32.mrf.mxu0  ;;  %6911 = vmatmul.mubr.msk.f32.gmra.mxu1 %vm1714_vm3, %v8336_v20  ;;  %7013 = vmatprep.subr.mxu1 %v7301_v2 }
 0x268   : > { %v8671_v27 = vadd.f32 %v2118_v52, %v1945_v24  ;;  %6913 = vmatprep.mubr.msk.f32.mxu1 %vm7302_vm1, %v7301_v2  ;;  %7014 = vmatpush3.msra.mxu1 %v3094_v46 }
 0x269   : > { %v6610_v29 = vpop.f32.mrf.mxu1  ;;  %v6684_v14 = vpop.f32.mrf.mxu0  ;;  %7015 = vmatprep.subr.mxu1 %v7301_v2 }
 0x26a   : > { %7016 = vmatpush3.msra.mxu1 %v3093_v25 }
 0x26b   : > { %v1950_v20 = vpop.f32.mrf.mxu1  ;;  %v2128_v48 = vpop.f32.mrf.mxu0  ;;  %6914 = vmatmul.mubr.msk.f32.gmra.mxu1 %vm1714_vm3, %v8349_v22  ;;  %7017 = vmatprep.subr.mxu1 %v7301_v2 }
 0x26c   : > { %v8685_v42 = vadd.f32 %v2123_v31, %v1950_v20  ;;  %6916 = vmatprep.mubr.msk.f32.mxu1 %vm7302_vm1, %v7301_v2  ;;  %7018 = vmatpush3.msra.mxu1 %v3092_v61 }
 0x26d   : > { %v6613_v22 = vpop.f32.mrf.mxu1  ;;  %v6687_v54 = vpop.f32.mrf.mxu0  ;;  %7019 = vmatprep.subr.mxu1 %v7301_v2 }
 0x26e   : > { %7020 = vmatpush3.msra.mxu1 %v3091_v30 }
 0x26f   : > { %v1955_v10 = vpop.f32.mrf.mxu1  ;;  %v2133_v13 = vpop.f32.mrf.mxu0  ;;  %6917 = vmatmul.mubr.msk.f32.gmra.mxu1 %vm1714_vm3, %v8362_v6  ;;  %v3090_v6 = vld [vmem:[%s9458_s6] sm:$0xff]  ;;  %7021 = vmatprep.subr.mxu1 %v7301_v2 }
 0x270   : > { %v8703_v21 = vadd.f32 %v2128_v48, %v1955_v10  ;;  %6919 = vmatprep.mubr.msk.f32.mxu1 %vm7302_vm1, %v7301_v2  ;;  %7022 = vmatpush3.msra.mxu1 %v3090_v6 }
 0x271   : > { %v6616_v47 = vpop.f32.mrf.mxu1  ;;  %v6690_v36 = vpop.f32.mrf.mxu0  ;;  %7165 = vmatprep.subr.mxu1 %v7301_v2 }
 0x273   : > { %v1960_v60 = vpop.f32.mrf.mxu1  ;;  %v2138_v0 = vpop.f32.mrf.mxu0  ;;  %6920 = vmatmul.mubr.msk.f32.gmra.mxu1 %vm1714_vm3, %v8534_v38  ;;  %v2757_v38 = vld [vmem:[#allocation2 + $0xc0] sm:$0xff] }
 0x274   : > { %v8721_v7 = vadd.f32 %v2133_v13, %v1960_v60  ;;  %6922 = vmatprep.mubr.msk.f32.mxu1 %vm7302_vm1, %v7301_v2 }
 0x275   : > { %v6619_v9 = vpop.f32.mrf.mxu1  ;;  %v6693_v1 = vpop.f32.mrf.mxu0 }
 0x276   : > { %v2079_v9 = vadd.f32 %v8364_v34, %v8602_v63 }
 0x277   : > { %v1965_v12 = vpop.f32.mrf.mxu1  ;;  %v2143_v33 = vpop.f32.mrf.mxu0  ;;  %6923 = vmatmul.mubr.msk.f32.gmra.mxu1 %vm1714_vm3, %v8544_v40 }
 0x278   : > { %v8728_v57 = vadd.f32 %v2138_v0, %v1965_v12  ;;  %6925 = vmatprep.mubr.msk.f32.mxu1 %vm7302_vm1, %v7301_v2 }
 0x279   : > { %v6622_v51 = vpop.f32.mrf.mxu1  ;;  %v6696_v35 = vpop.f32.mrf.mxu0 }
 0x27b   : > { %v1970_v58 = vpop.f32.mrf.mxu1  ;;  %v2148_v18 = vpop.f32.mrf.mxu0  ;;  %6926 = vmatmul.mubr.msk.f32.gmra.mxu1 %vm1714_vm3, %v2757_v38 }
 0x27c   : > { %v8733_v62 = vadd.f32 %v2143_v33, %v1970_v58  ;;  %7023 = vmatprep.mubr.msk.f32.mxu1 %vm7302_vm1, %v7301_v2 }
 0x27d   : > { %v6625_v4 = vpop.f32.mrf.mxu1  ;;  %v6699_v40 = vpop.f32.mrf.mxu0 }
 0x27f   : > { %v1975_v37 = vpop.f32.mrf.mxu1  ;;  %v2153_v44 = vpop.f32.mrf.mxu0  ;;  %7024 = vmatmul.mubr.msk.f32.vlgmr.msra.gmra.mxu1 %vm3045_vm4, %v3069_v53 }
 0x280   : > { %v8738_v23 = vadd.f32 %v2148_v18, %v1975_v37  ;;  %7026 = vmatprep.mubr.msk.f32.mxu1 %vm7302_vm1, %v7301_v2 }
 0x281   : > { %v6628_v5 = vpop.f32.mrf.mxu1  ;;  %v6702_v45 = vpop.f32.mrf.mxu0 }
 0x283   : > { %v1980_v39 = vpop.f32.mrf.mxu1  ;;  %v2158_v32 = vpop.f32.mrf.mxu0 }
 0x284   : > { %v8742_v8 = vadd.f32 %v2153_v44, %v1980_v39 }
 0x285   : > { %v6631_v52 = vpop.f32.mrf.mxu1  ;;  %v6705_v3 = vpop.f32.mrf.mxu0 }
 0x287   : > { %v1985_v19 = vpop.f32.mrf.mxu1  ;;  %v2163_v15 = vpop.f32.mrf.mxu0 }
 0x288   : > { %v8744_v59 = vadd.f32 %v2158_v32, %v1985_v19 }
 0x289   : > { %v6634_v11 = vpop.f32.mrf.mxu1  ;;  %v6708_v24 = vpop.f32.mrf.mxu0 }
 0x28b   : > { %v1990_v31 = vpop.f32.mrf.mxu1  ;;  %v2168_v41 = vpop.f32.mrf.mxu0 }
 0x28c   : > { %v8746_v29 = vadd.f32 %v2163_v15, %v1990_v31 }
 0x28d   : > { %v6637_v14 = vpop.f32.mrf.mxu1  ;;  %v6711_v46 = vpop.f32.mrf.mxu0 }
 0x28f   : > { %v1995_v20 = vpop.f32.mrf.mxu1  ;;  %v2173_v48 = vpop.f32.mrf.mxu0 }
 0x290   : > { %v8748_v25 = vadd.f32 %v2168_v41, %v1995_v20 }
 0x291   : > { %v6640_v22 = vpop.f32.mrf.mxu1  ;;  %v6714_v54 = vpop.f32.mrf.mxu0 }
 0x293   : > { %v2000_v61 = vpop.f32.mrf.mxu1  ;;  %v2612_v10 = vpop.f32.mrf.mxu0 }
 0x294   : > { %v8750_v13 = vadd.f32 %v2173_v48, %v2000_v61 }
 0x295   : > { %v6643_v28 = vpop.f32.mrf.mxu1  ;;  %v6796_v30 = vpop.f32.mrf.mxu0 }
 0x297   : > { %v2332_v47 = vpop.f32.mrf.mxu1  ;;  %v2617_v36 = vpop.f32.mrf.mxu0 }
 0x298   : > { %v2436_v6 = vadd.f32 %v2332_v47, %v8356_v55 }
 0x299   : > { %v6725_v60 = vpop.f32.mrf.mxu1  ;;  %v6799_v0 = vpop.f32.mrf.mxu0 }
 0x29a   : > { %v8755_v1 = vadd.f32 %v2612_v10, %v2436_v6 }
 0x29b   : > { %v2337_v12 = vpop.f32.mrf.mxu1  ;;  %v2622_v33 = vpop.f32.mrf.mxu0 }
 0x29c   : > { %v2437_v38 = vadd.f32 %v2337_v12, %v2079_v9 }
 0x29d   : > { %v6728_v51 = vpop.f32.mrf.mxu1  ;;  %v6802_v35 = vpop.f32.mrf.mxu0 }
 0x29e   : > { %v8757_v58 = vadd.f32 %v2617_v36, %v2437_v38 }
 0x29f   : > { %v2342_v18 = vpop.f32.mrf.mxu1  ;;  %v2627_v53 = vpop.f32.mrf.mxu0 }
 0x2a0   : > { %v2438_v4 = vadd.f32 %v2342_v18, %v8610_v49 }
 0x2a1   : > { %v6731_v40 = vpop.f32.mrf.mxu1  ;;  %v6805_v55 = vpop.f32.mrf.mxu0 }
 0x2a2   : > { %v8760_v37 = vadd.f32 %v2622_v33, %v2438_v4 }
 0x2a3   : > { %v2347_v44 = vpop.f32.mrf.mxu1  ;;  %v2632_v5 = vpop.f32.mrf.mxu0 }
 0x2a4   : > { %v2439_v34 = vadd.f32 %v2347_v44, %v8620_v43 }
 0x2a5   : > { %v6734_v63 = vpop.f32.mrf.mxu1  ;;  %v6808_v45 = vpop.f32.mrf.mxu0 }
 0x2a6   : > { %v8763_v39 = vadd.f32 %v2627_v53, %v2439_v34 }
 0x2a7   : > { %v2352_v32 = vpop.f32.mrf.mxu1  ;;  %v2637_v52 = vpop.f32.mrf.mxu0 }
 0x2a8   : > { %v2440_v3 = vadd.f32 %v2352_v32, %v8626_v17 }
 0x2a9   : > { %v6737_v19 = vpop.f32.mrf.mxu1  ;;  %v6811_v15 = vpop.f32.mrf.mxu0 }
 0x2aa   : > { %v8766_v11 = vadd.f32 %v2632_v5, %v2440_v3 }
 0x2ab   : > { %v2357_v49 = vpop.f32.mrf.mxu1  ;;  %v2642_v24 = vpop.f32.mrf.mxu0 }
 0x2ac   : > { %v2441_v31 = vadd.f32 %v2357_v49, %v8632_v26 }
 0x2ad   : > { %v6740_v41 = vpop.f32.mrf.mxu1  ;;  %v6814_v14 = vpop.f32.mrf.mxu0 }
 0x2ae   : > { %v8769_v46 = vadd.f32 %v2637_v52, %v2441_v31 }
 0x2af   : > { %v2362_v43 = vpop.f32.mrf.mxu1  ;;  %v2647_v20 = vpop.f32.mrf.mxu0 }
 0x2b0   : > { %v2442_v48 = vadd.f32 %v2362_v43, %v8642_v56 }
 0x2b1   : > { %v6743_v22 = vpop.f32.mrf.mxu1  ;;  %v6817_v54 = vpop.f32.mrf.mxu0 }
 0x2b2   : > { %v8772_v61 = vadd.f32 %v2642_v24, %v2442_v48 }
 0x2b3   : > { %v2367_v17 = vpop.f32.mrf.mxu1  ;;  %v2652_v10 = vpop.f32.mrf.mxu0 }
 0x2b4   : > { %v2443_v28 = vadd.f32 %v2367_v17, %v8648_v50 }
 0x2b5   : > { %v6746_v30 = vpop.f32.mrf.mxu1  ;;  %v6820_v47 = vpop.f32.mrf.mxu0 }
 0x2b6   : > { %v8775_v36 = vadd.f32 %v2647_v20, %v2443_v28 }
 0x2b7   : > { %v2372_v26 = vpop.f32.mrf.mxu1  ;;  %v2657_v6 = vpop.f32.mrf.mxu0 }
 0x2b8   : > { %v2444_v60 = vadd.f32 %v2372_v26, %v8654_v16 }
 0x2b9   : > { %v6749_v0 = vpop.f32.mrf.mxu1  ;;  %v6823_v9 = vpop.f32.mrf.mxu0 }
 0x2ba   : > { %v8778_v12 = vadd.f32 %v2652_v10, %v2444_v60 }
 0x2bb   : > { %v2377_v56 = vpop.f32.mrf.mxu1  ;;  %v2662_v33 = vpop.f32.mrf.mxu0 }
 0x2bc   : > { %v2445_v38 = vadd.f32 %v2377_v56, %v8671_v27 }
 0x2bd   : > { %v6752_v51 = vpop.f32.mrf.mxu1  ;;  %v6826_v35 = vpop.f32.mrf.mxu0 }
 0x2be   : > { %v8781_v18 = vadd.f32 %v2657_v6, %v2445_v38 }
 0x2bf   : > { %v2382_v50 = vpop.f32.mrf.mxu1  ;;  %v2667_v53 = vpop.f32.mrf.mxu0 }
 0x2c0   : > { %v2446_v4 = vadd.f32 %v2382_v50, %v8685_v42 }
 0x2c1   : > { %v6755_v40 = vpop.f32.mrf.mxu1  ;;  %v6829_v55 = vpop.f32.mrf.mxu0 }
 0x2c2   : > { %v8784_v44 = vadd.f32 %v2662_v33, %v2446_v4 }
 0x2c3   : > { %v2387_v16 = vpop.f32.mrf.mxu1  ;;  %v2672_v5 = vpop.f32.mrf.mxu0 }
 0x2c4   : > { %v2447_v34 = vadd.f32 %v2387_v16, %v8703_v21 }
 0x2c5   : > { %v6758_v63 = vpop.f32.mrf.mxu1  ;;  %v6832_v45 = vpop.f32.mrf.mxu0 }
 0x2c6   : > { %v8787_v32 = vadd.f32 %v2667_v53, %v2447_v34 }
 0x2c7   : > { %v2392_v27 = vpop.f32.mrf.mxu1  ;;  %v2677_v52 = vpop.f32.mrf.mxu0 }
 0x2c8   : > { %v2448_v3 = vadd.f32 %v2392_v27, %v8721_v7 }
 0x2c9   : > { %v6761_v19 = vpop.f32.mrf.mxu1  ;;  %v6835_v15 = vpop.f32.mrf.mxu0 }
 0x2ca   : > { %v8790_v49 = vadd.f32 %v2672_v5, %v2448_v3 }
 0x2cb   : > { %v2397_v42 = vpop.f32.mrf.mxu1  ;;  %v2682_v24 = vpop.f32.mrf.mxu0 }
 0x2cc   : > { %v2449_v31 = vadd.f32 %v2397_v42, %v8728_v57 }
 0x2cd   : > { %v6764_v41 = vpop.f32.mrf.mxu1  ;;  %v6838_v14 = vpop.f32.mrf.mxu0 }
 0x2ce   : > { %v8793_v43 = vadd.f32 %v2677_v52, %v2449_v31 }
 0x2cf   : > { %v2402_v21 = vpop.f32.mrf.mxu1  ;;  %v2687_v20 = vpop.f32.mrf.mxu0 }
 0x2d0   : > { %v2450_v48 = vadd.f32 %v2402_v21, %v8733_v62 }
 0x2d1   : > { %v6767_v22 = vpop.f32.mrf.mxu1  ;;  %v6841_v54 = vpop.f32.mrf.mxu0 }
 0x2d2   : > { %v8796_v17 = vadd.f32 %v2682_v24, %v2450_v48 }
 0x2d3   : > { %v2407_v7 = vpop.f32.mrf.mxu1  ;;  %v2692_v10 = vpop.f32.mrf.mxu0 }
 0x2d4   : > { %v2451_v28 = vadd.f32 %v2407_v7, %v8738_v23 }
 0x2d5   : > { %v6770_v30 = vpop.f32.mrf.mxu1  ;;  %v6844_v47 = vpop.f32.mrf.mxu0 }
 0x2d6   : > { %v8799_v26 = vadd.f32 %v2687_v20, %v2451_v28 }
 0x2d7   : > { %v2412_v57 = vpop.f32.mrf.mxu1  ;;  %v2697_v6 = vpop.f32.mrf.mxu0 }
 0x2d8   : > { %v2452_v60 = vadd.f32 %v2412_v57, %v8742_v8  ;;  %v5836_v57 = vld [vmem:[%s9458_s6 + $0xa8] sm:$0xff] }
 0x2d9   : > { %v6773_v0 = vpop.f32.mrf.mxu1  ;;  %v6847_v9 = vpop.f32.mrf.mxu0 }
 0x2da   : > { %v8802_v56 = vadd.f32 %v2692_v10, %v2452_v60 }
 0x2db   : > { %v2417_v62 = vpop.f32.mrf.mxu1  ;;  %v2702_v33 = vpop.f32.mrf.mxu0 }
 0x2dc   : > { %v2453_v38 = vadd.f32 %v2417_v62, %v8744_v59  ;;  %v5835_v62 = vld [vmem:[%s9458_s6 + $0xa0] sm:$0xff] }
 0x2dd   : > { %v6776_v51 = vpop.f32.mrf.mxu1  ;;  %v6850_v35 = vpop.f32.mrf.mxu0 }
 0x2de   : > { %v8805_v50 = vadd.f32 %v2697_v6, %v2453_v38 }
 0x2df   : > { %v2422_v23 = vpop.f32.mrf.mxu1  ;;  %v2707_v53 = vpop.f32.mrf.mxu0 }
 0x2e0   : > { %v2454_v4 = vadd.f32 %v2422_v23, %v8746_v29  ;;  %v8819_v29 = vld [vmem:[%s9457_s5] ss:$0 sm:$0xff]  ;;  %v5834_v23 = vld [vmem:[%s9458_s6 + $0x98] sm:$0xff] }
 0x2e1   : > { %v6779_v40 = vpop.f32.mrf.mxu1  ;;  %v6853_v55 = vpop.f32.mrf.mxu0 }
 0x2e2   : > { %v8808_v16 = vadd.f32 %v2702_v33, %v2454_v4 }
 0x2e3   : > { %v2427_v8 = vpop.f32.mrf.mxu1  ;;  %v2712_v5 = vpop.f32.mrf.mxu0 }
 0x2e4   : > { %v2455_v34 = vadd.f32 %v2427_v8, %v8748_v25  ;;  %v5833_v8 = vld [vmem:[%s9458_s6 + $0x90] sm:$0xff] }
 0x2e5   : > { %v6782_v63 = vpop.f32.mrf.mxu1  ;;  %v6856_v45 = vpop.f32.mrf.mxu0 }
 0x2e6   : > { %v8811_v27 = vadd.f32 %v2707_v53, %v2455_v34 }
 0x2e7   : > { %v2432_v59 = vpop.f32.mrf.mxu1 }
 0x2e8   : > { %v2456_v52 = vadd.f32 %v2432_v59, %v8750_v13  ;;  %v5832_v59 = vld [vmem:[%s9458_s6 + $0x88] sm:$0xff] }
 0x2e9   : > { %v6785_v3 = vpop.f32.mrf.mxu1 }
 0x2ea   : > { %v8814_v19 = vadd.f32 %v2712_v5, %v2456_v52 }
 0x2eb   : > { %v2892_v15 = vpop.f32.mrf.mxu1 }
 0x2ec   : > { %v2996_v42 = vadd.f32 %v2892_v15, %v8755_v1  ;;  %v5838_v1 = vld [vmem:[%s9458_s6 + $0xb8] sm:$0xff] }
 0x2ed   : > { %v6867_v24 = vpop.f32.mrf.mxu1 }
 0x2ee   : > { %v3024_v25 = vadd.f32 %v8819_v29, %v2996_v42  ;;  %v5831_v24 = vld [vmem:[%s9458_s6 + $0x80] sm:$0xff] }
 0x2ef   : > { %v2897_v31 = vpop.f32.mrf.mxu1 }
 0x2f0   : > { %3048 = vst.msk [vmem:[#allocation3 + $0x8] sm:$0xff] %vm3045_vm4, %v3024_v25  ;;  %v2997_v41 = vadd.f32 %v2897_v31, %v8757_v58 }
 0x2f1   : > { %v6870_v13 = vpop.f32.mrf.mxu1 }
 0x2f2   : > { %v3025_v14 = vadd.f32 %v8819_v29, %v2997_v41 }
 0x2f3   : > { %v2902_v21 = vpop.f32.mrf.mxu1 }
 0x2f4   : > { %3049 = vst.msk [vmem:[#allocation3 + $0x10] sm:$0xff] %vm3045_vm4, %v3025_v14  ;;  %v2998_v20 = vadd.f32 %v2902_v21, %v8760_v37  ;;  %v5837_v37 = vld [vmem:[%s9458_s6 + $0xb0] sm:$0xff] }
 0x2f5   : > { %v6873_v48 = vpop.f32.mrf.mxu1 }
 0x2f6   : > { %v3026_v22 = vadd.f32 %v8819_v29, %v2998_v20 }
 0x2f7   : > { %v2907_v54 = vpop.f32.mrf.mxu1  ;;  %v3070_v7 = vld [vmem:[#allocation3 + $0x8] sm:$0xff] }
 0x2f8   : > { %3050 = vst.msk [vmem:[#allocation3 + $0x18] sm:$0xff] %vm3045_vm4, %v3026_v22  ;;  %v2999_v58 = vadd.f32 %v2907_v54, %v8763_v39  ;;  %6945 = vmatmul.mubr.msk.f32.vlgmr.msra.gmra.mxu0 %vm3045_vm4, %v3070_v7  ;;  %7027 = vmatmul.mubr.msk.f32.gmra.mxu1 %vm3045_vm4, %v3070_v7 }
 0x2f9   : > { %7087 = vmatpush3.msra.mxu0 %v5838_v1  ;;  %v6876_v10 = vpop.f32.mrf.mxu1  ;;  %6947 = vmatprep.mubr.msk.f32.mxu0 %vm7302_vm1, %v7301_v2 }
 0x2fa   : > { %v3027_v28 = vadd.f32 %v8819_v29, %v2999_v58  ;;  %7029 = vmatprep.mubr.msk.f32.mxu1 %vm7302_vm1, %v7301_v2  ;;  %7088 = vmatprep.subr.mxu0 %v7301_v2 }
 0x2fb   : > { %v2912_v39 = vpop.f32.mrf.mxu1  ;;  %v8845_v30 = vld [vmem:[#allocation3 + $0x10] sm:$0xff]  ;;  %7089 = vmatpush3.msra.mxu0 %v5837_v37 }
 0x2fc   : > { %3051 = vst.msk [vmem:[#allocation3 + $0x20] sm:$0xff] %vm3045_vm4, %v3027_v28  ;;  %v3000_v47 = vadd.f32 %v2912_v39, %v8766_v11  ;;  %6948 = vmatmul.mubr.msk.f32.gmra.mxu0 %vm3045_vm4, %v8845_v30  ;;  %7030 = vmatmul.mubr.msk.f32.gmra.mxu1 %vm3045_vm4, %v8845_v30 }
 0x2fd   : > { %v6879_v6 = vpop.f32.mrf.mxu1  ;;  %6950 = vmatprep.mubr.msk.f32.mxu0 %vm7302_vm1, %v7301_v2  ;;  %7032 = vmatprep.mubr.msk.f32.mxu1 %vm7302_vm1, %v7301_v2 }
 0x2fe   : > { %v3028_v60 = vadd.f32 %v8819_v29, %v3000_v47  ;;  %7090 = vmatprep.subr.mxu0 %v7301_v2 }
 0x2ff   : > { %v2917_v11 = vpop.f32.mrf.mxu1  ;;  %v8862_v0 = vld [vmem:[#allocation3 + $0x18] sm:$0xff]  ;;  %7091 = vmatpush3.msra.mxu0 %v5836_v57 }
 0x300   : > { %3052 = vst.msk [vmem:[#allocation3 + $0x28] sm:$0xff] %vm3045_vm4, %v3028_v60  ;;  %v3001_v9 = vadd.f32 %v2917_v11, %v8769_v46  ;;  %6951 = vmatmul.mubr.msk.f32.gmra.mxu0 %vm3045_vm4, %v8862_v0  ;;  %7033 = vmatmul.mubr.msk.f32.gmra.mxu1 %vm3045_vm4, %v8862_v0 }
 0x301   : > { %v6882_v33 = vpop.f32.mrf.mxu1  ;;  %6953 = vmatprep.mubr.msk.f32.mxu0 %vm7302_vm1, %v7301_v2  ;;  %7035 = vmatprep.mubr.msk.f32.mxu1 %vm7302_vm1, %v7301_v2 }
 0x302   : > { %v3029_v38 = vadd.f32 %v8819_v29, %v3001_v9  ;;  %7092 = vmatprep.subr.mxu0 %v7301_v2 }
 0x303   : > { %v2922_v46 = vpop.f32.mrf.mxu1  ;;  %v8879_v51 = vld [vmem:[#allocation3 + $0x20] sm:$0xff]  ;;  %7093 = vmatpush3.msra.mxu0 %v5835_v62 }
 0x304   : > { %3053 = vst.msk [vmem:[#allocation3 + $0x30] sm:$0xff] %vm3045_vm4, %v3029_v38  ;;  %v3002_v35 = vadd.f32 %v2922_v46, %v8772_v61  ;;  %6954 = vmatmul.mubr.msk.f32.gmra.mxu0 %vm3045_vm4, %v8879_v51  ;;  %7036 = vmatmul.mubr.msk.f32.gmra.mxu1 %vm3045_vm4, %v8879_v51 }
 0x305   : > { %v6885_v53 = vpop.f32.mrf.mxu1  ;;  %6956 = vmatprep.mubr.msk.f32.mxu0 %vm7302_vm1, %v7301_v2  ;;  %7038 = vmatprep.mubr.msk.f32.mxu1 %vm7302_vm1, %v7301_v2 }
 0x306   : > { %v3030_v4 = vadd.f32 %v8819_v29, %v3002_v35  ;;  %7094 = vmatprep.subr.mxu0 %v7301_v2 }
 0x307   : > { %v2927_v61 = vpop.f32.mrf.mxu1  ;;  %v8896_v40 = vld [vmem:[#allocation3 + $0x28] sm:$0xff]  ;;  %7095 = vmatpush3.msra.mxu0 %v5834_v23 }
 0x308   : > { %3054 = vst.msk [vmem:[#allocation3 + $0x38] sm:$0xff] %vm3045_vm4, %v3030_v4  ;;  %v3003_v55 = vadd.f32 %v2927_v61, %v8775_v36  ;;  %6957 = vmatmul.mubr.msk.f32.gmra.mxu0 %vm3045_vm4, %v8896_v40  ;;  %7039 = vmatmul.mubr.msk.f32.gmra.mxu1 %vm3045_vm4, %v8896_v40 }
 0x309   : > { %v6888_v5 = vpop.f32.mrf.mxu1  ;;  %6959 = vmatprep.mubr.msk.f32.mxu0 %vm7302_vm1, %v7301_v2  ;;  %7041 = vmatprep.mubr.msk.f32.mxu1 %vm7302_vm1, %v7301_v2 }
 0x30a   : > { %v3031_v34 = vadd.f32 %v8819_v29, %v3003_v55  ;;  %7096 = vmatprep.subr.mxu0 %v7301_v2 }
 0x30b   : > { %v2932_v36 = vpop.f32.mrf.mxu1  ;;  %v8913_v63 = vld [vmem:[#allocation3 + $0x30] sm:$0xff]  ;;  %7097 = vmatpush3.msra.mxu0 %v5833_v8 }
 0x30c   : > { %3055 = vst.msk [vmem:[#allocation3 + $0x40] sm:$0xff] %vm3045_vm4, %v3031_v34  ;;  %v3004_v45 = vadd.f32 %v2932_v36, %v8778_v12  ;;  %6960 = vmatmul.mubr.msk.f32.gmra.mxu0 %vm3045_vm4, %v8913_v63  ;;  %7042 = vmatmul.mubr.msk.f32.gmra.mxu1 %vm3045_vm4, %v8913_v63 }
 0x30d   : > { %v6891_v52 = vpop.f32.mrf.mxu1  ;;  %6962 = vmatprep.mubr.msk.f32.mxu0 %vm7302_vm1, %v7301_v2  ;;  %7044 = vmatprep.mubr.msk.f32.mxu1 %vm7302_vm1, %v7301_v2 }
 0x30e   : > { %v3032_v3 = vadd.f32 %v8819_v29, %v3004_v45  ;;  %7098 = vmatprep.subr.mxu0 %v7301_v2 }
 0x30f   : > { %v2937_v12 = vpop.f32.mrf.mxu1  ;;  %v8930_v15 = vld [vmem:[#allocation3 + $0x38] sm:$0xff]  ;;  %7099 = vmatpush3.msra.mxu0 %v5832_v59 }
 0x310   : > { %3056 = vst.msk [vmem:[#allocation3 + $0x48] sm:$0xff] %vm3045_vm4, %v3032_v3  ;;  %v3005_v42 = vadd.f32 %v2937_v12, %v8781_v18  ;;  %6963 = vmatmul.mubr.msk.f32.gmra.mxu0 %vm3045_vm4, %v8930_v15  ;;  %7045 = vmatmul.mubr.msk.f32.gmra.mxu1 %vm3045_vm4, %v8930_v15 }
 0x311   : > { %v6894_v25 = vpop.f32.mrf.mxu1  ;;  %6965 = vmatprep.mubr.msk.f32.mxu0 %vm7302_vm1, %v7301_v2  ;;  %7047 = vmatprep.mubr.msk.f32.mxu1 %vm7302_vm1, %v7301_v2 }
 0x312   : > { %v3033_v31 = vadd.f32 %v8819_v29, %v3005_v42  ;;  %7100 = vmatprep.subr.mxu0 %v7301_v2 }
 0x313   : > { %v2942_v18 = vpop.f32.mrf.mxu1  ;;  %v8947_v41 = vld [vmem:[#allocation3 + $0x40] sm:$0xff]  ;;  %7101 = vmatpush3.msra.mxu0 %v5831_v24 }
 0x314   : > { %3057 = vst.msk [vmem:[#allocation3 + $0x50] sm:$0xff] %vm3045_vm4, %v3033_v31  ;;  %v3006_v13 = vadd.f32 %v2942_v18, %v8784_v44  ;;  %6966 = vmatmul.mubr.msk.f32.gmra.mxu0 %vm3045_vm4, %v8947_v41  ;;  %7048 = vmatmul.mubr.msk.f32.gmra.mxu1 %vm3045_vm4, %v8947_v41  ;;  %v3826_v31 = vld [vmem:[%s9460_s8] sm:$0x3f] }
 0x315   : > { %v6897_v14 = vpop.f32.mrf.mxu1  ;;  %6968 = vmatprep.mubr.msk.f32.mxu0 %vm7302_vm1, %v7301_v2  ;;  %7050 = vmatprep.mubr.msk.f32.mxu1 %vm7302_vm1, %v7301_v2 }
 0x316   : > { %v3034_v21 = vadd.f32 %v8819_v29, %v3006_v13  ;;  %7270 = vmatprep.subr.mxu0 %v7301_v2  ;;  %7166 = vmatpush3.xpose.msra.mxu1 %v3826_v31 }
 0x317   : > { %v2947_v20 = vpop.f32.mrf.mxu1  ;;  %v8961_v48 = vld [vmem:[#allocation3 + $0x48] sm:$0xff]  ;;  %7170 = vmatprep.subr.mxu1 %v7301_v2 }
 0x318   : > { %3058 = vst.msk [vmem:[#allocation3 + $0x58] sm:$0xff] %vm3045_vm4, %v3034_v21  ;;  %v3007_v44 = vadd.f32 %v2947_v20, %v8787_v32  ;;  %6969 = vmatmul.mubr.msk.f32.gmra.mxu0 %vm3045_vm4, %v8961_v48  ;;  %7051 = vmatmul.mubr.msk.f32.gmra.mxu1 %vm3045_vm4, %v8961_v48 }
 0x319   : > { %v6900_v22 = vpop.f32.mrf.mxu1  ;;  %6971 = vmatprep.mubr.msk.f32.mxu0 %vm7302_vm1, %v7301_v2  ;;  %7053 = vmatprep.mubr.msk.f32.mxu1 %vm7302_vm1, %v7301_v2 }
 0x31a   : > { %v3035_v1 = vadd.f32 %v8819_v29, %v3007_v44 }
 0x31b   : > { %v2952_v54 = vpop.f32.mrf.mxu1  ;;  %v8974_v7 = vld [vmem:[#allocation3 + $0x50] sm:$0xff] }
 0x31c   : > { %3059 = vst.msk [vmem:[#allocation3 + $0x60] sm:$0xff] %vm3045_vm4, %v3035_v1  ;;  %v3008_v32 = vadd.f32 %v2952_v54, %v8790_v49  ;;  %6972 = vmatmul.mubr.msk.f32.gmra.mxu0 %vm3045_vm4, %v8974_v7  ;;  %7054 = vmatmul.mubr.msk.f32.gmra.mxu1 %vm3045_vm4, %v8974_v7 }
 0x31d   : > { %v6903_v58 = vpop.f32.mrf.mxu1  ;;  %6974 = vmatprep.mubr.msk.f32.mxu0 %vm7302_vm1, %v7301_v2  ;;  %7056 = vmatprep.mubr.msk.f32.mxu1 %vm7302_vm1, %v7301_v2 }
 0x31e   : > { %v3036_v37 = vadd.f32 %v8819_v29, %v3008_v32 }
 0x31f   : > { %v2957_v10 = vpop.f32.mrf.mxu1  ;;  %v8987_v28 = vld [vmem:[#allocation3 + $0x58] sm:$0xff] }
 0x320   : > { %3060 = vst.msk [vmem:[#allocation3 + $0x68] sm:$0xff] %vm3045_vm4, %v3036_v37  ;;  %v3009_v49 = vadd.f32 %v2957_v10, %v8793_v43  ;;  %6975 = vmatmul.mubr.msk.f32.gmra.mxu0 %vm3045_vm4, %v8987_v28  ;;  %7057 = vmatmul.mubr.msk.f32.gmra.mxu1 %vm3045_vm4, %v8987_v28 }
 0x321   : > { %v6906_v39 = vpop.f32.mrf.mxu1  ;;  %6977 = vmatprep.mubr.msk.f32.mxu0 %vm7302_vm1, %v7301_v2  ;;  %7059 = vmatprep.mubr.msk.f32.mxu1 %vm7302_vm1, %v7301_v2 }
 0x322   : > { %v3037_v47 = vadd.f32 %v8819_v29, %v3009_v49 }
 0x323   : > { %v2962_v57 = vpop.f32.mrf.mxu1  ;;  %v9000_v6 = vld [vmem:[#allocation3 + $0x60] sm:$0xff] }
 0x324   : > { %3061 = vst.msk [vmem:[#allocation3 + $0x70] sm:$0xff] %vm3045_vm4, %v3037_v47  ;;  %v3010_v43 = vadd.f32 %v2962_v57, %v8796_v17  ;;  %6978 = vmatmul.mubr.msk.f32.gmra.mxu0 %vm3045_vm4, %v9000_v6  ;;  %7060 = vmatmul.mubr.msk.f32.gmra.mxu1 %vm3045_vm4, %v9000_v6 }
 0x325   : > { %v6909_v60 = vpop.f32.mrf.mxu1  ;;  %6980 = vmatprep.mubr.msk.f32.mxu0 %vm7302_vm1, %v7301_v2  ;;  %7062 = vmatprep.mubr.msk.f32.mxu1 %vm7302_vm1, %v7301_v2 }
 0x326   : > { %v3038_v11 = vadd.f32 %v8819_v29, %v3010_v43 }
 0x327   : > { %v2967_v9 = vpop.f32.mrf.mxu1  ;;  %v9013_v62 = vld [vmem:[#allocation3 + $0x68] sm:$0xff] }
 0x328   : > { %3062 = vst.msk [vmem:[#allocation3 + $0x78] sm:$0xff] %vm3045_vm4, %v3038_v11  ;;  %v3011_v17 = vadd.f32 %v2967_v9, %v8799_v26  ;;  %6981 = vmatmul.mubr.msk.f32.gmra.mxu0 %vm3045_vm4, %v9013_v62  ;;  %7063 = vmatmul.mubr.msk.f32.gmra.mxu1 %vm3045_vm4, %v9013_v62 }
 0x329   : > { %v6912_v33 = vpop.f32.mrf.mxu1  ;;  %6983 = vmatprep.mubr.msk.f32.mxu0 %vm7302_vm1, %v7301_v2  ;;  %7065 = vmatprep.mubr.msk.f32.mxu1 %vm7302_vm1, %v7301_v2 }
 0x32a   : > { %v3039_v38 = vadd.f32 %v8819_v29, %v3011_v17 }
 0x32b   : > { %v2972_v46 = vpop.f32.mrf.mxu1  ;;  %v9026_v35 = vld [vmem:[#allocation3 + $0x70] sm:$0xff] }
 0x32c   : > { %3063 = vst.msk [vmem:[#allocation3 + $0x80] sm:$0xff] %vm3045_vm4, %v3039_v38  ;;  %v3012_v26 = vadd.f32 %v2972_v46, %v8802_v56  ;;  %6984 = vmatmul.mubr.msk.f32.gmra.mxu0 %vm3045_vm4, %v9026_v35  ;;  %7066 = vmatmul.mubr.msk.f32.gmra.mxu1 %vm3045_vm4, %v9026_v35 }
 0x32d   : > { %v6915_v23 = vpop.f32.mrf.mxu1  ;;  %6986 = vmatprep.mubr.msk.f32.mxu0 %vm7302_vm1, %v7301_v2  ;;  %7068 = vmatprep.mubr.msk.f32.mxu1 %vm7302_vm1, %v7301_v2 }
 0x32e   : > { %v3040_v53 = vadd.f32 %v8819_v29, %v3012_v26 }
 0x32f   : > { %v2977_v4 = vpop.f32.mrf.mxu1  ;;  %v9039_v61 = vld [vmem:[#allocation3 + $0x78] sm:$0xff] }
 0x330   : > { %3064 = vst.msk [vmem:[#allocation3 + $0x88] sm:$0xff] %vm3045_vm4, %v3040_v53  ;;  %v3013_v56 = vadd.f32 %v2977_v4, %v8805_v50  ;;  %6987 = vmatmul.mubr.msk.f32.gmra.mxu0 %vm3045_vm4, %v9039_v61  ;;  %7069 = vmatmul.mubr.msk.f32.gmra.mxu1 %vm3045_vm4, %v9039_v61 }
 0x331   : > { %v6918_v55 = vpop.f32.mrf.mxu1  ;;  %6989 = vmatprep.mubr.msk.f32.mxu0 %vm7302_vm1, %v7301_v2  ;;  %7071 = vmatprep.mubr.msk.f32.mxu1 %vm7302_vm1, %v7301_v2 }
 0x332   : > { %v3041_v8 = vadd.f32 %v8819_v29, %v3013_v56 }
 0x333   : > { %v2982_v5 = vpop.f32.mrf.mxu1  ;;  %v9052_v34 = vld [vmem:[#allocation3 + $0x80] sm:$0xff] }
 0x334   : > { %3065 = vst.msk [vmem:[#allocation3 + $0x90] sm:$0xff] %vm3045_vm4, %v3041_v8  ;;  %v3014_v50 = vadd.f32 %v2982_v5, %v8808_v16  ;;  %6990 = vmatmul.mubr.msk.f32.gmra.mxu0 %vm3045_vm4, %v9052_v34  ;;  %7072 = vmatmul.mubr.msk.f32.gmra.mxu1 %vm3045_vm4, %v9052_v34 }
 0x335   : > { %v6921_v36 = vpop.f32.mrf.mxu1  ;;  %6992 = vmatprep.mubr.msk.f32.mxu0 %vm7302_vm1, %v7301_v2  ;;  %7074 = vmatprep.mubr.msk.f32.mxu1 %vm7302_vm1, %v7301_v2 }
 0x336   : > { %v3042_v45 = vadd.f32 %v8819_v29, %v3014_v50 }
 0x337   : > { %v2987_v59 = vpop.f32.mrf.mxu1  ;;  %v9065_v52 = vld [vmem:[#allocation3 + $0x88] sm:$0xff] }
 0x338   : > { %3066 = vst.msk [vmem:[#allocation3 + $0x98] sm:$0xff] %vm3045_vm4, %v3042_v45  ;;  %v3015_v16 = vadd.f32 %v2987_v59, %v8811_v27  ;;  %6993 = vmatmul.mubr.msk.f32.gmra.mxu0 %vm3045_vm4, %v9065_v52  ;;  %7075 = vmatmul.mubr.msk.f32.gmra.mxu1 %vm3045_vm4, %v9065_v52 }
 0x339   : > { %v6924_v3 = vpop.f32.mrf.mxu1  ;;  %6995 = vmatprep.mubr.msk.f32.mxu0 %vm7302_vm1, %v7301_v2  ;;  %7077 = vmatprep.mubr.msk.f32.mxu1 %vm7302_vm1, %v7301_v2 }
 0x33a   : > { %v3043_v12 = vadd.f32 %v8819_v29, %v3015_v16 }
 0x33b   : > { %v2992_v42 = vpop.f32.mrf.mxu1  ;;  %v3087_v24 = vld [vmem:[#allocation3 + $0x90] sm:$0xff] }
 0x33c   : > { %3067 = vst.msk [vmem:[#allocation3 + $0xa0] sm:$0xff] %vm3045_vm4, %v3043_v12  ;;  %v3016_v27 = vadd.f32 %v2992_v42, %v8814_v19  ;;  %6996 = vmatmul.mubr.msk.f32.gmra.mxu0 %vm3045_vm4, %v3087_v24  ;;  %7078 = vmatmul.mubr.msk.f32.gmra.mxu1 %vm3045_vm4, %v3087_v24 }
 0x33d   : > { %v6927_v25 = vpop.f32.mrf.mxu1  ;;  %6998 = vmatprep.mubr.msk.f32.mxu0 %vm7302_vm1, %v7301_v2  ;;  %7080 = vmatprep.mubr.msk.f32.mxu1 %vm7302_vm1, %v7301_v2 }
 0x33e   : > { %v3044_v18 = vadd.f32 %v8819_v29, %v3016_v27  ;;  %v9223_v25 = vld [vmem:[%s397_s26] sm:$0xff]  ;;  %s401_s26 = scalar_lea.vmem %s9463_s11, %s5538_s23 }
 0x33f   : > { %v3088_v13 = vld [vmem:[#allocation3 + $0x98] sm:$0xff]  ;;  %v9090_v19 = vpop.f32.mrf.mxu1  ;;  %5451 = vrot.lane.b32.xlu0 %v9223_v25, %s7303_s27 }
 0x340   : > { %3068 = vst.msk [vmem:[#allocation3 + $0xa8] sm:$0xff] %vm3045_vm4, %v3044_v18  ;;  %6999 = vmatmul.mubr.msk.f32.gmra.mxu0 %vm3045_vm4, %v3088_v13  ;;  %7081 = vmatmul.mubr.msk.f32.gmra.mxu1 %vm3045_vm4, %v3088_v13 }
 0x341   : > { %7001 = vmatprep.mubr.msk.f32.mxu0 %vm7302_vm1, %v7301_v2  ;;  %7083 = vmatprep.mubr.msk.f32.mxu1 %vm7302_vm1, %v7301_v2  ;;  %v7025_v14 = vpop.f32.mrf.mxu1 }
 0x343   : > { %v3089_v29 = vld [vmem:[#allocation3 + $0xa0] sm:$0xff] }
 0x344   : > { %7002 = vmatmul.mubr.msk.f32.gmra.mxu0 %vm3045_vm4, %v3089_v29  ;;  %7084 = vmatmul.mubr.msk.f32.gmra.mxu1 %vm3045_vm4, %v3089_v29 }
 0x345   : > { %7004 = vmatprep.mubr.msk.f32.mxu0 %vm7302_vm1, %v7301_v2  ;;  %7167 = vmatprep.mubr.msk.f32.mxu1 %vm7302_vm1, %v7301_v2 }
 0x347   : > { %v3098_v21 = vld [vmem:[#allocation3 + $0xa8] sm:$0xff] }
 0x348   : > { %7005 = vmatmul.mubr.msk.f32.gmra.mxu0 %vm3045_vm4, %v3098_v21 }
 0x349   : > { %7102 = vmatprep.mubr.msk.f32.mxu0 %vm7302_vm1, %v7301_v2 }
 0x34c   : > { %7103 = vmatmul.mubr.msk.f32.vlgmr.msra.gmra.mxu0 %vm3045_vm4, %v8845_v30  ;;  %v5361_v30 = vld [vmem:[%s9461_s9 + $0x8] sm:$0xf] }
 0x34d   : > { %7105 = vmatprep.mubr.msk.f32.mxu0 %vm7302_vm1, %v7301_v2  ;;  %7271 = vmatpush3.msk.msra.mxu0 %vm5366_vm5, %v5361_v30 }
 0x34e   : > { %7272 = vmatprep.subr.mxu0 %v7301_v2 }
 0x350   : > { %7106 = vmatmul.mubr.msk.f32.gmra.mxu0 %vm3045_vm4, %v8862_v0  ;;  %v3534_v0 = vld [vmem:[#allocation3 + $0xb0] sm:$0xff] }
 0x351   : > { %7108 = vmatprep.mubr.msk.f32.mxu0 %vm7302_vm1, %v7301_v2 }
 0x354   : > { %7109 = vmatmul.mubr.msk.f32.gmra.mxu0 %vm3045_vm4, %v8879_v51 }
 0x355   : > { %7111 = vmatprep.mubr.msk.f32.mxu0 %vm7302_vm1, %v7301_v2 }
 0x358   : > { %7112 = vmatmul.mubr.msk.f32.gmra.mxu0 %vm3045_vm4, %v8896_v40 }
 0x359   : > { %7114 = vmatprep.mubr.msk.f32.mxu0 %vm7302_vm1, %v7301_v2 }
 0x35c   : > { %7115 = vmatmul.mubr.msk.f32.gmra.mxu0 %vm3045_vm4, %v8913_v63 }
 0x35d   : > { %7117 = vmatprep.mubr.msk.f32.mxu0 %vm7302_vm1, %v7301_v2 }
 0x360   : > { %7118 = vmatmul.mubr.msk.f32.gmra.mxu0 %vm3045_vm4, %v8930_v15 }
 0x361   : > { %7120 = vmatprep.mubr.msk.f32.mxu0 %vm7302_vm1, %v7301_v2 }
 0x364   : > { %7121 = vmatmul.mubr.msk.f32.gmra.mxu0 %vm3045_vm4, %v8947_v41  ;;  %v5360_v41 = vld [vmem:[%s9461_s9] sm:$0xff] }
 0x365   : > { %7123 = vmatprep.mubr.msk.f32.mxu0 %vm7302_vm1, %v7301_v2  ;;  %7273 = vmatpush3.msra.mxu0 %v5360_v41 }
 0x368   : > { %7124 = vmatmul.mubr.msk.f32.gmra.mxu0 %vm3045_vm4, %v8961_v48 }
 0x369   : > { %7126 = vmatprep.mubr.msk.f32.mxu0 %vm7302_vm1, %v7301_v2 }
 0x36c   : > { %7127 = vmatmul.mubr.msk.f32.gmra.mxu0 %vm3045_vm4, %v8974_v7 }
 0x36d   : > { %7129 = vmatprep.mubr.msk.f32.mxu0 %vm7302_vm1, %v7301_v2 }
 0x370   : > { %7130 = vmatmul.mubr.msk.f32.gmra.mxu0 %vm3045_vm4, %v8987_v28 }
 0x371   : > { %7132 = vmatprep.mubr.msk.f32.mxu0 %vm7302_vm1, %v7301_v2 }
 0x374   : > { %7133 = vmatmul.mubr.msk.f32.gmra.mxu0 %vm3045_vm4, %v9000_v6 }
 0x375   : > { %7135 = vmatprep.mubr.msk.f32.mxu0 %vm7302_vm1, %v7301_v2 }
 0x378   : > { %7136 = vmatmul.mubr.msk.f32.gmra.mxu0 %vm3045_vm4, %v9013_v62 }
 0x379   : > { %7138 = vmatprep.mubr.msk.f32.mxu0 %vm7302_vm1, %v7301_v2 }
 0x37c   : > { %7139 = vmatmul.mubr.msk.f32.gmra.mxu0 %vm3045_vm4, %v9026_v35 }
 0x37d   : > { %7141 = vmatprep.mubr.msk.f32.mxu0 %vm7302_vm1, %v7301_v2 }
 0x380   : > { %7142 = vmatmul.mubr.msk.f32.gmra.mxu0 %vm3045_vm4, %v9039_v61 }
 0x381   : > { %7144 = vmatprep.mubr.msk.f32.mxu0 %vm7302_vm1, %v7301_v2 }
 0x384   : > { %7145 = vmatmul.mubr.msk.f32.gmra.mxu0 %vm3045_vm4, %v9052_v34 }
 0x385   : > { %7147 = vmatprep.mubr.msk.f32.mxu0 %vm7302_vm1, %v7301_v2 }
 0x388   : > { %7148 = vmatmul.mubr.msk.f32.gmra.mxu0 %vm3045_vm4, %v9065_v52 }
 0x389   : > { %7150 = vmatprep.mubr.msk.f32.mxu0 %vm7302_vm1, %v7301_v2 }
 0x38c   : > { %7151 = vmatmul.mubr.msk.f32.gmra.mxu0 %vm3045_vm4, %v3087_v24 }
 0x38d   : > { %7153 = vmatprep.mubr.msk.f32.mxu0 %vm7302_vm1, %v7301_v2 }
 0x390   : > { %7154 = vmatmul.mubr.msk.f32.gmra.mxu0 %vm3045_vm4, %v3088_v13 }
 0x391   : > { %7156 = vmatprep.mubr.msk.f32.mxu0 %vm7302_vm1, %v7301_v2 }
 0x394   : > { %7157 = vmatmul.mubr.msk.f32.gmra.mxu0 %vm3045_vm4, %v3089_v29 }
 0x395   : > { %7159 = vmatprep.mubr.msk.f32.mxu0 %vm7302_vm1, %v7301_v2 }
 0x398   : > { %7160 = vmatmul.mubr.msk.f32.gmra.mxu0 %vm3045_vm4, %v3098_v21 }
 0x399   : > { %7162 = vmatprep.mubr.msk.f32.mxu0 %vm7302_vm1, %v7301_v2 }
 0x39c   : > { %7163 = vmatmul.mubr.msk.f32.gmra.mxu0 %vm3045_vm4, %v3534_v0 }
 0x39d   : > { %7274 = vmatprep.mubr.msk.f32.mxu0 %vm7302_vm1, %v7301_v2 }
 0x3a0   : > { %7275 = vmatmul.mubr.msk.f32.vlgmr.msra.gmra.mxu0 %vm5362_vm6, %v9223_v25 }
 0x3b8   : > { %v9192_v51 = vpop.f32.mrf.mxu0  ;;  %v3415_v40 = vpop.f32.mrf.mxu1 }
 0x3ba   : > { %v6946_v63 = vpop.f32.mrf.mxu0  ;;  %v7028_v15 = vpop.f32.mrf.mxu1 }
 0x3bc   : > { %v3242_v20 = vpop.f32.mrf.mxu0  ;;  %v3420_v48 = vpop.f32.mrf.mxu1 }
 0x3bd   : > { %v9197_v44 = vadd.f32 %v3415_v40, %v3242_v20 }
 0x3be   : > { %v6949_v22 = vpop.f32.mrf.mxu0  ;;  %v7031_v1 = vpop.f32.mrf.mxu1 }
 0x3c0   : > { %v3247_v54 = vpop.f32.mrf.mxu0  ;;  %v3425_v7 = vpop.f32.mrf.mxu1 }
 0x3c1   : > { %v9199_v32 = vadd.f32 %v3420_v48, %v3247_v54 }
 0x3c2   : > { %v6952_v58 = vpop.f32.mrf.mxu0  ;;  %v7034_v37 = vpop.f32.mrf.mxu1 }
 0x3c4   : > { %v3252_v10 = vpop.f32.mrf.mxu0  ;;  %v3430_v28 = vpop.f32.mrf.mxu1 }
 0x3c5   : > { %v9201_v49 = vadd.f32 %v3425_v7, %v3252_v10 }
 0x3c6   : > { %v6955_v39 = vpop.f32.mrf.mxu0  ;;  %v7037_v47 = vpop.f32.mrf.mxu1 }
 0x3c8   : > { %v3257_v57 = vpop.f32.mrf.mxu0  ;;  %v3435_v6 = vpop.f32.mrf.mxu1 }
 0x3c9   : > { %v9203_v43 = vadd.f32 %v3430_v28, %v3257_v57 }
 0x3ca   : > { %v6958_v60 = vpop.f32.mrf.mxu0  ;;  %v7040_v11 = vpop.f32.mrf.mxu1 }
 0x3cc   : > { %v3262_v9 = vpop.f32.mrf.mxu0  ;;  %v3440_v62 = vpop.f32.mrf.mxu1 }
 0x3cd   : > { %v9205_v17 = vadd.f32 %v3435_v6, %v3262_v9 }
 0x3ce   : > { %v6961_v33 = vpop.f32.mrf.mxu0  ;;  %v7043_v38 = vpop.f32.mrf.mxu1 }
 0x3d0   : > { %v3267_v46 = vpop.f32.mrf.mxu0  ;;  %v3445_v35 = vpop.f32.mrf.mxu1 }
 0x3d1   : > { %v9207_v26 = vadd.f32 %v3440_v62, %v3267_v46 }
 0x3d2   : > { %v6964_v23 = vpop.f32.mrf.mxu0  ;;  %v7046_v53 = vpop.f32.mrf.mxu1 }
 0x3d4   : > { %v3272_v4 = vpop.f32.mrf.mxu0  ;;  %v3450_v61 = vpop.f32.mrf.mxu1 }
 0x3d5   : > { %v9209_v56 = vadd.f32 %v3445_v35, %v3272_v4 }
 0x3d6   : > { %v6967_v55 = vpop.f32.mrf.mxu0  ;;  %v7049_v8 = vpop.f32.mrf.mxu1 }
 0x3d8   : > { %v3277_v5 = vpop.f32.mrf.mxu0  ;;  %v3455_v34 = vpop.f32.mrf.mxu1 }
 0x3d9   : > { %v9211_v50 = vadd.f32 %v3450_v61, %v3277_v5 }
 0x3da   : > { %v6970_v36 = vpop.f32.mrf.mxu0  ;;  %v7052_v45 = vpop.f32.mrf.mxu1 }
 0x3dc   : > { %v3282_v59 = vpop.f32.mrf.mxu0  ;;  %v3460_v52 = vpop.f32.mrf.mxu1 }
 0x3dd   : > { %v9213_v16 = vadd.f32 %v3455_v34, %v3282_v59 }
 0x3de   : > { %v6973_v3 = vpop.f32.mrf.mxu0  ;;  %v7055_v12 = vpop.f32.mrf.mxu1 }
 0x3e0   : > { %v3287_v42 = vpop.f32.mrf.mxu0  ;;  %v3465_v24 = vpop.f32.mrf.mxu1 }
 0x3e1   : > { %v9221_v27 = vadd.f32 %v3460_v52, %v3287_v42 }
 0x3e2   : > { %v6976_v31 = vpop.f32.mrf.mxu0  ;;  %v7058_v18 = vpop.f32.mrf.mxu1 }
 0x3e3   : > { %v3411_v31 = vadd.f32 %v9090_v19, %v9192_v51 }
 0x3e4   : > { %v3292_v13 = vpop.f32.mrf.mxu0  ;;  %v3470_v14 = vpop.f32.mrf.mxu1 }
 0x3e5   : > { %v9227_v29 = vadd.f32 %v3465_v24, %v3292_v13  ;;  %v9252_v13 = vld [vmem:[%s9459_s7] ss:$0 sm:$0xff] }
 0x3e6   : > { %v6979_v21 = vpop.f32.mrf.mxu0  ;;  %v7061_v30 = vpop.f32.mrf.mxu1 }
 0x3e8   : > { %v3297_v0 = vpop.f32.mrf.mxu0  ;;  %v3475_v40 = vpop.f32.mrf.mxu1 }
 0x3e9   : > { %v9229_v63 = vadd.f32 %v3470_v14, %v3297_v0  ;;  %v3827_v0 = vld [vmem:[%s9460_s8 + $0x8] sm:$0x3f] }
 0x3ea   : > { %v6982_v15 = vpop.f32.mrf.mxu0  ;;  %v7064_v41 = vpop.f32.mrf.mxu1 }
 0x3eb   : > { %v3828_v41 = vld [vmem:[%s9460_s8 + $0x10] sm:$0x3f] }
 0x3ec   : > { %v3302_v20 = vpop.f32.mrf.mxu0  ;;  %v3480_v48 = vpop.f32.mrf.mxu1 }
 0x3ed   : > { %v9231_v22 = vadd.f32 %v3475_v40, %v3302_v20 }
 0x3ee   : > { %v6985_v1 = vpop.f32.mrf.mxu0  ;;  %v7067_v54 = vpop.f32.mrf.mxu1 }
 0x3ef   : > { %v3829_v54 = vld [vmem:[%s9460_s8 + $0x18] sm:$0x3f] }
 0x3f0   : > { %v3307_v7 = vpop.f32.mrf.mxu0  ;;  %v3485_v58 = vpop.f32.mrf.mxu1 }
 0x3f1   : > { %v9233_v37 = vadd.f32 %v3480_v48, %v3307_v7 }
 0x3f2   : > { %v6988_v10 = vpop.f32.mrf.mxu0  ;;  %v7070_v28 = vpop.f32.mrf.mxu1 }
 0x3f3   : > { %v3830_v28 = vld [vmem:[%s9460_s8 + $0x20] sm:$0x3f] }
 0x3f4   : > { %v3312_v39 = vpop.f32.mrf.mxu0  ;;  %v3490_v47 = vpop.f32.mrf.mxu1 }
 0x3f5   : > { %v9235_v57 = vadd.f32 %v3485_v58, %v3312_v39 }
 0x3f6   : > { %v6991_v6 = vpop.f32.mrf.mxu0  ;;  %v7073_v60 = vpop.f32.mrf.mxu1 }
 0x3f7   : > { %v3831_v60 = vld [vmem:[%s9460_s8 + $0x28] sm:$0x3f] }
 0x3f8   : > { %v3317_v11 = vpop.f32.mrf.mxu0  ;;  %v3495_v9 = vpop.f32.mrf.mxu1 }
 0x3f9   : > { %v9237_v62 = vadd.f32 %v3490_v47, %v3317_v11 }
 0x3fa   : > { %v6994_v33 = vpop.f32.mrf.mxu0  ;;  %v7076_v38 = vpop.f32.mrf.mxu1 }
 0x3fb   : > { %v3832_v38 = vld [vmem:[%s9460_s8 + $0x30] sm:$0x3f] }
 0x3fc   : > { %v3322_v46 = vpop.f32.mrf.mxu0  ;;  %v3500_v35 = vpop.f32.mrf.mxu1 }
 0x3fd   : > { %v9239_v23 = vadd.f32 %v3495_v9, %v3322_v46 }
 0x3fe   : > { %v6997_v53 = vpop.f32.mrf.mxu0  ;;  %v7079_v4 = vpop.f32.mrf.mxu1 }
 0x3ff   : > { %v3833_v4 = vld [vmem:[%s9460_s8 + $0x38] sm:$0x3f] }
 0x400   : > { %v3327_v61 = vpop.f32.mrf.mxu0  ;;  %v3505_v55 = vpop.f32.mrf.mxu1 }
 0x401   : > { %v9241_v8 = vadd.f32 %v3500_v35, %v3327_v61 }
 0x402   : > { %v7000_v5 = vpop.f32.mrf.mxu0  ;;  %v7082_v34 = vpop.f32.mrf.mxu1 }
 0x403   : > { %v3834_v34 = vld [vmem:[%s9460_s8 + $0x40] sm:$0x3f] }
 0x404   : > { %v3332_v36 = vpop.f32.mrf.mxu0  ;;  %v3510_v45 = vpop.f32.mrf.mxu1 }
 0x405   : > { %v9243_v59 = vadd.f32 %v3505_v55, %v3332_v36 }
 0x406   : > { %v7003_v52 = vpop.f32.mrf.mxu0  ;;  %v7085_v3 = vpop.f32.mrf.mxu1 }
 0x407   : > { %v3835_v3 = vld [vmem:[%s9460_s8 + $0x48] sm:$0x3f] }
 0x408   : > { %v3337_v12 = vpop.f32.mrf.mxu0 }
 0x409   : > { %v9245_v42 = vadd.f32 %v3510_v45, %v3337_v12 }
 0x40a   : > { %v7006_v24 = vpop.f32.mrf.mxu0 }
 0x40c   : > { %v3673_v18 = vpop.f32.mrf.mxu0 }
 0x40d   : > { %v3777_v14 = vadd.f32 %v3673_v18, %v3411_v31  ;;  %v3836_v18 = vld [vmem:[%s9460_s8 + $0x50] sm:$0x3f] }
 0x40e   : > { %v7104_v21 = vpop.f32.mrf.mxu0 }
 0x40f   : > { %v3805_v30 = vadd.f32 %v9252_v13, %v3777_v14 }
 0x410   : > { %v3678_v40 = vpop.f32.mrf.mxu0 }
 0x411   : > { %v3778_v15 = vadd.f32 %v3678_v40, %v9197_v44  ;;  %7168 = vmatmul.mubr.f32.vlgmr.msra.gmra.mxu1 %v3805_v30 }
 0x412   : > { %7171 = vmatpush3.xpose.msra.mxu1 %v3827_v0  ;;  %v7107_v19 = vpop.f32.mrf.mxu0  ;;  %7172 = vmatprep.mubr.msk.f32.mxu1 %vm7302_vm1, %v7301_v2  ;;  %v3837_v0 = vld [vmem:[%s9460_s8 + $0x58] sm:$0x3f] }
 0x413   : > { %v3806_v51 = vadd.f32 %v9252_v13, %v3778_v15  ;;  %7175 = vmatprep.subr.mxu1 %v7301_v2 }
 0x414   : > { %v3683_v20 = vpop.f32.mrf.mxu0 }
 0x415   : > { %v3779_v48 = vadd.f32 %v3683_v20, %v9199_v32  ;;  %7173 = vmatmul.mubr.f32.vlgmr.msra.gmra.mxu1 %v3806_v51  ;;  %v3838_v51 = vld [vmem:[%s9460_s8 + $0x60] sm:$0x3f] }
 0x416   : > { %7176 = vmatpush3.xpose.msra.mxu1 %v3828_v41  ;;  %v7110_v44 = vpop.f32.mrf.mxu0  ;;  %7177 = vmatprep.mubr.msk.f32.mxu1 %vm7302_vm1, %v7301_v2 }
 0x417   : > { %v3807_v1 = vadd.f32 %v9252_v13, %v3779_v48  ;;  %7180 = vmatprep.subr.mxu1 %v7301_v2  ;;  %v3839_v44 = vld [vmem:[%s9460_s8 + $0x68] sm:$0x3f] }
 0x418   : > { %v3688_v7 = vpop.f32.mrf.mxu0 }
 0x419   : > { %v3780_v58 = vadd.f32 %v3688_v7, %v9201_v49  ;;  %7178 = vmatmul.mubr.f32.vlgmr.msra.gmra.mxu1 %v3807_v1 }
 0x41a   : > { %7181 = vmatpush3.xpose.msra.mxu1 %v3829_v54  ;;  %v7113_v32 = vpop.f32.mrf.mxu0  ;;  %7182 = vmatprep.mubr.msk.f32.mxu1 %vm7302_vm1, %v7301_v2 }
 0x41b   : > { %v3808_v10 = vadd.f32 %v9252_v13, %v3780_v58  ;;  %7185 = vmatprep.subr.mxu1 %v7301_v2  ;;  %v3840_v58 = vld [vmem:[%s9460_s8 + $0x70] sm:$0x3f] }
 0x41c   : > { %v3693_v39 = vpop.f32.mrf.mxu0 }
 0x41d   : > { %v3781_v47 = vadd.f32 %v3693_v39, %v9203_v43  ;;  %7183 = vmatmul.mubr.f32.vlgmr.msra.gmra.mxu1 %v3808_v10  ;;  %v3841_v39 = vld [vmem:[%s9460_s8 + $0x78] sm:$0x3f] }
 0x41e   : > { %7186 = vmatpush3.xpose.msra.mxu1 %v3830_v28  ;;  %v7116_v49 = vpop.f32.mrf.mxu0  ;;  %7187 = vmatprep.mubr.msk.f32.mxu1 %vm7302_vm1, %v7301_v2 }
 0x41f   : > { %v3809_v6 = vadd.f32 %v9252_v13, %v3781_v47  ;;  %7190 = vmatprep.subr.mxu1 %v7301_v2 }
 0x420   : > { %v3698_v11 = vpop.f32.mrf.mxu0 }
 0x421   : > { %v3782_v9 = vadd.f32 %v3698_v11, %v9205_v17  ;;  %7188 = vmatmul.mubr.f32.vlgmr.msra.gmra.mxu1 %v3809_v6 }
 0x422   : > { %7191 = vmatpush3.xpose.msra.mxu1 %v3831_v60  ;;  %v7119_v43 = vpop.f32.mrf.mxu0  ;;  %7192 = vmatprep.mubr.msk.f32.mxu1 %vm7302_vm1, %v7301_v2  ;;  %v3842_v60 = vld [vmem:[%s9460_s8 + $0x80] sm:$0x3f] }
 0x423   : > { %v3810_v33 = vadd.f32 %v9252_v13, %v3782_v9  ;;  %7195 = vmatprep.subr.mxu1 %v7301_v2 }
 0x424   : > { %v3703_v46 = vpop.f32.mrf.mxu0 }
 0x425   : > { %v3783_v35 = vadd.f32 %v3703_v46, %v9207_v26  ;;  %7193 = vmatmul.mubr.f32.vlgmr.msra.gmra.mxu1 %v3810_v33  ;;  %v3843_v33 = vld [vmem:[%s9460_s8 + $0x88] sm:$0x3f] }
 0x426   : > { %7196 = vmatpush3.xpose.msra.mxu1 %v3832_v38  ;;  %v7122_v17 = vpop.f32.mrf.mxu0  ;;  %7197 = vmatprep.mubr.msk.f32.mxu1 %vm7302_vm1, %v7301_v2 }
 0x427   : > { %v3811_v53 = vadd.f32 %v9252_v13, %v3783_v35  ;;  %7200 = vmatprep.subr.mxu1 %v7301_v2  ;;  %v3844_v17 = vld [vmem:[%s9460_s8 + $0x90] sm:$0x3f] }
 0x428   : > { %v3708_v61 = vpop.f32.mrf.mxu0 }
 0x429   : > { %v3784_v55 = vadd.f32 %v3708_v61, %v9209_v56  ;;  %7198 = vmatmul.mubr.f32.vlgmr.msra.gmra.mxu1 %v3811_v53 }
 0x42a   : > { %7201 = vmatpush3.xpose.msra.mxu1 %v3833_v4  ;;  %v7125_v26 = vpop.f32.mrf.mxu0  ;;  %7202 = vmatprep.mubr.msk.f32.mxu1 %vm7302_vm1, %v7301_v2 }
 0x42b   : > { %v3812_v5 = vadd.f32 %v9252_v13, %v3784_v55  ;;  %7205 = vmatprep.subr.mxu1 %v7301_v2  ;;  %v3845_v55 = vld [vmem:[%s9460_s8 + $0x98] sm:$0x3f] }
 0x42c   : > { %v3713_v36 = vpop.f32.mrf.mxu0 }
 0x42d   : > { %v3785_v45 = vadd.f32 %v3713_v36, %v9211_v50  ;;  %7203 = vmatmul.mubr.f32.vlgmr.msra.gmra.mxu1 %v3812_v5  ;;  %v3846_v36 = vld [vmem:[%s9460_s8 + $0xa0] sm:$0x3f] }
 0x42e   : > { %7206 = vmatpush3.xpose.msra.mxu1 %v3834_v34  ;;  %v7128_v56 = vpop.f32.mrf.mxu0  ;;  %7207 = vmatprep.mubr.msk.f32.mxu1 %vm7302_vm1, %v7301_v2 }
 0x42f   : > { %v3813_v52 = vadd.f32 %v9252_v13, %v3785_v45  ;;  %7210 = vmatprep.subr.mxu1 %v7301_v2 }
 0x430   : > { %v3718_v12 = vpop.f32.mrf.mxu0 }
 0x431   : > { %v3786_v24 = vadd.f32 %v3718_v12, %v9213_v16  ;;  %7208 = vmatmul.mubr.f32.vlgmr.msra.gmra.mxu1 %v3813_v52 }
 0x432   : > { %7211 = vmatpush3.xpose.msra.mxu1 %v3835_v3  ;;  %v7131_v50 = vpop.f32.mrf.mxu0  ;;  %7212 = vmatprep.mubr.msk.f32.mxu1 %vm7302_vm1, %v7301_v2 }
 0x433   : > { %v3814_v31 = vadd.f32 %v9252_v13, %v3786_v24  ;;  %7215 = vmatprep.subr.mxu1 %v7301_v2 }
 0x434   : > { %v3723_v14 = vpop.f32.mrf.mxu0 }
 0x435   : > { %v3787_v21 = vadd.f32 %v3723_v14, %v9221_v27  ;;  %7213 = vmatmul.mubr.f32.vlgmr.msra.gmra.mxu1 %v3814_v31 }
 0x436   : > { %7216 = vmatpush3.xpose.msra.mxu1 %v3836_v18  ;;  %v7134_v16 = vpop.f32.mrf.mxu0  ;;  %7217 = vmatprep.mubr.msk.f32.mxu1 %vm7302_vm1, %v7301_v2 }
 0x437   : > { %v3815_v30 = vadd.f32 %v9252_v13, %v3787_v21  ;;  %7220 = vmatprep.subr.mxu1 %v7301_v2 }
 0x438   : > { %v3728_v40 = vpop.f32.mrf.mxu0 }
 0x439   : > { %v3788_v15 = vadd.f32 %v3728_v40, %v9227_v29  ;;  %7218 = vmatmul.mubr.f32.vlgmr.msra.gmra.mxu1 %v3815_v30 }
 0x43a   : > { %7221 = vmatpush3.xpose.msra.mxu1 %v3837_v0  ;;  %v7137_v27 = vpop.f32.mrf.mxu0  ;;  %7222 = vmatprep.mubr.msk.f32.mxu1 %vm7302_vm1, %v7301_v2 }
 0x43b   : > { %v3816_v19 = vadd.f32 %v9252_v13, %v3788_v15  ;;  %7225 = vmatprep.subr.mxu1 %v7301_v2 }
 0x43c   : > { %v3733_v41 = vpop.f32.mrf.mxu0 }
 0x43d   : > { %v3789_v20 = vadd.f32 %v3733_v41, %v9229_v63  ;;  %7223 = vmatmul.mubr.f32.vlgmr.msra.gmra.mxu1 %v3816_v19 }
 0x43e   : > { %7226 = vmatpush3.xpose.msra.mxu1 %v3838_v51  ;;  %v7140_v29 = vpop.f32.mrf.mxu0  ;;  %7227 = vmatprep.mubr.msk.f32.mxu1 %vm7302_vm1, %v7301_v2 }
 0x43f   : > { %v3817_v48 = vadd.f32 %v9252_v13, %v3789_v20  ;;  %7230 = vmatprep.subr.mxu1 %v7301_v2 }
 0x440   : > { %v3738_v1 = vpop.f32.mrf.mxu0 }
 0x441   : > { %v3790_v54 = vadd.f32 %v3738_v1, %v9231_v22  ;;  %7228 = vmatmul.mubr.f32.vlgmr.msra.gmra.mxu1 %v3817_v48 }
 0x442   : > { %7231 = vmatpush3.xpose.msra.mxu1 %v3839_v44  ;;  %v7143_v63 = vpop.f32.mrf.mxu0  ;;  %7232 = vmatprep.mubr.msk.f32.mxu1 %vm7302_vm1, %v7301_v2 }
 0x443   : > { %v3818_v7 = vadd.f32 %v9252_v13, %v3790_v54  ;;  %7235 = vmatprep.subr.mxu1 %v7301_v2 }
 0x444   : > { %v3743_v32 = vpop.f32.mrf.mxu0 }
 0x445   : > { %v3791_v10 = vadd.f32 %v3743_v32, %v9233_v37  ;;  %7233 = vmatmul.mubr.f32.vlgmr.msra.gmra.mxu1 %v3818_v7 }
 0x446   : > { %7236 = vmatpush3.xpose.msra.mxu1 %v3840_v58  ;;  %v7146_v22 = vpop.f32.mrf.mxu0  ;;  %7237 = vmatprep.mubr.msk.f32.mxu1 %vm7302_vm1, %v7301_v2 }
 0x447   : > { %v3819_v28 = vadd.f32 %v9252_v13, %v3791_v10  ;;  %7240 = vmatprep.subr.mxu1 %v7301_v2 }
 0x448   : > { %v3748_v47 = vpop.f32.mrf.mxu0 }
 0x449   : > { %v3792_v49 = vadd.f32 %v3748_v47, %v9235_v57  ;;  %7238 = vmatmul.mubr.f32.vlgmr.msra.gmra.mxu1 %v3819_v28 }
 0x44a   : > { %7241 = vmatpush3.xpose.msra.mxu1 %v3841_v39  ;;  %v7149_v37 = vpop.f32.mrf.mxu0  ;;  %7242 = vmatprep.mubr.msk.f32.mxu1 %vm7302_vm1, %v7301_v2 }
 0x44b   : > { %v3820_v6 = vadd.f32 %v9252_v13, %v3792_v49  ;;  %7245 = vmatprep.subr.mxu1 %v7301_v2 }
 0x44c   : > { %v3753_v11 = vpop.f32.mrf.mxu0 }
 0x44d   : > { %v3793_v9 = vadd.f32 %v3753_v11, %v9237_v62  ;;  %7243 = vmatmul.mubr.f32.vlgmr.msra.gmra.mxu1 %v3820_v6 }
 0x44e   : > { %7246 = vmatpush3.xpose.msra.mxu1 %v3842_v60  ;;  %v7152_v57 = vpop.f32.mrf.mxu0  ;;  %7247 = vmatprep.mubr.msk.f32.mxu1 %vm7302_vm1, %v7301_v2 }
 0x44f   : > { %v3821_v43 = vadd.f32 %v9252_v13, %v3793_v9  ;;  %7250 = vmatprep.subr.mxu1 %v7301_v2 }
 0x450   : > { %v3758_v38 = vpop.f32.mrf.mxu0 }
 0x451   : > { %v3794_v46 = vadd.f32 %v3758_v38, %v9239_v23  ;;  %7248 = vmatmul.mubr.f32.vlgmr.msra.gmra.mxu1 %v3821_v43 }
 0x452   : > { %7251 = vmatpush3.xpose.msra.mxu1 %v3843_v33  ;;  %v7155_v62 = vpop.f32.mrf.mxu0  ;;  %7252 = vmatprep.mubr.msk.f32.mxu1 %vm7302_vm1, %v7301_v2 }
 0x453   : > { %v3822_v35 = vadd.f32 %v9252_v13, %v3794_v46  ;;  %7255 = vmatprep.subr.mxu1 %v7301_v2 }
 0x454   : > { %v3763_v53 = vpop.f32.mrf.mxu0 }
 0x455   : > { %v3795_v4 = vadd.f32 %v3763_v53, %v9241_v8  ;;  %7253 = vmatmul.mubr.f32.vlgmr.msra.gmra.mxu1 %v3822_v35 }
 0x456   : > { %7256 = vmatpush3.xpose.msra.mxu1 %v3844_v17  ;;  %v7158_v23 = vpop.f32.mrf.mxu0  ;;  %7257 = vmatprep.mubr.msk.f32.mxu1 %vm7302_vm1, %v7301_v2 }
 0x457   : > { %v3823_v61 = vadd.f32 %v9252_v13, %v3795_v4  ;;  %7260 = vmatprep.subr.mxu1 %v7301_v2 }
 0x458   : > { %v3768_v26 = vpop.f32.mrf.mxu0 }
 0x459   : > { %v3796_v5 = vadd.f32 %v3768_v26, %v9243_v59  ;;  %7258 = vmatmul.mubr.f32.vlgmr.msra.gmra.mxu1 %v3823_v61 }
 0x45a   : > { %7261 = vmatpush3.xpose.msra.mxu1 %v3845_v55  ;;  %v7161_v8 = vpop.f32.mrf.mxu0  ;;  %7262 = vmatprep.mubr.msk.f32.mxu1 %vm7302_vm1, %v7301_v2 }
 0x45b   : > { %v3824_v34 = vadd.f32 %v9252_v13, %v3796_v5  ;;  %7265 = vmatprep.subr.mxu1 %v7301_v2 }
 0x45c   : > { %v3773_v45 = vpop.f32.mrf.mxu0 }
 0x45d   : > { %v3797_v56 = vadd.f32 %v3773_v45, %v9245_v42  ;;  %7263 = vmatmul.mubr.f32.vlgmr.msra.gmra.mxu1 %v3824_v34 }
 0x45e   : > { %7266 = vmatpush3.xpose.msra.mxu1 %v3846_v36  ;;  %v7164_v59 = vpop.f32.mrf.mxu0  ;;  %7267 = vmatprep.mubr.msk.f32.mxu1 %vm7302_vm1, %v7301_v2 }
 0x45f   : > { %v3825_v52 = vadd.f32 %v9252_v13, %v3797_v56 }
 0x460   : > { %v9414_v3 = vpop.f32.mrf.mxu0 }
 0x461   : > { %7268 = vmatmul.mubr.f32.vlgmr.msra.gmra.mxu1 %v3825_v52 }
 0x462   : > { %v7276_v12 = vpop.f32.mrf.mxu0 }
 0x4d1   : > { %v3913_v24 = vpop.f32.mrf.mxu1 }
 0x4d2   : > { %v5319_v54 = vsel %vm5318_vm7, %v3913_v24, 0.0 }
 0x4d3   : > { %v7169_v50 = vpop.f32.mrf.mxu1 }
 0x4d5   : > { %v3983_v31 = vpop.f32.mrf.mxu1 }
 0x4d6   : > { %v5320_v44 = vsel %vm5318_vm7, %v3983_v31, 0.0 }
 0x4d7   : > { %v7174_v18 = vpop.f32.mrf.mxu1  ;;  %v5321_v7 = vadd.f32 %v5320_v44, %v5319_v54  ;;  %v5863_v44 = vld [vmem:[%s9462_s10] ss:$0 sm:$0xff] }
 0x4d9   : > { %v4053_v14 = vpop.f32.mrf.mxu1 }
 0x4da   : > { %v5322_v63 = vsel %vm5318_vm7, %v4053_v14, 0.0 }
 0x4db   : > { %v7179_v21 = vpop.f32.mrf.mxu1  ;;  %v5323_v10 = vadd.f32 %v5322_v63, %v5321_v7  ;;  %v5452_v7 = vpop.permute.xlu0 %5451 }
 0x4dd   : > { %v4123_v16 = vpop.f32.mrf.mxu1 }
 0x4de   : > { %v5324_v32 = vsel %vm5318_vm7, %v4123_v16, 0.0 }
 0x4df   : > { %v7184_v42 = vpop.f32.mrf.mxu1  ;;  %v5325_v39 = vadd.f32 %v5324_v32, %v5323_v10 }
 0x4e1   : > { %v4193_v30 = vpop.f32.mrf.mxu1 }
 0x4e2   : > { %v5326_v28 = vsel %vm5318_vm7, %v4193_v30, 0.0 }
 0x4e3   : > { %v7189_v0 = vpop.f32.mrf.mxu1  ;;  %v5327_v37 = vadd.f32 %v5326_v28, %v5325_v39 }
 0x4e5   : > { %v4263_v40 = vpop.f32.mrf.mxu1 }
 0x4e6   : > { %v5328_v49 = vsel %vm5318_vm7, %v4263_v40, 0.0 }
 0x4e7   : > { %v7194_v15 = vpop.f32.mrf.mxu1  ;;  %v5329_v11 = vadd.f32 %v5328_v49, %v5327_v37 }
 0x4e9   : > { %v4333_v27 = vpop.f32.mrf.mxu1 }
 0x4ea   : > { %v5330_v60 = vsel %vm5318_vm7, %v4333_v27, 0.0 }
 0x4eb   : > { %v7199_v2 = vpop.f32.mrf.mxu1  ;;  %v5331_v43 = vadd.f32 %v5330_v60, %v5329_v11 }
 0x4ed   : > { %v4403_v19 = vpop.f32.mrf.mxu1 }
 0x4ee   : > { %v5332_v57 = vsel %vm5318_vm7, %v4403_v19, 0.0 }
 0x4ef   : > { %v7204_v13 = vpop.f32.mrf.mxu1  ;;  %v5333_v46 = vadd.f32 %v5332_v57, %v5331_v43 }
 0x4f1   : > { %v4473_v51 = vpop.f32.mrf.mxu1 }
 0x4f2   : > { %v5334_v38 = vsel %vm5318_vm7, %v4473_v51, 0.0 }
 0x4f3   : > { %v7209_v41 = vpop.f32.mrf.mxu1  ;;  %v5335_v17 = vadd.f32 %v5334_v38, %v5333_v46 }
 0x4f5   : > { %v4543_v20 = vpop.f32.mrf.mxu1 }
 0x4f6   : > { %v5336_v35 = vsel %vm5318_vm7, %v4543_v20, 0.0 }
 0x4f7   : > { %v7214_v29 = vpop.f32.mrf.mxu1  ;;  %v5337_v23 = vadd.f32 %v5336_v35, %v5335_v17 }
 0x4f9   : > { %v4613_v48 = vpop.f32.mrf.mxu1 }
 0x4fa   : > { %v5338_v4 = vsel %vm5318_vm7, %v4613_v48, 0.0 }
 0x4fb   : > { %v7219_v1 = vpop.f32.mrf.mxu1  ;;  %v5339_v26 = vadd.f32 %v5338_v4, %v5337_v23 }
 0x4fd   : > { %v4683_v58 = vpop.f32.mrf.mxu1 }
 0x4fe   : > { %v5340_v55 = vsel %vm5318_vm7, %v4683_v58, 0.0 }
 0x4ff   : > { %v7224_v22 = vpop.f32.mrf.mxu1  ;;  %v5341_v34 = vadd.f32 %v5340_v55, %v5339_v26 }
 0x501   : > { %v4753_v47 = vpop.f32.mrf.mxu1 }
 0x502   : > { %v5342_v8 = vsel %vm5318_vm7, %v4753_v47, 0.0 }
 0x503   : > { %v7229_v6 = vpop.f32.mrf.mxu1  ;;  %v5343_v56 = vadd.f32 %v5342_v8, %v5341_v34 }
 0x505   : > { %v4823_v9 = vpop.f32.mrf.mxu1 }
 0x506   : > { %v5344_v45 = vsel %vm5318_vm7, %v4823_v9, 0.0 }
 0x507   : > { %v7234_v33 = vpop.f32.mrf.mxu1  ;;  %v5345_v12 = vadd.f32 %v5344_v45, %v5343_v56 }
 0x509   : > { %v4893_v62 = vpop.f32.mrf.mxu1 }
 0x50a   : > { %v5346_v52 = vsel %vm5318_vm7, %v4893_v62, 0.0 }
 0x50b   : > { %v7239_v53 = vpop.f32.mrf.mxu1  ;;  %v5347_v31 = vadd.f32 %v5346_v52, %v5345_v12 }
 0x50d   : > { %v4963_v61 = vpop.f32.mrf.mxu1 }
 0x50e   : > { %v5348_v50 = vsel %vm5318_vm7, %v4963_v61, 0.0 }
 0x50f   : > { %v7244_v5 = vpop.f32.mrf.mxu1  ;;  %v5349_v21 = vadd.f32 %v5348_v50, %v5347_v31 }
 0x511   : > { %v5033_v36 = vpop.f32.mrf.mxu1 }
 0x512   : > { %v5350_v14 = vsel %vm5318_vm7, %v5033_v36, 0.0 }
 0x513   : > { %v7249_v59 = vpop.f32.mrf.mxu1  ;;  %v5351_v30 = vadd.f32 %v5350_v14, %v5349_v21 }
 0x515   : > { %v5103_v24 = vpop.f32.mrf.mxu1 }
 0x516   : > { %v5352_v42 = vsel %vm5318_vm7, %v5103_v24, 0.0 }
 0x517   : > { %v7254_v18 = vpop.f32.mrf.mxu1  ;;  %v5353_v15 = vadd.f32 %v5352_v42, %v5351_v30 }
 0x519   : > { %v5173_v16 = vpop.f32.mrf.mxu1 }
 0x51a   : > { %v5354_v40 = vsel %vm5318_vm7, %v5173_v16, 0.0 }
 0x51b   : > { %v7259_v0 = vpop.f32.mrf.mxu1  ;;  %v5355_v19 = vadd.f32 %v5354_v40, %v5353_v15 }
 0x51d   : > { %v5243_v27 = vpop.f32.mrf.mxu1 }
 0x51e   : > { %v5356_v2 = vsel %vm5318_vm7, %v5243_v27, 0.0 }
 0x51f   : > { %v7264_v13 = vpop.f32.mrf.mxu1  ;;  %v5357_v51 = vadd.f32 %v5356_v2, %v5355_v19 }
 0x521   : > { %v5313_v41 = vpop.f32.mrf.mxu1 }
 0x522   : > { %v5358_v20 = vsel %vm5318_vm7, %v5313_v41, 0.0 }
 0x523   : > { %v5359_v29 = vadd.f32 %v5358_v20, %v5357_v51  ;;  %v7269_v48 = vpop.f32.mrf.mxu1 }
 0x525   : > { %v5440_v1 = vadd.f32 %v9414_v3, %v5359_v29 }
 0x527   : > { %v5448_v54 = vadd.f32 %v5863_v44, %v5440_v1 }
 0x529   : > { %v5449_v63 = vmul.f32 1.442695, %v5448_v54 }
 0x52b   : > { %7289 = vpow2.f32 %v5449_v63 }
 0x538   : > { %v7290_v58 = vpop.eup %7289 }
 0x539   : > { %v5454_v32 = vmul.f32 %v7290_v58, %v5452_v7 }
 0x53b   : > { %v5455_v10 = vsel %vm5318_vm7, %v5454_v32, 0.0 }
 0x53c   : > { %5456 = vadd.xlane.f32.xlu0 %v5455_v10 }
 0x5c5   : > { %v5457_v22 = vpop.xlane.xlu0 %5456 }
 0x5c6   : > { %v5458_v28 = vadd.f32 1e-05, %v5457_v22 }
 0x5c8   : > { %7291 = vrcp.f32 %v5458_v28 }
 0x5d5   : > { %v7292_v39 = vpop.eup %7291 }
 0x5d6   : > { %v5460_v47 = vmul.f32 %v7292_v39, %v5454_v32 }
 0x5d8   : > { %v5461_v49 = vmul.f32 %v5460_v47, %v9223_v25 }
 0x5da   : > { %v5462_v37 = vsel %vm5318_vm7, %v5461_v49, 0.0 }
 0x5db   : > { %5463 = vadd.xlane.f32.xlu1 %v5462_v37 }
 0x664   : > { %v5464_v3 = vpop.xlane.xlu1 %5463 }
 0x665   : > { %5466 = vst.msk [vmem:[%s401_s26] sm:$0xff] %vm5465_vm8, %v5464_v3 }
 0x666 PF: > { %s21_s17 = sadd.s32 1, %s7299_s17  }
 0x667   : > { %p18_p4 = scmp.ge.s32.totalorder %s21_s17, 4  }
 0x669   :  { %20 = sbr.rel (!%p18_p4) target bundleno = 1 (0x1), region = 107 }

</bundles_post_ra>
